<compile_context>
chip_gen: v6e
topology: v6e:2x2x1
jax: 0.10.0
libtpu: 0.0.40
codegen_flags: <defaults>
</compile_context>

<pallas_src>
import functools

import jax
import jax.numpy as jnp
from jax.experimental import pallas as pl
from jax.experimental.pallas import tpu as pltpu


# ----------------------------------------------------------------------------
# Fused kernel: whole model in one invocation (no grid).
# ----------------------------------------------------------------------------
def _fused_kernel(x_ref, wck_ref, bc_ref, w1e_ref, b1_ref, w2_ref, b2_ref,
                  o_ref, xp_scr):
    # x_ref  : [B, C_in, T]        raw input (PyTorch NCL layout)
    # wck_ref: [3, C_out, C_in]    conv weight, tap-major (prepped once)
    # bc_ref : [C_out, 1]          conv bias (column -> broadcasts along time lanes)
    # w1e_ref: [C_out, Tm, NH]     FC1 weight, pool-expanded: w1e[c, 2p, j] = W1[j, c*P+p],
    #                              zeros at odd time offsets (absorbs MaxPool stride-2)
    # b1_ref : [1, NH]
    # w2_ref : [NH, 1]
    # b2_ref : [1, 1]
    # o_ref  : [B, 1]
    # xp_scr : VMEM [C_in, B*BLK + 4]  zero-padded, batch-folded input
    B, C_in, T = x_ref.shape
    _, C_out, _ = wck_ref.shape
    _, Tm, NH = w1e_ref.shape
    Wxp = xp_scr.shape[1]
    BLK = (Wxp - 4) // B          # lane stride between batch elements (>= T + 2)
    Wc = B * BLK + 2              # conv output width over the folded batch

    # ---- in-kernel Conv1d padding: zero the scratch, drop each x[b] at lane b*BLK+1 ----
    xp_scr[...] = jnp.zeros(xp_scr.shape, xp_scr.dtype)
    for b in range(B):            # B is tiny and static
        xp_scr[:, b * BLK + 1: b * BLK + 1 + T] = x_ref[b]
    xp = xp_scr[...]              # [C_in, Wxp]

    # ---- Conv1d(k=3, s=1, p=1): 3 shifted MXU matmuls over the folded batch ----
    #   conv[:, b*BLK + t] = sum_k W_k @ xpad_b[:, t + k]
    conv = jnp.zeros((C_out, Wc), jnp.float32)
    for k in range(3):
        conv = conv + jnp.dot(wck_ref[k], xp[:, k:k + Wc],
                              preferred_element_type=jnp.float32)
    relu = jnp.maximum(conv + bc_ref[...], 0.0)                 # [C_out, Wc]

    # ---- MaxPool1d(k=3, s=2): 3-tap max at full resolution on the VPU.
    #      The stride-2 selection is absorbed into w1e (zero weights at odd t). ----
    W = B * BLK
    m_full = jnp.maximum(jnp.maximum(relu[:, 0:W], relu[:, 1:W + 1]),
                         relu[:, 2:W + 2])                      # [C_out, W]

    # ---- FC1 + ReLU, flatten-free: accumulate per-channel [B,Tm] @ [Tm,NH] matmuls ----
    feats = jnp.stack([m_full[:, b * BLK: b * BLK + Tm] for b in range(B)],
                      axis=0)                                    # [B, C_out, Tm]
    h = jnp.zeros((B, NH), jnp.float32)
    for c in range(C_out):
        h = h + jnp.dot(feats[:, c, :], w1e_ref[c],
                        preferred_element_type=jnp.float32)
    h = jnp.maximum(h + b1_ref[...], 0.0)                        # [B, NH]

    # ---- FC2 + Sigmoid ----
    y = jnp.dot(h, w2_ref[...], preferred_element_type=jnp.float32) + b2_ref[...]
    o_ref[...] = (1.0 / (1.0 + jnp.exp(-y))).astype(o_ref.dtype)


# ----------------------------------------------------------------------------
# One-time parameter preparation (hoisted out of the per-call forward path).
# ----------------------------------------------------------------------------
def prepare_params(params):
    conv_w, conv_b = params["conv_w"], params["conv_b"]   # [C_out,C_in,3], [C_out]
    fc1_w, fc1_b = params["fc1_w"], params["fc1_b"]        # [NH, C_out*P], [NH]
    fc2_w, fc2_b = params["fc2_w"], params["fc2_b"]        # [1, NH], [1]
    C_out, C_in, K = conv_w.shape
    assert K == 3
    NH, F = fc1_w.shape
    P = F // C_out
    Tm = 2 * P - 1                                         # full-res time positions used

    wck = jnp.transpose(conv_w, (2, 0, 1))                 # [3, C_out, C_in]
    bc = conv_b.reshape(C_out, 1)
    # Pool-expanded FC1 weight: even time offsets carry the real weights, odd are 0.
    w1r = jnp.transpose(fc1_w.reshape(NH, C_out, P), (1, 2, 0))   # [C_out, P, NH]
    w1e = jnp.zeros((C_out, Tm, NH), fc1_w.dtype).at[:, 0::2, :].set(w1r)
    b1 = fc1_b.reshape(1, NH)
    w2 = jnp.transpose(fc2_w)                              # [NH, 1]
    b2 = fc2_b.reshape(1, 1)
    return {"wck": wck, "bc": bc, "w1e": w1e, "b1": b1, "w2": w2, "b2": b2}


# ----------------------------------------------------------------------------
# Forward wrapper: exactly one pallas_call, no per-call prep ops.
# ----------------------------------------------------------------------------
@jax.jit
def simple_wake_word_forward(x, prepped):
    """x: [B, n_mfcc, num_frames] float32 (PyTorch NCL). Returns [B, 1]."""
    B, C_in, T = x.shape
    # Per-batch lane stride in the folded layout: 128-aligned and >= T + 2.
    BLK = ((T + 2 + 127) // 128) * 128
    Wxp = B * BLK + 4

    vmem = pl.BlockSpec(memory_space=pltpu.MemorySpace.VMEM)
    out = pl.pallas_call(
        _fused_kernel,
        out_shape=jax.ShapeDtypeStruct((B, 1), x.dtype),
        in_specs=[vmem] * 7,
        out_specs=vmem,
        scratch_shapes=[pltpu.VMEM((C_in, Wxp), jnp.float32)],
    )(x, prepped["wck"], prepped["bc"], prepped["w1e"],
      prepped["b1"], prepped["w2"], prepped["b2"])
    return out


# ----------------------------------------------------------------------------
# Pure-JAX reference (mirrors the PyTorch forward exactly)
# ----------------------------------------------------------------------------
def reference_forward(x, params):
    wc, bc, w1, b1, w2, b2 = (params[k] for k in
                              ("conv_w", "conv_b", "fc1_w", "fc1_b", "fc2_w", "fc2_b"))
    y = jax.lax.conv_general_dilated(
        x, wc, window_strides=(1,), padding=((1, 1),),
        dimension_numbers=("NCH", "OIH", "NCH"))
    y = jnp.maximum(y + bc[None, :, None], 0.0)
    y = jax.lax.reduce_window(y, -jnp.inf, jax.lax.max,
                              window_dimensions=(1, 1, 3),
                              window_strides=(1, 1, 2),
                              padding="VALID")
    y = y.reshape(y.shape[0], -1)
    y = jnp.maximum(y @ w1.T + b1, 0.0)
    return jax.nn.sigmoid(y @ w2.T + b2)


# ----------------------------------------------------------------------------
def make_params(key, n_mfcc, num_frames):
    P = (num_frames - 3) // 2 + 1
    fc_in = 32 * P
    ks = jax.random.split(key, 6)
    return {
        "conv_w": jax.random.normal(ks[0], (32, n_mfcc, 3), jnp.float32) * 0.1,
        "conv_b": jax.random.normal(ks[1], (32,), jnp.float32) * 0.1,
        "fc1_w": jax.random.normal(ks[2], (64, fc_in), jnp.float32) * 0.05,
        "fc1_b": jax.random.normal(ks[3], (64,), jnp.float32) * 0.05,
        "fc2_w": jax.random.normal(ks[4], (1, 64), jnp.float32) * 0.05,
        "fc2_b": jax.random.normal(ks[5], (1,), jnp.float32) * 0.05,
    }


if __name__ == "__main__":
    B, n_mfcc, num_frames = 2, 13, 101  # module defaults; batch kept small
    key = jax.random.PRNGKey(0)
    k_x, k_p = jax.random.split(key)
    x = jax.random.normal(k_x, (B, n_mfcc, num_frames), jnp.float32)
    params = make_params(k_p, n_mfcc, num_frames)

    prepped = prepare_params(params)        # one-time weight prep (hoisted)

    out = simple_wake_word_forward(x, prepped)
    out = jax.block_until_ready(out)

    ref = reference_forward(x, params)
    assert out.shape == (B, 1)
    assert jnp.allclose(out, ref, rtol=1e-4, atol=1e-5), (out, ref)
    print("KERNEL_OK")
</pallas_src>

<mosaic_0001>
module attributes {stable_mosaic.version = 11 : i64} {
  func.func @_fused_kernel(%arg0: memref<2x13x101xf32, #tpu.memory_space<vmem>>, %arg1: memref<3x32x13xf32, #tpu.memory_space<vmem>>, %arg2: memref<32x1xf32, #tpu.memory_space<vmem>>, %arg3: memref<32x99x64xf32, #tpu.memory_space<vmem>>, %arg4: memref<1x64xf32, #tpu.memory_space<vmem>>, %arg5: memref<64x1xf32, #tpu.memory_space<vmem>>, %arg6: memref<1x1xf32, #tpu.memory_space<vmem>>, %arg7: memref<2x1xf32, #tpu.memory_space<vmem>>, %arg8: memref<13x260xf32, #tpu.memory_space<vmem>>) attributes {dimension_semantics = [], scalar_prefetch = 0 : i64, scratch_operands = 1 : i64, tpu.core_type = #tpu.core_type<tc>} {
    %cst = arith.constant 0.000000e+00 : f32
    %0 = vector.broadcast %cst : f32 to vector<13x260xf32>
    %c0 = arith.constant 0 : index
    %c0_0 = arith.constant 0 : index
    %1 = vector.load %arg8[%c0, %c0_0] : memref<13x260xf32, #tpu.memory_space<vmem>>, vector<13x260xf32>
    tpu.vector_store %arg8[%c0, %c0_0], %0 {strides = array<i32>} : memref<13x260xf32, #tpu.memory_space<vmem>>, vector<13x260xf32>,
    %c0_1 = arith.constant 0 : index
    %c0_2 = arith.constant 0 : index
    %c0_3 = arith.constant 0 : index
    %2 = vector.load %arg0[%c0_1, %c0_2, %c0_3] : memref<2x13x101xf32, #tpu.memory_space<vmem>>, vector<1x13x101xf32>
    %3 = vector.shape_cast %2 : vector<1x13x101xf32> to vector<13x101xf32>
    %c0_4 = arith.constant 0 : index
    %c1 = arith.constant 1 : index
    %4 = vector.load %arg8[%c0_4, %c1] : memref<13x260xf32, #tpu.memory_space<vmem>>, vector<13x101xf32>
    tpu.vector_store %arg8[%c0_4, %c1], %3 {strides = array<i32>} : memref<13x260xf32, #tpu.memory_space<vmem>>, vector<13x101xf32>,
    %c1_5 = arith.constant 1 : index
    %c0_6 = arith.constant 0 : index
    %c0_7 = arith.constant 0 : index
    %5 = vector.load %arg0[%c1_5, %c0_6, %c0_7] : memref<2x13x101xf32, #tpu.memory_space<vmem>>, vector<1x13x101xf32>
    %6 = vector.shape_cast %5 : vector<1x13x101xf32> to vector<13x101xf32>
    %c0_8 = arith.constant 0 : index
    %c129 = arith.constant 129 : index
    %7 = vector.load %arg8[%c0_8, %c129] : memref<13x260xf32, #tpu.memory_space<vmem>>, vector<13x101xf32>
    tpu.vector_store %arg8[%c0_8, %c129], %6 {strides = array<i32>} : memref<13x260xf32, #tpu.memory_space<vmem>>, vector<13x101xf32>,
    %c0_9 = arith.constant 0 : index
    %c0_10 = arith.constant 0 : index
    %8 = vector.load %arg8[%c0_9, %c0_10] : memref<13x260xf32, #tpu.memory_space<vmem>>, vector<13x260xf32>
    %cst_11 = arith.constant 0.000000e+00 : f32
    %9 = vector.broadcast %cst_11 : f32 to vector<32x258xf32>
    %c0_12 = arith.constant 0 : index
    %c0_13 = arith.constant 0 : index
    %c0_14 = arith.constant 0 : index
    %10 = vector.load %arg1[%c0_12, %c0_13, %c0_14] : memref<3x32x13xf32, #tpu.memory_space<vmem>>, vector<1x32x13xf32>
    %11 = vector.shape_cast %10 : vector<1x32x13xf32> to vector<32x13xf32>
    %12 = vector.extract_strided_slice %8 {offsets = [0, 0], sizes = [13, 258], strides = [1, 1]} : vector<13x260xf32> to vector<13x258xf32>
    %cst_15 = arith.constant dense<0.000000e+00> : vector<32x258xf32>
    %13 = tpu.matmul %11, %12, %cst_15 {dimension_numbers = #tpu.dot_dimension_numbers<[1], [0], [0], [1], [0, 0, 1, 1], [], []>} : vector<32x13xf32>, vector<13x258xf32>, vector<32x258xf32> -> vector<32x258xf32>
    %14 = arith.addf %9, %13 : vector<32x258xf32>
    %c1_16 = arith.constant 1 : index
    %c0_17 = arith.constant 0 : index
    %c0_18 = arith.constant 0 : index
    %15 = vector.load %arg1[%c1_16, %c0_17, %c0_18] : memref<3x32x13xf32, #tpu.memory_space<vmem>>, vector<1x32x13xf32>
    %16 = vector.shape_cast %15 : vector<1x32x13xf32> to vector<32x13xf32>
    %17 = vector.extract_strided_slice %8 {offsets = [0, 1], sizes = [13, 258], strides = [1, 1]} : vector<13x260xf32> to vector<13x258xf32>
    %cst_19 = arith.constant dense<0.000000e+00> : vector<32x258xf32>
    %18 = tpu.matmul %16, %17, %cst_19 {dimension_numbers = #tpu.dot_dimension_numbers<[1], [0], [0], [1], [0, 0, 1, 1], [], []>} : vector<32x13xf32>, vector<13x258xf32>, vector<32x258xf32> -> vector<32x258xf32>
    %19 = arith.addf %14, %18 : vector<32x258xf32>
    %c2 = arith.constant 2 : index
    %c0_20 = arith.constant 0 : index
    %c0_21 = arith.constant 0 : index
    %20 = vector.load %arg1[%c2, %c0_20, %c0_21] : memref<3x32x13xf32, #tpu.memory_space<vmem>>, vector<1x32x13xf32>
    %21 = vector.shape_cast %20 : vector<1x32x13xf32> to vector<32x13xf32>
    %22 = vector.extract_strided_slice %8 {offsets = [0, 2], sizes = [13, 258], strides = [1, 1]} : vector<13x260xf32> to vector<13x258xf32>
    %cst_22 = arith.constant dense<0.000000e+00> : vector<32x258xf32>
    %23 = tpu.matmul %21, %22, %cst_22 {dimension_numbers = #tpu.dot_dimension_numbers<[1], [0], [0], [1], [0, 0, 1, 1], [], []>} : vector<32x13xf32>, vector<13x258xf32>, vector<32x258xf32> -> vector<32x258xf32>
    %24 = arith.addf %19, %23 : vector<32x258xf32>
    %c0_23 = arith.constant 0 : index
    %c0_24 = arith.constant 0 : index
    %25 = vector.load %arg2[%c0_23, %c0_24] : memref<32x1xf32, #tpu.memory_space<vmem>>, vector<32x1xf32>
    %26 = vector.broadcast %25 : vector<32x1xf32> to vector<32x258xf32>
    %27 = arith.addf %24, %26 : vector<32x258xf32>
    %cst_25 = arith.constant 0.000000e+00 : f32
    %28 = vector.broadcast %cst_25 : f32 to vector<32x258xf32>
    %29 = arith.maximumf %27, %28 : vector<32x258xf32>
    %30 = vector.extract_strided_slice %29 {offsets = [0, 0], sizes = [32, 256], strides = [1, 1]} : vector<32x258xf32> to vector<32x256xf32>
    %31 = vector.extract_strided_slice %29 {offsets = [0, 1], sizes = [32, 256], strides = [1, 1]} : vector<32x258xf32> to vector<32x256xf32>
    %32 = arith.maximumf %30, %31 : vector<32x256xf32>
    %33 = vector.extract_strided_slice %29 {offsets = [0, 2], sizes = [32, 256], strides = [1, 1]} : vector<32x258xf32> to vector<32x256xf32>
    %34 = arith.maximumf %32, %33 : vector<32x256xf32>
    %35 = vector.extract_strided_slice %34 {offsets = [0, 0], sizes = [32, 99], strides = [1, 1]} : vector<32x256xf32> to vector<32x99xf32>
    %36 = vector.extract_strided_slice %34 {offsets = [0, 128], sizes = [32, 99], strides = [1, 1]} : vector<32x256xf32> to vector<32x99xf32>
    %37 = vector.shape_cast %35 : vector<32x99xf32> to vector<1x32x99xf32>
    %38 = vector.shape_cast %36 : vector<32x99xf32> to vector<1x32x99xf32>
    %39 = tpu.concatenate %37, %38 in 0 : vector<1x32x99xf32>, vector<1x32x99xf32> -> vector<2x32x99xf32>
    %cst_26 = arith.constant 0.000000e+00 : f32
    %40 = vector.broadcast %cst_26 : f32 to vector<2x64xf32>
    %41 = vector.extract_strided_slice %39 {offsets = [0, 0, 0], sizes = [2, 1, 99], strides = [1, 1, 1]} : vector<2x32x99xf32> to vector<2x1x99xf32>
    %42 = vector.shape_cast %41 : vector<2x1x99xf32> to vector<2x99xf32>
    %c0_27 = arith.constant 0 : index
    %c0_28 = arith.constant 0 : index
    %c0_29 = arith.constant 0 : index
    %43 = vector.load %arg3[%c0_27, %c0_28, %c0_29] : memref<32x99x64xf32, #tpu.memory_space<vmem>>, vector<1x99x64xf32>
    %44 = vector.shape_cast %43 : vector<1x99x64xf32> to vector<99x64xf32>
    %cst_30 = arith.constant dense<0.000000e+00> : vector<2x64xf32>
    %45 = tpu.matmul %42, %44, %cst_30 {dimension_numbers = #tpu.dot_dimension_numbers<[1], [0], [0], [1], [0, 0, 1, 1], [], []>} : vector<2x99xf32>, vector<99x64xf32>, vector<2x64xf32> -> vector<2x64xf32>
    %46 = arith.addf %40, %45 : vector<2x64xf32>
    %47 = vector.extract_strided_slice %39 {offsets = [0, 1, 0], sizes = [2, 1, 99], strides = [1, 1, 1]} : vector<2x32x99xf32> to vector<2x1x99xf32>
    %48 = vector.shape_cast %47 : vector<2x1x99xf32> to vector<2x99xf32>
    %c1_31 = arith.constant 1 : index
    %c0_32 = arith.constant 0 : index
    %c0_33 = arith.constant 0 : index
    %49 = vector.load %arg3[%c1_31, %c0_32, %c0_33] : memref<32x99x64xf32, #tpu.memory_space<vmem>>, vector<1x99x64xf32>
    %50 = vector.shape_cast %49 : vector<1x99x64xf32> to vector<99x64xf32>
    %cst_34 = arith.constant dense<0.000000e+00> : vector<2x64xf32>
    %51 = tpu.matmul %48, %50, %cst_34 {dimension_numbers = #tpu.dot_dimension_numbers<[1], [0], [0], [1], [0, 0, 1, 1], [], []>} : vector<2x99xf32>, vector<99x64xf32>, vector<2x64xf32> -> vector<2x64xf32>
    %52 = arith.addf %46, %51 : vector<2x64xf32>
    %53 = vector.extract_strided_slice %39 {offsets = [0, 2, 0], sizes = [2, 1, 99], strides = [1, 1, 1]} : vector<2x32x99xf32> to vector<2x1x99xf32>
    %54 = vector.shape_cast %53 : vector<2x1x99xf32> to vector<2x99xf32>
    %c2_35 = arith.constant 2 : index
    %c0_36 = arith.constant 0 : index
    %c0_37 = arith.constant 0 : index
    %55 = vector.load %arg3[%c2_35, %c0_36, %c0_37] : memref<32x99x64xf32, #tpu.memory_space<vmem>>, vector<1x99x64xf32>
    %56 = vector.shape_cast %55 : vector<1x99x64xf32> to vector<99x64xf32>
    %cst_38 = arith.constant dense<0.000000e+00> : vector<2x64xf32>
    %57 = tpu.matmul %54, %56, %cst_38 {dimension_numbers = #tpu.dot_dimension_numbers<[1], [0], [0], [1], [0, 0, 1, 1], [], []>} : vector<2x99xf32>, vector<99x64xf32>, vector<2x64xf32> -> vector<2x64xf32>
    %58 = arith.addf %52, %57 : vector<2x64xf32>
    %59 = vector.extract_strided_slice %39 {offsets = [0, 3, 0], sizes = [2, 1, 99], strides = [1, 1, 1]} : vector<2x32x99xf32> to vector<2x1x99xf32>
    %60 = vector.shape_cast %59 : vector<2x1x99xf32> to vector<2x99xf32>
    %c3 = arith.constant 3 : index
    %c0_39 = arith.constant 0 : index
    %c0_40 = arith.constant 0 : index
    %61 = vector.load %arg3[%c3, %c0_39, %c0_40] : memref<32x99x64xf32, #tpu.memory_space<vmem>>, vector<1x99x64xf32>
    %62 = vector.shape_cast %61 : vector<1x99x64xf32> to vector<99x64xf32>
    %cst_41 = arith.constant dense<0.000000e+00> : vector<2x64xf32>
    %63 = tpu.matmul %60, %62, %cst_41 {dimension_numbers = #tpu.dot_dimension_numbers<[1], [0], [0], [1], [0, 0, 1, 1], [], []>} : vector<2x99xf32>, vector<99x64xf32>, vector<2x64xf32> -> vector<2x64xf32>
    %64 = arith.addf %58, %63 : vector<2x64xf32>
    %65 = vector.extract_strided_slice %39 {offsets = [0, 4, 0], sizes = [2, 1, 99], strides = [1, 1, 1]} : vector<2x32x99xf32> to vector<2x1x99xf32>
    %66 = vector.shape_cast %65 : vector<2x1x99xf32> to vector<2x99xf32>
    %c4 = arith.constant 4 : index
    %c0_42 = arith.constant 0 : index
    %c0_43 = arith.constant 0 : index
    %67 = vector.load %arg3[%c4, %c0_42, %c0_43] : memref<32x99x64xf32, #tpu.memory_space<vmem>>, vector<1x99x64xf32>
    %68 = vector.shape_cast %67 : vector<1x99x64xf32> to vector<99x64xf32>
    %cst_44 = arith.constant dense<0.000000e+00> : vector<2x64xf32>
    %69 = tpu.matmul %66, %68, %cst_44 {dimension_numbers = #tpu.dot_dimension_numbers<[1], [0], [0], [1], [0, 0, 1, 1], [], []>} : vector<2x99xf32>, vector<99x64xf32>, vector<2x64xf32> -> vector<2x64xf32>
    %70 = arith.addf %64, %69 : vector<2x64xf32>
    %71 = vector.extract_strided_slice %39 {offsets = [0, 5, 0], sizes = [2, 1, 99], strides = [1, 1, 1]} : vector<2x32x99xf32> to vector<2x1x99xf32>
    %72 = vector.shape_cast %71 : vector<2x1x99xf32> to vector<2x99xf32>
    %c5 = arith.constant 5 : index
    %c0_45 = arith.constant 0 : index
    %c0_46 = arith.constant 0 : index
    %73 = vector.load %arg3[%c5, %c0_45, %c0_46] : memref<32x99x64xf32, #tpu.memory_space<vmem>>, vector<1x99x64xf32>
    %74 = vector.shape_cast %73 : vector<1x99x64xf32> to vector<99x64xf32>
    %cst_47 = arith.constant dense<0.000000e+00> : vector<2x64xf32>
    %75 = tpu.matmul %72, %74, %cst_47 {dimension_numbers = #tpu.dot_dimension_numbers<[1], [0], [0], [1], [0, 0, 1, 1], [], []>} : vector<2x99xf32>, vector<99x64xf32>, vector<2x64xf32> -> vector<2x64xf32>
    %76 = arith.addf %70, %75 : vector<2x64xf32>
    %77 = vector.extract_strided_slice %39 {offsets = [0, 6, 0], sizes = [2, 1, 99], strides = [1, 1, 1]} : vector<2x32x99xf32> to vector<2x1x99xf32>
    %78 = vector.shape_cast %77 : vector<2x1x99xf32> to vector<2x99xf32>
    %c6 = arith.constant 6 : index
    %c0_48 = arith.constant 0 : index
    %c0_49 = arith.constant 0 : index
    %79 = vector.load %arg3[%c6, %c0_48, %c0_49] : memref<32x99x64xf32, #tpu.memory_space<vmem>>, vector<1x99x64xf32>
    %80 = vector.shape_cast %79 : vector<1x99x64xf32> to vector<99x64xf32>
    %cst_50 = arith.constant dense<0.000000e+00> : vector<2x64xf32>
    %81 = tpu.matmul %78, %80, %cst_50 {dimension_numbers = #tpu.dot_dimension_numbers<[1], [0], [0], [1], [0, 0, 1, 1], [], []>} : vector<2x99xf32>, vector<99x64xf32>, vector<2x64xf32> -> vector<2x64xf32>
    %82 = arith.addf %76, %81 : vector<2x64xf32>
    %83 = vector.extract_strided_slice %39 {offsets = [0, 7, 0], sizes = [2, 1, 99], strides = [1, 1, 1]} : vector<2x32x99xf32> to vector<2x1x99xf32>
    %84 = vector.shape_cast %83 : vector<2x1x99xf32> to vector<2x99xf32>
    %c7 = arith.constant 7 : index
    %c0_51 = arith.constant 0 : index
    %c0_52 = arith.constant 0 : index
    %85 = vector.load %arg3[%c7, %c0_51, %c0_52] : memref<32x99x64xf32, #tpu.memory_space<vmem>>, vector<1x99x64xf32>
    %86 = vector.shape_cast %85 : vector<1x99x64xf32> to vector<99x64xf32>
    %cst_53 = arith.constant dense<0.000000e+00> : vector<2x64xf32>
    %87 = tpu.matmul %84, %86, %cst_53 {dimension_numbers = #tpu.dot_dimension_numbers<[1], [0], [0], [1], [0, 0, 1, 1], [], []>} : vector<2x99xf32>, vector<99x64xf32>, vector<2x64xf32> -> vector<2x64xf32>
    %88 = arith.addf %82, %87 : vector<2x64xf32>
    %89 = vector.extract_strided_slice %39 {offsets = [0, 8, 0], sizes = [2, 1, 99], strides = [1, 1, 1]} : vector<2x32x99xf32> to vector<2x1x99xf32>
    %90 = vector.shape_cast %89 : vector<2x1x99xf32> to vector<2x99xf32>
    %c8 = arith.constant 8 : index
    %c0_54 = arith.constant 0 : index
    %c0_55 = arith.constant 0 : index
    %91 = vector.load %arg3[%c8, %c0_54, %c0_55] : memref<32x99x64xf32, #tpu.memory_space<vmem>>, vector<1x99x64xf32>
    %92 = vector.shape_cast %91 : vector<1x99x64xf32> to vector<99x64xf32>
    %cst_56 = arith.constant dense<0.000000e+00> : vector<2x64xf32>
    %93 = tpu.matmul %90, %92, %cst_56 {dimension_numbers = #tpu.dot_dimension_numbers<[1], [0], [0], [1], [0, 0, 1, 1], [], []>} : vector<2x99xf32>, vector<99x64xf32>, vector<2x64xf32> -> vector<2x64xf32>
    %94 = arith.addf %88, %93 : vector<2x64xf32>
    %95 = vector.extract_strided_slice %39 {offsets = [0, 9, 0], sizes = [2, 1, 99], strides = [1, 1, 1]} : vector<2x32x99xf32> to vector<2x1x99xf32>
    %96 = vector.shape_cast %95 : vector<2x1x99xf32> to vector<2x99xf32>
    %c9 = arith.constant 9 : index
    %c0_57 = arith.constant 0 : index
    %c0_58 = arith.constant 0 : index
    %97 = vector.load %arg3[%c9, %c0_57, %c0_58] : memref<32x99x64xf32, #tpu.memory_space<vmem>>, vector<1x99x64xf32>
    %98 = vector.shape_cast %97 : vector<1x99x64xf32> to vector<99x64xf32>
    %cst_59 = arith.constant dense<0.000000e+00> : vector<2x64xf32>
    %99 = tpu.matmul %96, %98, %cst_59 {dimension_numbers = #tpu.dot_dimension_numbers<[1], [0], [0], [1], [0, 0, 1, 1], [], []>} : vector<2x99xf32>, vector<99x64xf32>, vector<2x64xf32> -> vector<2x64xf32>
    %100 = arith.addf %94, %99 : vector<2x64xf32>
    %101 = vector.extract_strided_slice %39 {offsets = [0, 10, 0], sizes = [2, 1, 99], strides = [1, 1, 1]} : vector<2x32x99xf32> to vector<2x1x99xf32>
    %102 = vector.shape_cast %101 : vector<2x1x99xf32> to vector<2x99xf32>
    %c10 = arith.constant 10 : index
    %c0_60 = arith.constant 0 : index
    %c0_61 = arith.constant 0 : index
    %103 = vector.load %arg3[%c10, %c0_60, %c0_61] : memref<32x99x64xf32, #tpu.memory_space<vmem>>, vector<1x99x64xf32>
    %104 = vector.shape_cast %103 : vector<1x99x64xf32> to vector<99x64xf32>
    %cst_62 = arith.constant dense<0.000000e+00> : vector<2x64xf32>
    %105 = tpu.matmul %102, %104, %cst_62 {dimension_numbers = #tpu.dot_dimension_numbers<[1], [0], [0], [1], [0, 0, 1, 1], [], []>} : vector<2x99xf32>, vector<99x64xf32>, vector<2x64xf32> -> vector<2x64xf32>
    %106 = arith.addf %100, %105 : vector<2x64xf32>
    %107 = vector.extract_strided_slice %39 {offsets = [0, 11, 0], sizes = [2, 1, 99], strides = [1, 1, 1]} : vector<2x32x99xf32> to vector<2x1x99xf32>
    %108 = vector.shape_cast %107 : vector<2x1x99xf32> to vector<2x99xf32>
    %c11 = arith.constant 11 : index
    %c0_63 = arith.constant 0 : index
    %c0_64 = arith.constant 0 : index
    %109 = vector.load %arg3[%c11, %c0_63, %c0_64] : memref<32x99x64xf32, #tpu.memory_space<vmem>>, vector<1x99x64xf32>
    %110 = vector.shape_cast %109 : vector<1x99x64xf32> to vector<99x64xf32>
    %cst_65 = arith.constant dense<0.000000e+00> : vector<2x64xf32>
    %111 = tpu.matmul %108, %110, %cst_65 {dimension_numbers = #tpu.dot_dimension_numbers<[1], [0], [0], [1], [0, 0, 1, 1], [], []>} : vector<2x99xf32>, vector<99x64xf32>, vector<2x64xf32> -> vector<2x64xf32>
    %112 = arith.addf %106, %111 : vector<2x64xf32>
    %113 = vector.extract_strided_slice %39 {offsets = [0, 12, 0], sizes = [2, 1, 99], strides = [1, 1, 1]} : vector<2x32x99xf32> to vector<2x1x99xf32>
    %114 = vector.shape_cast %113 : vector<2x1x99xf32> to vector<2x99xf32>
    %c12 = arith.constant 12 : index
    %c0_66 = arith.constant 0 : index
    %c0_67 = arith.constant 0 : index
    %115 = vector.load %arg3[%c12, %c0_66, %c0_67] : memref<32x99x64xf32, #tpu.memory_space<vmem>>, vector<1x99x64xf32>
    %116 = vector.shape_cast %115 : vector<1x99x64xf32> to vector<99x64xf32>
    %cst_68 = arith.constant dense<0.000000e+00> : vector<2x64xf32>
    %117 = tpu.matmul %114, %116, %cst_68 {dimension_numbers = #tpu.dot_dimension_numbers<[1], [0], [0], [1], [0, 0, 1, 1], [], []>} : vector<2x99xf32>, vector<99x64xf32>, vector<2x64xf32> -> vector<2x64xf32>
    %118 = arith.addf %112, %117 : vector<2x64xf32>
    %119 = vector.extract_strided_slice %39 {offsets = [0, 13, 0], sizes = [2, 1, 99], strides = [1, 1, 1]} : vector<2x32x99xf32> to vector<2x1x99xf32>
    %120 = vector.shape_cast %119 : vector<2x1x99xf32> to vector<2x99xf32>
    %c13 = arith.constant 13 : index
    %c0_69 = arith.constant 0 : index
    %c0_70 = arith.constant 0 : index
    %121 = vector.load %arg3[%c13, %c0_69, %c0_70] : memref<32x99x64xf32, #tpu.memory_space<vmem>>, vector<1x99x64xf32>
    %122 = vector.shape_cast %121 : vector<1x99x64xf32> to vector<99x64xf32>
    %cst_71 = arith.constant dense<0.000000e+00> : vector<2x64xf32>
    %123 = tpu.matmul %120, %122, %cst_71 {dimension_numbers = #tpu.dot_dimension_numbers<[1], [0], [0], [1], [0, 0, 1, 1], [], []>} : vector<2x99xf32>, vector<99x64xf32>, vector<2x64xf32> -> vector<2x64xf32>
    %124 = arith.addf %118, %123 : vector<2x64xf32>
    %125 = vector.extract_strided_slice %39 {offsets = [0, 14, 0], sizes = [2, 1, 99], strides = [1, 1, 1]} : vector<2x32x99xf32> to vector<2x1x99xf32>
    %126 = vector.shape_cast %125 : vector<2x1x99xf32> to vector<2x99xf32>
    %c14 = arith.constant 14 : index
    %c0_72 = arith.constant 0 : index
    %c0_73 = arith.constant 0 : index
    %127 = vector.load %arg3[%c14, %c0_72, %c0_73] : memref<32x99x64xf32, #tpu.memory_space<vmem>>, vector<1x99x64xf32>
    %128 = vector.shape_cast %127 : vector<1x99x64xf32> to vector<99x64xf32>
    %cst_74 = arith.constant dense<0.000000e+00> : vector<2x64xf32>
    %129 = tpu.matmul %126, %128, %cst_74 {dimension_numbers = #tpu.dot_dimension_numbers<[1], [0], [0], [1], [0, 0, 1, 1], [], []>} : vector<2x99xf32>, vector<99x64xf32>, vector<2x64xf32> -> vector<2x64xf32>
    %130 = arith.addf %124, %129 : vector<2x64xf32>
    %131 = vector.extract_strided_slice %39 {offsets = [0, 15, 0], sizes = [2, 1, 99], strides = [1, 1, 1]} : vector<2x32x99xf32> to vector<2x1x99xf32>
    %132 = vector.shape_cast %131 : vector<2x1x99xf32> to vector<2x99xf32>
    %c15 = arith.constant 15 : index
    %c0_75 = arith.constant 0 : index
    %c0_76 = arith.constant 0 : index
    %133 = vector.load %arg3[%c15, %c0_75, %c0_76] : memref<32x99x64xf32, #tpu.memory_space<vmem>>, vector<1x99x64xf32>
    %134 = vector.shape_cast %133 : vector<1x99x64xf32> to vector<99x64xf32>
    %cst_77 = arith.constant dense<0.000000e+00> : vector<2x64xf32>
    %135 = tpu.matmul %132, %134, %cst_77 {dimension_numbers = #tpu.dot_dimension_numbers<[1], [0], [0], [1], [0, 0, 1, 1], [], []>} : vector<2x99xf32>, vector<99x64xf32>, vector<2x64xf32> -> vector<2x64xf32>
    %136 = arith.addf %130, %135 : vector<2x64xf32>
    %137 = vector.extract_strided_slice %39 {offsets = [0, 16, 0], sizes = [2, 1, 99], strides = [1, 1, 1]} : vector<2x32x99xf32> to vector<2x1x99xf32>
    %138 = vector.shape_cast %137 : vector<2x1x99xf32> to vector<2x99xf32>
    %c16 = arith.constant 16 : index
    %c0_78 = arith.constant 0 : index
    %c0_79 = arith.constant 0 : index
    %139 = vector.load %arg3[%c16, %c0_78, %c0_79] : memref<32x99x64xf32, #tpu.memory_space<vmem>>, vector<1x99x64xf32>
    %140 = vector.shape_cast %139 : vector<1x99x64xf32> to vector<99x64xf32>
    %cst_80 = arith.constant dense<0.000000e+00> : vector<2x64xf32>
    %141 = tpu.matmul %138, %140, %cst_80 {dimension_numbers = #tpu.dot_dimension_numbers<[1], [0], [0], [1], [0, 0, 1, 1], [], []>} : vector<2x99xf32>, vector<99x64xf32>, vector<2x64xf32> -> vector<2x64xf32>
    %142 = arith.addf %136, %141 : vector<2x64xf32>
    %143 = vector.extract_strided_slice %39 {offsets = [0, 17, 0], sizes = [2, 1, 99], strides = [1, 1, 1]} : vector<2x32x99xf32> to vector<2x1x99xf32>
    %144 = vector.shape_cast %143 : vector<2x1x99xf32> to vector<2x99xf32>
    %c17 = arith.constant 17 : index
    %c0_81 = arith.constant 0 : index
    %c0_82 = arith.constant 0 : index
    %145 = vector.load %arg3[%c17, %c0_81, %c0_82] : memref<32x99x64xf32, #tpu.memory_space<vmem>>, vector<1x99x64xf32>
    %146 = vector.shape_cast %145 : vector<1x99x64xf32> to vector<99x64xf32>
    %cst_83 = arith.constant dense<0.000000e+00> : vector<2x64xf32>
    %147 = tpu.matmul %144, %146, %cst_83 {dimension_numbers = #tpu.dot_dimension_numbers<[1], [0], [0], [1], [0, 0, 1, 1], [], []>} : vector<2x99xf32>, vector<99x64xf32>, vector<2x64xf32> -> vector<2x64xf32>
    %148 = arith.addf %142, %147 : vector<2x64xf32>
    %149 = vector.extract_strided_slice %39 {offsets = [0, 18, 0], sizes = [2, 1, 99], strides = [1, 1, 1]} : vector<2x32x99xf32> to vector<2x1x99xf32>
    %150 = vector.shape_cast %149 : vector<2x1x99xf32> to vector<2x99xf32>
    %c18 = arith.constant 18 : index
    %c0_84 = arith.constant 0 : index
    %c0_85 = arith.constant 0 : index
    %151 = vector.load %arg3[%c18, %c0_84, %c0_85] : memref<32x99x64xf32, #tpu.memory_space<vmem>>, vector<1x99x64xf32>
    %152 = vector.shape_cast %151 : vector<1x99x64xf32> to vector<99x64xf32>
    %cst_86 = arith.constant dense<0.000000e+00> : vector<2x64xf32>
    %153 = tpu.matmul %150, %152, %cst_86 {dimension_numbers = #tpu.dot_dimension_numbers<[1], [0], [0], [1], [0, 0, 1, 1], [], []>} : vector<2x99xf32>, vector<99x64xf32>, vector<2x64xf32> -> vector<2x64xf32>
    %154 = arith.addf %148, %153 : vector<2x64xf32>
    %155 = vector.extract_strided_slice %39 {offsets = [0, 19, 0], sizes = [2, 1, 99], strides = [1, 1, 1]} : vector<2x32x99xf32> to vector<2x1x99xf32>
    %156 = vector.shape_cast %155 : vector<2x1x99xf32> to vector<2x99xf32>
    %c19 = arith.constant 19 : index
    %c0_87 = arith.constant 0 : index
    %c0_88 = arith.constant 0 : index
    %157 = vector.load %arg3[%c19, %c0_87, %c0_88] : memref<32x99x64xf32, #tpu.memory_space<vmem>>, vector<1x99x64xf32>
    %158 = vector.shape_cast %157 : vector<1x99x64xf32> to vector<99x64xf32>
    %cst_89 = arith.constant dense<0.000000e+00> : vector<2x64xf32>
    %159 = tpu.matmul %156, %158, %cst_89 {dimension_numbers = #tpu.dot_dimension_numbers<[1], [0], [0], [1], [0, 0, 1, 1], [], []>} : vector<2x99xf32>, vector<99x64xf32>, vector<2x64xf32> -> vector<2x64xf32>
    %160 = arith.addf %154, %159 : vector<2x64xf32>
    %161 = vector.extract_strided_slice %39 {offsets = [0, 20, 0], sizes = [2, 1, 99], strides = [1, 1, 1]} : vector<2x32x99xf32> to vector<2x1x99xf32>
    %162 = vector.shape_cast %161 : vector<2x1x99xf32> to vector<2x99xf32>
    %c20 = arith.constant 20 : index
    %c0_90 = arith.constant 0 : index
    %c0_91 = arith.constant 0 : index
    %163 = vector.load %arg3[%c20, %c0_90, %c0_91] : memref<32x99x64xf32, #tpu.memory_space<vmem>>, vector<1x99x64xf32>
    %164 = vector.shape_cast %163 : vector<1x99x64xf32> to vector<99x64xf32>
    %cst_92 = arith.constant dense<0.000000e+00> : vector<2x64xf32>
    %165 = tpu.matmul %162, %164, %cst_92 {dimension_numbers = #tpu.dot_dimension_numbers<[1], [0], [0], [1], [0, 0, 1, 1], [], []>} : vector<2x99xf32>, vector<99x64xf32>, vector<2x64xf32> -> vector<2x64xf32>
    %166 = arith.addf %160, %165 : vector<2x64xf32>
    %167 = vector.extract_strided_slice %39 {offsets = [0, 21, 0], sizes = [2, 1, 99], strides = [1, 1, 1]} : vector<2x32x99xf32> to vector<2x1x99xf32>
    %168 = vector.shape_cast %167 : vector<2x1x99xf32> to vector<2x99xf32>
    %c21 = arith.constant 21 : index
    %c0_93 = arith.constant 0 : index
    %c0_94 = arith.constant 0 : index
    %169 = vector.load %arg3[%c21, %c0_93, %c0_94] : memref<32x99x64xf32, #tpu.memory_space<vmem>>, vector<1x99x64xf32>
    %170 = vector.shape_cast %169 : vector<1x99x64xf32> to vector<99x64xf32>
    %cst_95 = arith.constant dense<0.000000e+00> : vector<2x64xf32>
    %171 = tpu.matmul %168, %170, %cst_95 {dimension_numbers = #tpu.dot_dimension_numbers<[1], [0], [0], [1], [0, 0, 1, 1], [], []>} : vector<2x99xf32>, vector<99x64xf32>, vector<2x64xf32> -> vector<2x64xf32>
    %172 = arith.addf %166, %171 : vector<2x64xf32>
    %173 = vector.extract_strided_slice %39 {offsets = [0, 22, 0], sizes = [2, 1, 99], strides = [1, 1, 1]} : vector<2x32x99xf32> to vector<2x1x99xf32>
    %174 = vector.shape_cast %173 : vector<2x1x99xf32> to vector<2x99xf32>
    %c22 = arith.constant 22 : index
    %c0_96 = arith.constant 0 : index
    %c0_97 = arith.constant 0 : index
    %175 = vector.load %arg3[%c22, %c0_96, %c0_97] : memref<32x99x64xf32, #tpu.memory_space<vmem>>, vector<1x99x64xf32>
    %176 = vector.shape_cast %175 : vector<1x99x64xf32> to vector<99x64xf32>
    %cst_98 = arith.constant dense<0.000000e+00> : vector<2x64xf32>
    %177 = tpu.matmul %174, %176, %cst_98 {dimension_numbers = #tpu.dot_dimension_numbers<[1], [0], [0], [1], [0, 0, 1, 1], [], []>} : vector<2x99xf32>, vector<99x64xf32>, vector<2x64xf32> -> vector<2x64xf32>
    %178 = arith.addf %172, %177 : vector<2x64xf32>
    %179 = vector.extract_strided_slice %39 {offsets = [0, 23, 0], sizes = [2, 1, 99], strides = [1, 1, 1]} : vector<2x32x99xf32> to vector<2x1x99xf32>
    %180 = vector.shape_cast %179 : vector<2x1x99xf32> to vector<2x99xf32>
    %c23 = arith.constant 23 : index
    %c0_99 = arith.constant 0 : index
    %c0_100 = arith.constant 0 : index
    %181 = vector.load %arg3[%c23, %c0_99, %c0_100] : memref<32x99x64xf32, #tpu.memory_space<vmem>>, vector<1x99x64xf32>
    %182 = vector.shape_cast %181 : vector<1x99x64xf32> to vector<99x64xf32>
    %cst_101 = arith.constant dense<0.000000e+00> : vector<2x64xf32>
    %183 = tpu.matmul %180, %182, %cst_101 {dimension_numbers = #tpu.dot_dimension_numbers<[1], [0], [0], [1], [0, 0, 1, 1], [], []>} : vector<2x99xf32>, vector<99x64xf32>, vector<2x64xf32> -> vector<2x64xf32>
    %184 = arith.addf %178, %183 : vector<2x64xf32>
    %185 = vector.extract_strided_slice %39 {offsets = [0, 24, 0], sizes = [2, 1, 99], strides = [1, 1, 1]} : vector<2x32x99xf32> to vector<2x1x99xf32>
    %186 = vector.shape_cast %185 : vector<2x1x99xf32> to vector<2x99xf32>
    %c24 = arith.constant 24 : index
    %c0_102 = arith.constant 0 : index
    %c0_103 = arith.constant 0 : index
    %187 = vector.load %arg3[%c24, %c0_102, %c0_103] : memref<32x99x64xf32, #tpu.memory_space<vmem>>, vector<1x99x64xf32>
    %188 = vector.shape_cast %187 : vector<1x99x64xf32> to vector<99x64xf32>
    %cst_104 = arith.constant dense<0.000000e+00> : vector<2x64xf32>
    %189 = tpu.matmul %186, %188, %cst_104 {dimension_numbers = #tpu.dot_dimension_numbers<[1], [0], [0], [1], [0, 0, 1, 1], [], []>} : vector<2x99xf32>, vector<99x64xf32>, vector<2x64xf32> -> vector<2x64xf32>
    %190 = arith.addf %184, %189 : vector<2x64xf32>
    %191 = vector.extract_strided_slice %39 {offsets = [0, 25, 0], sizes = [2, 1, 99], strides = [1, 1, 1]} : vector<2x32x99xf32> to vector<2x1x99xf32>
    %192 = vector.shape_cast %191 : vector<2x1x99xf32> to vector<2x99xf32>
    %c25 = arith.constant 25 : index
    %c0_105 = arith.constant 0 : index
    %c0_106 = arith.constant 0 : index
    %193 = vector.load %arg3[%c25, %c0_105, %c0_106] : memref<32x99x64xf32, #tpu.memory_space<vmem>>, vector<1x99x64xf32>
    %194 = vector.shape_cast %193 : vector<1x99x64xf32> to vector<99x64xf32>
    %cst_107 = arith.constant dense<0.000000e+00> : vector<2x64xf32>
    %195 = tpu.matmul %192, %194, %cst_107 {dimension_numbers = #tpu.dot_dimension_numbers<[1], [0], [0], [1], [0, 0, 1, 1], [], []>} : vector<2x99xf32>, vector<99x64xf32>, vector<2x64xf32> -> vector<2x64xf32>
    %196 = arith.addf %190, %195 : vector<2x64xf32>
    %197 = vector.extract_strided_slice %39 {offsets = [0, 26, 0], sizes = [2, 1, 99], strides = [1, 1, 1]} : vector<2x32x99xf32> to vector<2x1x99xf32>
    %198 = vector.shape_cast %197 : vector<2x1x99xf32> to vector<2x99xf32>
    %c26 = arith.constant 26 : index
    %c0_108 = arith.constant 0 : index
    %c0_109 = arith.constant 0 : index
    %199 = vector.load %arg3[%c26, %c0_108, %c0_109] : memref<32x99x64xf32, #tpu.memory_space<vmem>>, vector<1x99x64xf32>
    %200 = vector.shape_cast %199 : vector<1x99x64xf32> to vector<99x64xf32>
    %cst_110 = arith.constant dense<0.000000e+00> : vector<2x64xf32>
    %201 = tpu.matmul %198, %200, %cst_110 {dimension_numbers = #tpu.dot_dimension_numbers<[1], [0], [0], [1], [0, 0, 1, 1], [], []>} : vector<2x99xf32>, vector<99x64xf32>, vector<2x64xf32> -> vector<2x64xf32>
    %202 = arith.addf %196, %201 : vector<2x64xf32>
    %203 = vector.extract_strided_slice %39 {offsets = [0, 27, 0], sizes = [2, 1, 99], strides = [1, 1, 1]} : vector<2x32x99xf32> to vector<2x1x99xf32>
    %204 = vector.shape_cast %203 : vector<2x1x99xf32> to vector<2x99xf32>
    %c27 = arith.constant 27 : index
    %c0_111 = arith.constant 0 : index
    %c0_112 = arith.constant 0 : index
    %205 = vector.load %arg3[%c27, %c0_111, %c0_112] : memref<32x99x64xf32, #tpu.memory_space<vmem>>, vector<1x99x64xf32>
    %206 = vector.shape_cast %205 : vector<1x99x64xf32> to vector<99x64xf32>
    %cst_113 = arith.constant dense<0.000000e+00> : vector<2x64xf32>
    %207 = tpu.matmul %204, %206, %cst_113 {dimension_numbers = #tpu.dot_dimension_numbers<[1], [0], [0], [1], [0, 0, 1, 1], [], []>} : vector<2x99xf32>, vector<99x64xf32>, vector<2x64xf32> -> vector<2x64xf32>
    %208 = arith.addf %202, %207 : vector<2x64xf32>
    %209 = vector.extract_strided_slice %39 {offsets = [0, 28, 0], sizes = [2, 1, 99], strides = [1, 1, 1]} : vector<2x32x99xf32> to vector<2x1x99xf32>
    %210 = vector.shape_cast %209 : vector<2x1x99xf32> to vector<2x99xf32>
    %c28 = arith.constant 28 : index
    %c0_114 = arith.constant 0 : index
    %c0_115 = arith.constant 0 : index
    %211 = vector.load %arg3[%c28, %c0_114, %c0_115] : memref<32x99x64xf32, #tpu.memory_space<vmem>>, vector<1x99x64xf32>
    %212 = vector.shape_cast %211 : vector<1x99x64xf32> to vector<99x64xf32>
    %cst_116 = arith.constant dense<0.000000e+00> : vector<2x64xf32>
    %213 = tpu.matmul %210, %212, %cst_116 {dimension_numbers = #tpu.dot_dimension_numbers<[1], [0], [0], [1], [0, 0, 1, 1], [], []>} : vector<2x99xf32>, vector<99x64xf32>, vector<2x64xf32> -> vector<2x64xf32>
    %214 = arith.addf %208, %213 : vector<2x64xf32>
    %215 = vector.extract_strided_slice %39 {offsets = [0, 29, 0], sizes = [2, 1, 99], strides = [1, 1, 1]} : vector<2x32x99xf32> to vector<2x1x99xf32>
    %216 = vector.shape_cast %215 : vector<2x1x99xf32> to vector<2x99xf32>
    %c29 = arith.constant 29 : index
    %c0_117 = arith.constant 0 : index
    %c0_118 = arith.constant 0 : index
    %217 = vector.load %arg3[%c29, %c0_117, %c0_118] : memref<32x99x64xf32, #tpu.memory_space<vmem>>, vector<1x99x64xf32>
    %218 = vector.shape_cast %217 : vector<1x99x64xf32> to vector<99x64xf32>
    %cst_119 = arith.constant dense<0.000000e+00> : vector<2x64xf32>
    %219 = tpu.matmul %216, %218, %cst_119 {dimension_numbers = #tpu.dot_dimension_numbers<[1], [0], [0], [1], [0, 0, 1, 1], [], []>} : vector<2x99xf32>, vector<99x64xf32>, vector<2x64xf32> -> vector<2x64xf32>
    %220 = arith.addf %214, %219 : vector<2x64xf32>
    %221 = vector.extract_strided_slice %39 {offsets = [0, 30, 0], sizes = [2, 1, 99], strides = [1, 1, 1]} : vector<2x32x99xf32> to vector<2x1x99xf32>
    %222 = vector.shape_cast %221 : vector<2x1x99xf32> to vector<2x99xf32>
    %c30 = arith.constant 30 : index
    %c0_120 = arith.constant 0 : index
    %c0_121 = arith.constant 0 : index
    %223 = vector.load %arg3[%c30, %c0_120, %c0_121] : memref<32x99x64xf32, #tpu.memory_space<vmem>>, vector<1x99x64xf32>
    %224 = vector.shape_cast %223 : vector<1x99x64xf32> to vector<99x64xf32>
    %cst_122 = arith.constant dense<0.000000e+00> : vector<2x64xf32>
    %225 = tpu.matmul %222, %224, %cst_122 {dimension_numbers = #tpu.dot_dimension_numbers<[1], [0], [0], [1], [0, 0, 1, 1], [], []>} : vector<2x99xf32>, vector<99x64xf32>, vector<2x64xf32> -> vector<2x64xf32>
    %226 = arith.addf %220, %225 : vector<2x64xf32>
    %227 = vector.extract_strided_slice %39 {offsets = [0, 31, 0], sizes = [2, 1, 99], strides = [1, 1, 1]} : vector<2x32x99xf32> to vector<2x1x99xf32>
    %228 = vector.shape_cast %227 : vector<2x1x99xf32> to vector<2x99xf32>
    %c31 = arith.constant 31 : index
    %c0_123 = arith.constant 0 : index
    %c0_124 = arith.constant 0 : index
    %229 = vector.load %arg3[%c31, %c0_123, %c0_124] : memref<32x99x64xf32, #tpu.memory_space<vmem>>, vector<1x99x64xf32>
    %230 = vector.shape_cast %229 : vector<1x99x64xf32> to vector<99x64xf32>
    %cst_125 = arith.constant dense<0.000000e+00> : vector<2x64xf32>
    %231 = tpu.matmul %228, %230, %cst_125 {dimension_numbers = #tpu.dot_dimension_numbers<[1], [0], [0], [1], [0, 0, 1, 1], [], []>} : vector<2x99xf32>, vector<99x64xf32>, vector<2x64xf32> -> vector<2x64xf32>
    %232 = arith.addf %226, %231 : vector<2x64xf32>
    %c0_126 = arith.constant 0 : index
    %c0_127 = arith.constant 0 : index
    %233 = vector.load %arg4[%c0_126, %c0_127] : memref<1x64xf32, #tpu.memory_space<vmem>>, vector<1x64xf32>
    %234 = vector.broadcast %233 : vector<1x64xf32> to vector<2x64xf32>
    %235 = arith.addf %232, %234 : vector<2x64xf32>
    %cst_128 = arith.constant 0.000000e+00 : f32
    %236 = vector.broadcast %cst_128 : f32 to vector<2x64xf32>
    %237 = arith.maximumf %235, %236 : vector<2x64xf32>
    %c0_129 = arith.constant 0 : index
    %c0_130 = arith.constant 0 : index
    %238 = vector.load %arg5[%c0_129, %c0_130] : memref<64x1xf32, #tpu.memory_space<vmem>>, vector<64x1xf32>
    %cst_131 = arith.constant dense<0.000000e+00> : vector<2x1xf32>
    %239 = tpu.matmul %237, %238, %cst_131 {dimension_numbers = #tpu.dot_dimension_numbers<[1], [0], [0], [1], [0, 0, 1, 1], [], []>} : vector<2x64xf32>, vector<64x1xf32>, vector<2x1xf32> -> vector<2x1xf32>
    %c0_132 = arith.constant 0 : index
    %c0_133 = arith.constant 0 : index
    %240 = vector.load %arg6[%c0_132, %c0_133] : memref<1x1xf32, #tpu.memory_space<vmem>>, vector<1x1xf32>
    %241 = vector.broadcast %240 : vector<1x1xf32> to vector<2x1xf32>
    %242 = arith.addf %239, %241 : vector<2x1xf32>
    %cst_134 = arith.constant 0.000000e+00 : f32
    %243 = vector.broadcast %cst_134 : f32 to vector<2x1xf32>
    %244 = arith.subf %243, %242 : vector<2x1xf32>
    %245 = math.exp %244 : vector<2x1xf32>
    %cst_135 = arith.constant 1.000000e+00 : f32
    %246 = vector.broadcast %cst_135 : f32 to vector<2x1xf32>
    %247 = arith.addf %246, %245 : vector<2x1xf32>
    %cst_136 = arith.constant 1.000000e+00 : f32
    %248 = vector.broadcast %cst_136 : f32 to vector<2x1xf32>
    %249 = arith.divf %248, %247 : vector<2x1xf32>
    %c0_137 = arith.constant 0 : index
    %c0_138 = arith.constant 0 : index
    %250 = vector.load %arg7[%c0_137, %c0_138] : memref<2x1xf32, #tpu.memory_space<vmem>>, vector<2x1xf32>
    tpu.vector_store %arg7[%c0_137, %c0_138], %249 {strides = array<i32>} : memref<2x1xf32, #tpu.memory_space<vmem>>, vector<2x1xf32>,
    return
  }
}

</mosaic_0001>

<bundles_post_ra>
// kernel: simple_wake_word_forward.1
= control target key start
LH: loop header
LB: loop body
LE: loop exit
PB: predicated region body
PF: predicated region fallthrough
CT: control target
= control target key end

     0   :  { %vm34_vm0 = vcmask 28672   ;;  %v5942_v2 = vmov 0.0   ;;  %vm30_vm1 = vcmask 31744   ;;  %s5943_s28 = smov 1   ;;  %s5944_s10 = smov 127   ;;  %vm48_vm2 = vcmask 831496   ;;  %s8291_s0 = inlined_call_operand.vmem [shape: f32[2,13,101], index: 0, kind: input, shape index: {}]   ;;  %s8292_s2 = inlined_call_operand.vmem [shape: f32[32,1], index: 2, kind: input, shape index: {}]   ;;  %s8293_s1 = inlined_call_operand.vmem [shape: f32[3,32,13], index: 1, kind: input, shape index: {}]   ;;  %s8294_s3 = inlined_call_operand.vmem [shape: f32[32,99,64], index: 3, kind: input, shape index: {}]   ;;  %s8295_s5 = inlined_call_operand.vmem [shape: f32[64,1], index: 5, kind: input, shape index: {}]   ;;  %s8296_s6 = inlined_call_operand.<no memory space> [shape: f32[1,1], index: 6, kind: input, shape index: {}]   ;;  %s8297_s4 = inlined_call_operand.vmem [shape: f32[1,64], index: 4, kind: input, shape index: {}]   ;;  %s8298_s7 = inlined_call_operand.vmem [shape: f32[2,1], index: 7, kind: output, shape index: {}]  }
   0x1   :  { %v3962_v0 = vld [vmem:[%s8291_s0 + $0x18] sm:$0x1f]  ;;  %v3961_v1 = vld [vmem:[%s8291_s0 + $0x10] sm:$0xff]  ;;  %33 = vst [vmem:[#allocation2 + $0x20] sm:$0x1f] %v5942_v2  ;;  %28 = vst [vmem:[#allocation2] sm:$0xff] %v5942_v2  ;;  %188 = vmatprep.mubr.f32.mxu0 %v5942_v2  ;;  %200 = vmatprep.mubr.f32.mxu1 %v5942_v2 }
   0x2   :  { %29 = vst [vmem:[#allocation2 + $0x8] sm:$0xff] %v5942_v2  ;;  %32 = vst [vmem:[#allocation2 + $0x18] sm:$0x1f] %v5942_v2  ;;  %57 = vrot.lane.b32.xlu0 %v3962_v0, %s5943_s28  ;;  %55 = vrot.lane.b32.xlu1 %v3961_v1, %s5943_s28  ;;  %v37_v3 = vld [vmem:[%s8291_s0 + $0x8] sm:$0x1f]  ;;  %v36_v4 = vld [vmem:[%s8291_s0] sm:$0xff] }
   0x3   :  { %35 = vst.msk [vmem:[#allocation2 + $0x28] sm:$0x1f] %vm34_vm0, %v5942_v2  ;;  %vm46_vm3 = vcmask 834568   ;;  %s5945_s0 = smov 126   ;;  %v5946_v15 = vmov 0   ;;  %v719_v16 = vld [vmem:[%s8292_s2] sm:$0xff] }
   0x4   :  { %31 = vst.msk [vmem:[#allocation2 + $0x10] sm:$0xff] %vm30_vm1, %v5942_v2  ;;  %5936 = vset.pattern.permute.xlu0 %v5946_v15  ;;  %5937 = vset.pattern.permute.xlu1 %v5946_v15  ;;  %vm96_vm4 = vcmask 1039360   ;;  %vm117_vm5 = vcmask 1044480   ;;  %v3963_v26 = vld [vmem:[%s8293_s1 + $0x20] sm:$0xff]  ;;  %vm104_vm6 = vcmask 105472   ;;  %v3965_v27 = vld [vmem:[%s8293_s1 + $0x30] sm:$0xff] }
   0x5   :  { %vm507_vm7 = vcmask 1031168   ;;  %v3964_v31 = vld [vmem:[%s8293_s1 + $0x28] sm:$0xff]  ;;  %v3966_v32 = vld [vmem:[%s8293_s1 + $0x38] sm:$0xff]  ;;  %v69_v35 = vld [vmem:[%s8293_s1] sm:$0xff]  ;;  %vm910_vm8 = vcmask 1042432   ;;  %vm5947_vm9 = vmmov 0  }
   0x6   :  { %42 = vrot.lane.b32.xlu0 %v37_v3, %s5943_s28  ;;  %40 = vrot.lane.b32.xlu1 %v36_v4, %s5943_s28  ;;  %v70_v37 = vld [vmem:[%s8293_s1 + $0x8] sm:$0xff]  ;;  %v71_v42 = vld [vmem:[%s8293_s1 + $0x10] sm:$0xff]  ;;  %vm905_vm10 = vcmask 1041409   ;;  %vm907_vm11 = vcmask 809984   ;;  %vm3875_vm12 = vcmask 523264   ;;  %vm3955_vm13 = vcmask 1024  }
   0x7   :  { %v72_v43 = vld [vmem:[%s8293_s1 + $0x18] sm:$0xff]  ;;  %v3989_v45 = vld [vmem:[%s8293_s1 + $0x40] sm:$0xff]  ;;  %v3990_v46 = vld [vmem:[%s8293_s1 + $0x48] sm:$0xff] }
   0x8   :  { %v3991_v47 = vld [vmem:[%s8293_s1 + $0x50] sm:$0xff]  ;;  %v3992_v48 = vld [vmem:[%s8293_s1 + $0x58] sm:$0xff]  ;;  %v4016_v62 = vld [vmem:[%s8294_s3 + $0xc8] sm:$0x7] }
   0x9   :  { %v887_v63 = vld [vmem:[%s8294_s3 + $0x60] sm:$0x7]  ;;  %v886_v4 = vld [vmem:[%s8294_s3 + $0x58] sm:$0xff] }
   0xa   :  { %v6008_v5 = vld [vmem:[#allocation2 + $0x28] sm:$0x1f]  ;;  %v4015_v0 = vld [vmem:[%s8294_s3 + $0xc0] sm:$0xff] }
   0xb   :  { %94 = vrot.lane.b32.xlu1 %v6008_v5, %s5944_s10  ;;  %v65_v14 = vld [vmem:[#allocation2 + $0x10] sm:$0xff] }
  0x74   :  { %v58_v6 = vpop.permute.xlu0 %57  ;;  %v56_v7 = vpop.permute.xlu1 %55 }
  0x75   :  { %62 = vst.msk [vmem:[#allocation2 + $0x20] sm:$0x1f] %vm48_vm2, %v58_v6 }
  0x76   :  { %61 = vst.msk [vmem:[#allocation2 + $0x8] sm:$0xff] %vm46_vm3, %v56_v7 }
  0x78   :  { %v43_v8 = vpop.permute.xlu0 %42  ;;  %v41_v9 = vpop.permute.xlu1 %40 }
  0x79   :  { %49 = vst.msk [vmem:[#allocation2 + $0x18] sm:$0x1f] %vm48_vm2, %v43_v8 }
  0x7a   :  { %47 = vst.msk [vmem:[#allocation2] sm:$0xff] %vm46_vm3, %v41_v9  ;;  %v4014_v9 = vld [vmem:[%s8294_s3 + $0xb8] sm:$0xff] }
  0x7c   :  { %v6012_v10 = vld [vmem:[#allocation2 + $0x20] sm:$0x1f] }
  0x7d   :  { %v6014_v11 = vld [vmem:[#allocation2 + $0x8] sm:$0xff]  ;;  %92 = vrot.lane.b32.xlu0 %v6012_v10, %s5944_s10  ;;  %v95_v17 = vpop.permute.xlu1 %94 }
  0x7e   :  { %86 = vrot.lane.b32.xlu1 %v6014_v11, %s5944_s10 }
  0x80   :  { %v6020_v12 = vld [vmem:[#allocation2 + $0x18] sm:$0x1f] }
  0x81   :  { %v6022_v13 = vld [vmem:[#allocation2] sm:$0xff]  ;;  %90 = vrot.lane.b32.xlu0 %v6020_v12, %s5944_s10 }
  0x82   :  { %84 = vrot.lane.b32.xlu1 %v6022_v13, %s5944_s10 }
  0x85   :  { %88 = vrot.lane.b32.xlu0 %v65_v14, %s5944_s10 }
  0x86   :  { %505 = vrot.lane.b32.xlu1 %v6008_v5, %s5945_s0 }
  0x89   :  { %503 = vrot.lane.b32.xlu0 %v6012_v10, %s5945_s0 }
  0x8a   :  { %497 = vrot.lane.b32.xlu1 %v6014_v11, %s5945_s0 }
  0x8d   :  { %501 = vrot.lane.b32.xlu0 %v6020_v12, %s5945_s0 }
  0x8e   :  { %495 = vrot.lane.b32.xlu1 %v6022_v13, %s5945_s0 }
  0x91   :  { %499 = vrot.lane.b32.xlu0 %v65_v14, %s5945_s0 }
  0x95   :  { %725 = vperm.xlu0 %5936, %v719_v16  }
  0xef   :  { %v93_v18 = vpop.permute.xlu0 %92 }
  0xf0   :  { %v87_v19 = vpop.permute.xlu1 %86  ;;  %v100_v20 = vsel %vm96_vm4, %v93_v18, %v95_v17 }
  0xf1   :  { %3967 = vmatprep.subr.msk.mxu0 %vm117_vm5, %v100_v20  ;;  %5926 = vmatprep.subr.msk.mxu1 %vm117_vm5, %v100_v20 }
  0xf3   :  { %v91_v21 = vpop.permute.xlu0 %90 }
  0xf4   :  { %v85_v22 = vpop.permute.xlu1 %84  ;;  %v99_v23 = vsel %vm96_vm4, %v91_v21, %v93_v18  ;;  %v4012_v21 = vld [vmem:[%s8294_s3 + $0xa8] sm:$0xff] }
  0xf5   :  { %3968 = vmatpush1.msk.msra.mxu0 %vm117_vm5, %v99_v23  ;;  %5928 = vmatpush1.msk.msra.mxu1 %vm117_vm5, %v99_v23  ;;  %v97_v29 = vsel %vm96_vm4, %v85_v22, %v87_v19  ;;  %v883_v22 = vld [vmem:[%s8294_s3 + $0x40] sm:$0xff] }
  0xf7   :  { %v89_v24 = vpop.permute.xlu0 %88 }
  0xf8   :  { %v98_v25 = vsel %vm96_vm4, %v87_v19, %v89_v24  ;;  %v506_v28 = vpop.permute.xlu1 %505 }
  0xf9   :  { %154 = vmatprep.subr.mxu0 %v98_v25  ;;  %5927 = vmatprep.subr.mxu1 %v98_v25 }
  0xfa   :  { %155 = vmatpush1.msra.mxu0 %v97_v29  ;;  %5929 = vmatpush1.msra.mxu1 %v97_v29  ;;  %v4010_v29 = vld [vmem:[%s8294_s3 + $0x98] sm:$0xff] }
  0xfb   :  { %v504_v30 = vpop.permute.xlu0 %503  ;;  %3969 = vmatmul.mubr.msk.f32.vlgmr.msra.gmra.mxu0 %vm104_vm6, %v3963_v26  ;;  %3971 = vmatmul.mubr.msk.f32.vlgmr.msra.gmra.mxu1 %vm104_vm6, %v3965_v27 }
  0xfc   :  { %4949 = vmatprep.subr.msk.mxu1 %vm117_vm5, %v95_v17  ;;  %4959 = vmatprep.subr.msk.mxu0 %vm117_vm5, %v6008_v5  ;;  %v498_v33 = vpop.permute.xlu1 %497  ;;  %v511_v36 = vsel %vm507_vm7, %v504_v30, %v506_v28 }
  0xfd   :  { %4950 = vmatpush3.msk.msra.mxu1 %vm117_vm5, %v95_v17  ;;  %4960 = vmatpush3.msk.msra.mxu0 %vm117_vm5, %v6008_v5 }
  0xfe   :  { %4951 = vmatprep.subr.mxu1 %v89_v24  ;;  %4961 = vmatprep.subr.mxu0 %v65_v14 }
  0xff   :  { %194 = vmatprep.mubr.f32.mxu0 %v5942_v2  ;;  %206 = vmatprep.mubr.f32.mxu1 %v5942_v2  ;;  %v502_v34 = vpop.permute.xlu0 %501 }
 0x100   :  { %4952 = vmatpush3.msra.mxu1 %v89_v24  ;;  %4962 = vmatpush3.msra.mxu0 %v65_v14  ;;  %v510_v40 = vsel %vm507_vm7, %v502_v34, %v504_v30  ;;  %v496_v41 = vpop.permute.xlu1 %495  ;;  %v884_v14 = vld [vmem:[%s8294_s3 + $0x48] sm:$0xff] }
 0x101   :  { %3970 = vmatmul.mubr.msk.f32.gmra.mxu0 %vm104_vm6, %v3964_v31  ;;  %3972 = vmatmul.mubr.msk.f32.gmra.mxu1 %vm104_vm6, %v3966_v32  ;;  %v508_v44 = vsel %vm507_vm7, %v496_v41, %v498_v33 }
 0x102   :  { %3978 = vmatprep.subr.msk.mxu1 %vm117_vm5, %v6012_v10  ;;  %3993 = vmatprep.subr.msk.mxu0 %vm117_vm5, %v511_v36  ;;  %v885_v10 = vld [vmem:[%s8294_s3 + $0x50] sm:$0xff] }
 0x103   :  { %4953 = vmatprep.mubr.msk.f32.mxu1 %vm104_vm6, %v3963_v26  ;;  %4963 = vmatprep.mubr.msk.f32.mxu0 %vm104_vm6, %v69_v35  ;;  %v500_v38 = vpop.permute.xlu0 %499  ;;  %v4009_v36 = vld [vmem:[%s8294_s3 + $0x90] sm:$0xff] }
 0x104   :  { %v509_v39 = vsel %vm507_vm7, %v498_v33, %v500_v38 }
 0x105   :  { %4954 = vmatmul.mubr.msk.f32.vlgmr.msra.gmra.mxu1 %vm104_vm6, %v3964_v31  ;;  %4964 = vmatmul.mubr.msk.f32.vlgmr.msra.gmra.mxu0 %vm104_vm6, %v70_v37 }
 0x106   :  { %3979 = vmatpush1.msk.msra.mxu1 %vm117_vm5, %v6020_v12  ;;  %3994 = vmatpush1.msk.msra.mxu0 %vm117_vm5, %v510_v40 }
 0x107   :  { %346 = vmatprep.subr.mxu1 %v6014_v11  ;;  %563 = vmatprep.subr.mxu0 %v509_v39  ;;  %v4013_v11 = vld [vmem:[%s8294_s3 + $0xb0] sm:$0xff]  ;;  %v880_v39 = vld [vmem:[%s8294_s3 + $0x28] sm:$0xff] }
 0x108   :  { %347 = vmatpush1.msra.mxu1 %v6022_v13  ;;  %4956 = vmatprep.mubr.msk.f32.mxu1 %vm104_vm6, %v3965_v27  ;;  %v4011_v27 = vld [vmem:[%s8294_s3 + $0xa0] sm:$0xff] }
 0x109   :  { %4966 = vmatprep.mubr.msk.f32.mxu0 %vm104_vm6, %v71_v42  ;;  %564 = vmatpush1.msra.mxu0 %v508_v44 }
 0x10a   :  { %4957 = vmatmul.mubr.msk.f32.gmra.mxu1 %vm104_vm6, %v3966_v32  ;;  %4967 = vmatmul.mubr.msk.f32.gmra.mxu0 %vm104_vm6, %v72_v43  ;;  %v881_v32 = vld [vmem:[%s8294_s3 + $0x30] sm:$0xff] }
 0x10b   :  { %380 = vmatprep.mubr.f32.mxu1 %v5942_v2  ;;  %4969 = vmatprep.subr.msk.mxu1 %vm117_vm5, %v506_v28 }
 0x10c   :  { %597 = vmatprep.mubr.f32.mxu0 %v5942_v2  ;;  %4979 = vmatprep.subr.mxu0 %v5942_v2 }
 0x10e   :  { %3980 = vmatmul.mubr.msk.f32.vlgmr.msra.gmra.mxu1 %vm104_vm6, %v69_v35  ;;  %3995 = vmatmul.mubr.msk.f32.vlgmr.msra.gmra.mxu0 %vm104_vm6, %v3989_v45 }
 0x10f   :  { %4970 = vmatpush3.msk.msra.mxu1 %vm117_vm5, %v506_v28  ;;  %386 = vmatprep.mubr.f32.mxu1 %v5942_v2  ;;  %v882_v28 = vld [vmem:[%s8294_s3 + $0x38] sm:$0xff] }
 0x110   :  { %603 = vmatprep.mubr.f32.mxu0 %v5942_v2  ;;  %4971 = vmatprep.subr.mxu1 %v500_v38  ;;  %v6193_v16 = vpop.permute.xlu0 %725 }
 0x111   :  { %4972 = vmatpush3.msra.mxu1 %v500_v38  ;;  %4980 = vmatpush3.msk.msra.mxu0 %vm910_vm8, %v4016_v62 }
 0x112   :  { %3981 = vmatmul.mubr.msk.f32.gmra.mxu1 %vm104_vm6, %v70_v37  ;;  %3996 = vmatmul.mubr.msk.f32.gmra.mxu0 %vm104_vm6, %v3990_v46 }
 0x113   :  { %392 = vmatprep.mubr.f32.mxu1 %v5942_v2  ;;  %609 = vmatprep.mubr.f32.mxu0 %v5942_v2 }
 0x114   :  { %5008 = vmatprep.subr.mxu1 %v5942_v2  ;;  %4981 = vmatprep.subr.mxu0 %v5942_v2 }
 0x115   :  { %4982 = vmatpush3.msra.mxu0 %v4015_v0  ;;  %v4005_v0 = vld [vmem:[%s8294_s3 + $0x70] sm:$0xff] }
 0x116   :  { %3982 = vmatmul.mubr.msk.f32.gmra.mxu1 %vm104_vm6, %v71_v42  ;;  %3997 = vmatmul.mubr.msk.f32.gmra.mxu0 %vm104_vm6, %v3991_v47 }
 0x117   :  { %398 = vmatprep.mubr.f32.mxu1 %v5942_v2  ;;  %615 = vmatprep.mubr.f32.mxu0 %v5942_v2 }
 0x118   :  { %4983 = vmatprep.subr.mxu0 %v5942_v2 }
 0x119   :  { %4984 = vmatpush3.msra.mxu0 %v4014_v9 }
 0x11a   :  { %3983 = vmatmul.mubr.msk.f32.gmra.mxu1 %vm104_vm6, %v72_v43  ;;  %3998 = vmatmul.mubr.msk.f32.gmra.mxu0 %vm104_vm6, %v3992_v48 }
 0x11b   :  { %4973 = vmatprep.mubr.msk.f32.mxu1 %vm104_vm6, %v3989_v45  ;;  %4985 = vmatprep.subr.mxu0 %v5942_v2  ;;  %v4008_v45 = vld [vmem:[%s8294_s3 + $0x88] sm:$0xff] }
 0x11c   :  { %4986 = vmatpush3.msra.mxu0 %v4013_v11  ;;  %5005 = vmatprep.mubr.msk.f32.mxu0 %vm5947_vm9, %v5942_v2 }
 0x11d   :  { %4987 = vmatprep.subr.mxu0 %v5942_v2 }
 0x11e   :  { %4974 = vmatmul.mubr.msk.f32.vlgmr.msra.gmra.mxu1 %vm104_vm6, %v3990_v46  ;;  %4988 = vmatpush3.msra.mxu0 %v4012_v21  ;;  %v879_v46 = vld [vmem:[%s8294_s3 + $0x20] sm:$0xff] }
 0x11f   :  { %4976 = vmatprep.mubr.msk.f32.mxu1 %vm104_vm6, %v3991_v47  ;;  %5009 = vmatpush3.msk.msra.mxu1 %vm910_vm8, %v887_v63 }
 0x120   :  { %5010 = vmatprep.subr.mxu1 %v5942_v2  ;;  %4989 = vmatprep.subr.mxu0 %v5942_v2 }
 0x121   :  { %5011 = vmatpush3.msra.mxu1 %v886_v4  ;;  %4990 = vmatpush3.msra.mxu0 %v4011_v27 }
 0x122   :  { %4977 = vmatmul.mubr.msk.f32.gmra.mxu1 %vm104_vm6, %v3992_v48  ;;  %5012 = vmatprep.subr.mxu1 %v5942_v2 }
 0x123   :  { %5013 = vmatpush3.msra.mxu1 %v885_v10  ;;  %4991 = vmatprep.subr.mxu0 %v5942_v2 }
 0x124   :  { %5014 = vmatprep.subr.mxu1 %v5942_v2  ;;  %4992 = vmatpush3.msra.mxu0 %v4010_v29  ;;  %v4048_v29 = vld [vmem:[%s8294_s3 + $0x198] sm:$0x7] }
 0x125   :  { %5015 = vmatpush3.msra.mxu1 %v884_v14  ;;  %4993 = vmatprep.subr.mxu0 %v5942_v2 }
 0x126   :  { %5016 = vmatprep.subr.mxu1 %v5942_v2  ;;  %4994 = vmatpush3.msra.mxu0 %v4009_v36 }
 0x127   :  { %5017 = vmatpush3.msra.mxu1 %v883_v22  ;;  %4995 = vmatprep.subr.mxu0 %v5942_v2 }
 0x128   :  { %5018 = vmatprep.subr.mxu1 %v5942_v2  ;;  %4996 = vmatpush3.msra.mxu0 %v4008_v45  ;;  %v4046_v45 = vld [vmem:[%s8294_s3 + $0x188] sm:$0xff] }
 0x129   :  { %5019 = vmatpush3.msra.mxu1 %v882_v28  ;;  %4997 = vmatprep.subr.mxu0 %v5942_v2  ;;  %v4033_v28 = vld [vmem:[%s8294_s3 + $0x130] sm:$0x7] }
 0x12a   :  { %5020 = vmatprep.subr.mxu1 %v5942_v2  ;;  %5034 = vmatprep.mubr.msk.f32.mxu1 %vm5947_vm9, %v5942_v2 }
 0x12b   :  { %5021 = vmatpush3.msra.mxu1 %v881_v32 }
 0x12c   :  { %5022 = vmatprep.subr.mxu1 %v5942_v2 }
 0x12d   :  { %5023 = vmatpush3.msra.mxu1 %v880_v39 }
 0x12e   :  { %5024 = vmatprep.subr.mxu1 %v5942_v2 }
 0x12f   :  { %5025 = vmatpush3.msra.mxu1 %v879_v46 }
 0x130   :  { %5026 = vmatprep.subr.mxu1 %v5942_v2 }
 0x1bb   :  { %v190_v49 = vpop.f32.mrf.mxu0  ;;  %v6143_v50 = vpop.f32.mrf.mxu1 }
 0x1bd   :  { %v192_v51 = vpop.f32.mrf.mxu0  ;;  %v6145_v52 = vpop.f32.mrf.mxu1 }
 0x1c1   :  { %v196_v53 = vpop.f32.mrf.mxu0  ;;  %v6147_v54 = vpop.f32.mrf.mxu1 }
 0x1c3   :  { %v6149_v55 = vpop.f32.mrf.mxu0  ;;  %v6151_v56 = vpop.f32.mrf.mxu1 }
 0x1c5   :  { %v4955_v57 = vpop.f32.mrf.mxu1  ;;  %v4965_v58 = vpop.f32.mrf.mxu0 }
 0x1c6   :  { %v6153_v59 = vadd.f32 %v4965_v58, %v4955_v57  ;;  %v4006_v57 = vld [vmem:[%s8294_s3 + $0x78] sm:$0xff]  ;;  %v877_v58 = vld [vmem:[%s8294_s3 + $0x10] sm:$0xff] }
 0x1c7   :  { %v6155_v60 = vpop.f32.mrf.mxu1  ;;  %v6157_v61 = vpop.f32.mrf.mxu0 }
 0x1ca   :  { %v4958_v1 = vpop.f32.mrf.mxu1  ;;  %v4968_v3 = vpop.f32.mrf.mxu0 }
 0x1cb   :  { %v6173_v5 = vadd.f32 %v4968_v3, %v4958_v1  ;;  %v876_v1 = vld [vmem:[%s8294_s3 + $0x8] sm:$0xff] }
 0x1cc   :  { %v289_v6 = vpop.f32.mrf.mxu1  ;;  %v481_v7 = vpop.f32.mrf.mxu0 }
 0x1cd   :  { %v6177_v8 = vadd.f32 %v481_v7, %v289_v6 }
 0x1ce   :  { %v382_v12 = vpop.f32.mrf.mxu1  ;;  %v599_v13 = vpop.f32.mrf.mxu0 }
 0x1cf   :  { %v383_v15 = vadd.f32 %v382_v12, %v190_v49 }
 0x1d0   :  { %v384_v17 = vpop.f32.mrf.mxu1  ;;  %v601_v18 = vpop.f32.mrf.mxu0 }
 0x1d1   :  { %v385_v19 = vadd.f32 %v384_v17, %v192_v51  ;;  %v707_v20 = vadd.f32 %v599_v13, %v383_v15  ;;  %v878_v51 = vld [vmem:[%s8294_s3 + $0x18] sm:$0xff] }
 0x1d2   :  { %v388_v23 = vpop.f32.mrf.mxu1  ;;  %v6205_v24 = vpop.f32.mrf.mxu0  ;;  %5027 = vmatpush3.msra.mxu1 %v878_v51 }
 0x1d3   :  { %v743_v25 = vadd.f32 %v6193_v16, %v707_v20  ;;  %v6208_v26 = vadd.f32 %v388_v23, %v196_v53  ;;  %v708_v33 = vadd.f32 %v601_v18, %v385_v19  ;;  %5028 = vmatprep.subr.mxu1 %v5942_v2 }
 0x1d4   :  { %v390_v30 = vpop.f32.mrf.mxu1  ;;  %v6221_v31 = vpop.f32.mrf.mxu0  ;;  %5029 = vmatpush3.msra.mxu1 %v877_v58 }
 0x1d5   :  { %v6227_v34 = vadd.f32 %v390_v30, %v6149_v55  ;;  %v6229_v35 = vmax.f32 %v743_v25, 0.0  ;;  %v744_v43 = vadd.f32 %v6193_v16, %v708_v33  ;;  %5030 = vmatprep.subr.mxu1 %v5942_v2  ;;  %v4032_v33 = vld [vmem:[%s8294_s3 + $0x128] sm:$0xff] }
 0x1d6   :  { %v394_v37 = vpop.f32.mrf.mxu1  ;;  %v6236_v38 = vpop.f32.mrf.mxu0  ;;  %5031 = vmatpush3.msra.mxu1 %v876_v1  ;;  %v4042_v1 = vld [vmem:[%s8294_s3 + $0x168] sm:$0xff] }
 0x1d7   :  { %v6242_v40 = vadd.f32 %v394_v37, %v6143_v50  ;;  %779 = vrot.lane.b32.xlu1 %v6229_v35, %s5944_s10  ;;  %v4007_v50 = vld [vmem:[%s8294_s3 + $0x80] sm:$0xff]  ;;  %v756_v53 = vmax.f32 %v744_v43, 0.0  ;;  %5032 = vmatprep.subr.mxu1 %v5942_v2 }
 0x1d8   :  { %v396_v41 = vpop.f32.mrf.mxu1  ;;  %v6247_v42 = vpop.f32.mrf.mxu0  ;;  %4998 = vmatpush3.msra.mxu0 %v4007_v50  ;;  %v4031_v43 = vld [vmem:[%s8294_s3 + $0x120] sm:$0xff]  ;;  %v711_v50 = vadd.f32 %v6221_v31, %v6227_v34  ;;  %v4028_v31 = vld [vmem:[%s8294_s3 + $0x108] sm:$0xff]  ;;  %v4043_v34 = vld [vmem:[%s8294_s3 + $0x170] sm:$0xff] }
 0x1d9   :  { %v6252_v44 = vadd.f32 %v396_v41, %v6145_v52  ;;  %4999 = vmatprep.subr.mxu0 %v5942_v2 }
 0x1da   :  { %v400_v47 = vpop.f32.mrf.mxu1  ;;  %v617_v48 = vpop.f32.mrf.mxu0  ;;  %5000 = vmatpush3.msra.mxu0 %v4006_v57 }
 0x1db   :  { %v401_v49 = vadd.f32 %v400_v47, %v6147_v54  ;;  %827 = vrot.lane.b32.xlu1 %v6229_v35, %s5945_s0  ;;  %5001 = vmatprep.subr.mxu0 %v5942_v2 }
 0x1dc   :  { %v402_v52 = vpop.f32.mrf.mxu1  ;;  %5002 = vmatpush3.msra.mxu0 %v4005_v0  ;;  %v4027_v0 = vld [vmem:[%s8294_s3 + $0x100] sm:$0xff] }
 0x1dd   :  { %v6274_v54 = vadd.f32 %v402_v52, %v6151_v56  ;;  %v6276_v55 = vadd.f32 %v617_v48, %v401_v49  ;;  %v472_v56 = vadd.f32 %v6157_v61, %v6155_v60  ;;  %v875_v61 = vld [vmem:[%s8294_s3] sm:$0xff]  ;;  %5003 = vmatprep.subr.mxu0 %v5942_v2  ;;  %v4030_v48 = vld [vmem:[%s8294_s3 + $0x118] sm:$0xff]  ;;  %v4029_v52 = vld [vmem:[%s8294_s3 + $0x110] sm:$0xff] }
 0x1de   :  { %v4975_v62 = vpop.f32.mrf.mxu1  ;;  %5033 = vmatpush3.msra.mxu1 %v875_v61  ;;  %v4045_v49 = vld [vmem:[%s8294_s3 + $0x180] sm:$0xff]  ;;  %v4040_v61 = vld [vmem:[%s8294_s3 + $0x158] sm:$0xff] }
 0x1df   :  { %v6289_v63 = vadd.f32 %v4975_v62, %v6153_v59  ;;  %781 = vrot.lane.b32.xlu1 %v756_v53, %s5944_s10  ;;  %v4004_v59 = vld [vmem:[%s8294_s3 + $0x68] sm:$0xff]  ;;  %5066 = vmatprep.subr.mxu1 %v5942_v2 }
 0x1e0   :  { %v688_v3 = vpop.f32.mrf.mxu1  ;;  %5004 = vmatpush3.msra.mxu0 %v4004_v59 }
 0x1e1   :  { %v709_v60 = vadd.f32 %v688_v3, %v472_v56  ;;  %5037 = vmatprep.subr.mxu0 %v5942_v2 }
 0x1e2   :  { %v4978_v4 = vpop.f32.mrf.mxu1 }
 0x1e3   :  { %v745_v6 = vadd.f32 %v6193_v16, %v709_v60  ;;  %v6309_v7 = vadd.f32 %v4978_v4, %v6173_v5  ;;  %v720_v5 = vld [vmem:[%s8292_s2 + $0x8] sm:$0xff]  ;;  %v4025_v60 = vld [vmem:[%s8294_s3 + $0xf0] sm:$0xff] }
 0x1e4   :  { %v4024_v4 = vld [vmem:[%s8294_s3 + $0xe8] sm:$0xff] }
 0x1e5   :  { %v757_v9 = vmax.f32 %v745_v6, 0.0  ;;  %v4039_v6 = vld [vmem:[%s8294_s3 + $0x150] sm:$0xff] }
 0x1e7   :  { %783 = vrot.lane.b32.xlu0 %v757_v9, %s5944_s10  ;;  %831 = vrot.lane.b32.xlu1 %v757_v9, %s5945_s0  ;;  %v4023_v9 = vld [vmem:[%s8294_s3 + $0xe0] sm:$0xff] }
 0x1eb   :  { %829 = vrot.lane.b32.xlu0 %v756_v53, %s5945_s0 }
 0x1ef   :  { %730 = vperm.xlu0 %5936, %v720_v5   ;;  %v4038_v5 = vld [vmem:[%s8294_s3 + $0x148] sm:$0xff] }
 0x249   :  { %v780_v10 = vpop.permute.xlu1 %779 }
 0x24d   :  { %v828_v11 = vpop.permute.xlu1 %827 }
 0x251   :  { %v782_v12 = vpop.permute.xlu1 %781 }
 0x252   :  { %v803_v14 = vsel %vm96_vm4, %v780_v10, %v782_v12  ;;  %v4022_v10 = vld [vmem:[%s8294_s3 + $0xd8] sm:$0xff] }
 0x253   :  { %v819_v16 = vmax.f32 %v6229_v35, %v803_v14  ;;  %v4047_v35 = vld [vmem:[%s8294_s3 + $0x190] sm:$0xff] }
 0x259   :  { %v784_v13 = vpop.permute.xlu0 %783  ;;  %v832_v18 = vpop.permute.xlu1 %831 }
 0x25a   :  { %v804_v15 = vsel %vm96_vm4, %v782_v12, %v784_v13  ;;  %v721_v12 = vld [vmem:[%s8292_s2 + $0x10] sm:$0xff] }
 0x25b   :  { %v820_v17 = vmax.f32 %v756_v53, %v804_v15  ;;  %v4044_v53 = vld [vmem:[%s8294_s3 + $0x178] sm:$0xff]  ;;  %v4021_v13 = vld [vmem:[%s8294_s3 + $0xd0] sm:$0xff] }
 0x25d   :  { %v830_v19 = vpop.permute.xlu0 %829 }
 0x25e   :  { %v851_v20 = vsel %vm507_vm7, %v828_v11, %v830_v19  ;;  %v852_v21 = vsel %vm507_vm7, %v830_v19, %v832_v18  ;;  %v4037_v11 = vld [vmem:[%s8294_s3 + $0x140] sm:$0xff] }
 0x25f   :  { %v6329_v22 = vmax.f32 %v819_v16, %v851_v20  ;;  %v6331_v23 = vmax.f32 %v820_v17, %v852_v21  ;;  %v4036_v16 = vld [vmem:[%s8294_s3 + $0x138] sm:$0xff]  ;;  %v4063_v20 = vld [vmem:[%s8294_s3 + $0x200] sm:$0x7] }
 0x261   :  { %v904_v25 = vrot.slane %v6329_v22, 1  ;;  %v984_v27 = vrot.slane %v6331_v23, 7  ;;  %v1447_v36 = vrot.slane %v6329_v22, 6  ;;  %v1448_v37 = vrot.slane %v6331_v23, 5 }
 0x262   :  { %v1540_v39 = vrot.slane %v6329_v22, 7  ;;  %v1541_v41 = vrot.slane %v6331_v23, 6  ;;  %v1075_v14 = vrot.slane %v6329_v22, 2  ;;  %v1076_v15 = vrot.slane %v6331_v23, 1 }
 0x263   :  { %v906_v30 = vsel %vm905_vm10, %v6331_v23, %v904_v25  ;;  %v985_v32 = vsel %vm905_vm10, %v984_v27, %v6329_v22  ;;  %v6368_v46 = vsel %vm905_vm10, %v1448_v37, %v1447_v36  ;;  %v1168_v17 = vrot.slane %v6329_v22, 3  ;;  %v4078_v25 = vld [vmem:[%s8294_s3 + $0x268] sm:$0x7]  ;;  %v4062_v27 = vld [vmem:[%s8294_s3 + $0x1f8] sm:$0xff] }
 0x264   :  { %5006 = vmatmul.mubr.msk.f32.vlgmr.msra.gmra.mxu0 %vm907_vm11, %v906_v30  ;;  %5035 = vmatmul.mubr.msk.f32.vlgmr.msra.gmra.mxu1 %vm907_vm11, %v985_v32  ;;  %v6371_v47 = vsel %vm905_vm10, %v1541_v41, %v1540_v39  ;;  %v1169_v18 = vrot.slane %v6331_v23, 2  ;;  %v1077_v19 = vsel %vm905_vm10, %v1076_v15, %v1075_v14  ;;  %v4076_v30 = vld [vmem:[%s8294_s3 + $0x258] sm:$0xff]  ;;  %v4060_v32 = vld [vmem:[%s8294_s3 + $0x1e8] sm:$0xff]  ;;  %v4073_v39 = vld [vmem:[%s8294_s3 + $0x240] sm:$0xff] }
 0x265   :  { %5038 = vmatpush3.msk.msra.mxu0 %vm910_vm8, %v4033_v28  ;;  %5067 = vmatpush3.msk.msra.mxu1 %vm910_vm8, %v4048_v29  ;;  %v4077_v28 = vld [vmem:[%s8294_s3 + $0x260] sm:$0xff]  ;;  %v4061_v29 = vld [vmem:[%s8294_s3 + $0x1f0] sm:$0xff]  ;;  %v4074_v36 = vld [vmem:[%s8294_s3 + $0x248] sm:$0xff] }
 0x266   :  { %5039 = vmatprep.subr.mxu0 %v5942_v2  ;;  %5068 = vmatprep.subr.mxu1 %v5942_v2  ;;  %v1170_v21 = vsel %vm905_vm10, %v1169_v18, %v1168_v17  ;;  %v4058_v37 = vld [vmem:[%s8294_s3 + $0x1d8] sm:$0xff]  ;;  %v4057_v41 = vld [vmem:[%s8294_s3 + $0x1d0] sm:$0xff]  ;;  %v4087_v14 = vld [vmem:[%s8294_s3 + $0x2a0] sm:$0xff] }
 0x267   :  { %5040 = vmatpush3.msra.mxu0 %v4032_v33  ;;  %5069 = vmatpush3.msra.mxu1 %v4047_v35  ;;  %v4075_v33 = vld [vmem:[%s8294_s3 + $0x250] sm:$0xff]  ;;  %v4059_v35 = vld [vmem:[%s8294_s3 + $0x1e0] sm:$0xff]  ;;  %v4102_v15 = vld [vmem:[%s8294_s3 + $0x308] sm:$0xff] }
 0x268   :  { %5041 = vmatprep.subr.mxu0 %v5942_v2  ;;  %5070 = vmatprep.subr.mxu1 %v5942_v2  ;;  %v4101_v17 = vld [vmem:[%s8294_s3 + $0x300] sm:$0xff]  ;;  %v4085_v18 = vld [vmem:[%s8294_s3 + $0x290] sm:$0xff] }
 0x269   :  { %5042 = vmatpush3.msra.mxu0 %v4031_v43  ;;  %5071 = vmatpush3.msra.mxu1 %v4046_v45  ;;  %v4072_v43 = vld [vmem:[%s8294_s3 + $0x238] sm:$0xff]  ;;  %v4056_v45 = vld [vmem:[%s8294_s3 + $0x1c8] sm:$0xff] }
 0x26a   :  { %5043 = vmatprep.subr.mxu0 %v5942_v2  ;;  %5072 = vmatprep.subr.mxu1 %v5942_v2  ;;  %v731_v51 = vpop.permute.xlu0 %730 }
 0x26b   :  { %v747_v57 = vadd.f32 %v731_v51, %v711_v50  ;;  %v748_v58 = vadd.f32 %v731_v51, %v6289_v63  ;;  %5044 = vmatpush3.msra.mxu0 %v4030_v48  ;;  %5073 = vmatpush3.msra.mxu1 %v4045_v49  ;;  %v710_v63 = vadd.f32 %v6205_v24, %v6208_v26  ;;  %v4026_v24 = vld [vmem:[%s8294_s3 + $0xf8] sm:$0xff]  ;;  %v4041_v26 = vld [vmem:[%s8294_s3 + $0x160] sm:$0xff]  ;;  %v4071_v48 = vld [vmem:[%s8294_s3 + $0x230] sm:$0xff] }
 0x26c   :  { %5045 = vmatprep.subr.mxu0 %v5942_v2  ;;  %5074 = vmatprep.subr.mxu1 %v5942_v2  ;;  %v4055_v49 = vld [vmem:[%s8294_s3 + $0x1c0] sm:$0xff]  ;;  %v4070_v50 = vld [vmem:[%s8294_s3 + $0x228] sm:$0xff] }
 0x26d   :  { %5046 = vmatpush3.msra.mxu0 %v4029_v52  ;;  %5075 = vmatpush3.msra.mxu1 %v4044_v53  ;;  %v760_v62 = vmax.f32 %v748_v58, 0.0  ;;  %v6400_v56 = vmax.f32 %v747_v57, 0.0  ;;  %v746_v3 = vadd.f32 %v731_v51, %v710_v63  ;;  %v4054_v51 = vld [vmem:[%s8294_s3 + $0x1b8] sm:$0xff]  ;;  %v4069_v52 = vld [vmem:[%s8294_s3 + $0x220] sm:$0xff]  ;;  %v4053_v53 = vld [vmem:[%s8294_s3 + $0x1b0] sm:$0xff]  ;;  %v1262_v63 = vrot.slane %v6331_v23, 3 }
 0x26e   :  { %5047 = vmatprep.subr.mxu0 %v5942_v2  ;;  %5076 = vmatprep.subr.mxu1 %v5942_v2  ;;  %v4068_v57 = vld [vmem:[%s8294_s3 + $0x218] sm:$0xff]  ;;  %v4052_v58 = vld [vmem:[%s8294_s3 + $0x1a8] sm:$0xff] }
 0x26f   :  { %5048 = vmatpush3.msra.mxu0 %v4028_v31  ;;  %5077 = vmatpush3.msra.mxu1 %v4043_v34  ;;  %v6425_v59 = vmax.f32 %v746_v3, 0.0  ;;  %v4067_v31 = vld [vmem:[%s8294_s3 + $0x210] sm:$0xff]  ;;  %v4051_v34 = vld [vmem:[%s8294_s3 + $0x1a0] sm:$0xff]  ;;  %v1355_v3 = vrot.slane %v6331_v23, 4  ;;  %v4108_v23 = vld [vmem:[%s8294_s3 + $0x338] sm:$0x7] }
 0x270   :  { %789 = vrot.lane.b32.xlu0 %v760_v62, %s5944_s10  ;;  %5049 = vmatprep.subr.mxu0 %v5942_v2 }
 0x271   :  { %5078 = vmatprep.subr.mxu1 %v5942_v2  ;;  %787 = vrot.lane.b32.xlu1 %v6400_v56, %s5944_s10 }
 0x272   :  { %5050 = vmatpush3.msra.mxu0 %v4027_v0  ;;  %5079 = vmatpush3.msra.mxu1 %v4042_v1  ;;  %v4066_v0 = vld [vmem:[%s8294_s3 + $0x208] sm:$0xff]  ;;  %v1354_v1 = vrot.slane %v6329_v22, 5 }
 0x273   :  { %5051 = vmatprep.subr.mxu0 %v5942_v2  ;;  %5080 = vmatprep.subr.mxu1 %v5942_v2 }
 0x274   :  { %5052 = vmatpush3.msra.mxu0 %v4026_v24  ;;  %5081 = vmatpush3.msra.mxu1 %v4041_v26  ;;  %v4093_v26 = vld [vmem:[%s8294_s3 + $0x2d0] sm:$0x7] }
 0x275   :  { %5053 = vmatprep.subr.mxu0 %v5942_v2  ;;  %5082 = vmatprep.subr.mxu1 %v5942_v2 }
 0x276   :  { %835 = vrot.lane.b32.xlu0 %v6400_v56, %s5945_s0  ;;  %785 = vrot.lane.b32.xlu1 %v6425_v59, %s5944_s10 }
 0x277   :  { %5054 = vmatpush3.msra.mxu0 %v4025_v60  ;;  %5083 = vmatpush3.msra.mxu1 %v4040_v61  ;;  %v4092_v60 = vld [vmem:[%s8294_s3 + $0x2c8] sm:$0xff]  ;;  %v4107_v61 = vld [vmem:[%s8294_s3 + $0x330] sm:$0xff] }
 0x278   :  { %5055 = vmatprep.subr.mxu0 %v5942_v2  ;;  %5084 = vmatprep.subr.mxu1 %v5942_v2 }
 0x279   :  { %5056 = vmatpush3.msra.mxu0 %v4024_v4  ;;  %5085 = vmatpush3.msra.mxu1 %v4039_v6  ;;  %v4091_v4 = vld [vmem:[%s8294_s3 + $0x2c0] sm:$0xff]  ;;  %v4106_v6 = vld [vmem:[%s8294_s3 + $0x328] sm:$0xff] }
 0x27a   :  { %5057 = vmatprep.subr.mxu0 %v5942_v2  ;;  %5086 = vmatprep.subr.mxu1 %v5942_v2 }
 0x27b   :  { %833 = vrot.lane.b32.xlu0 %v6425_v59, %s5945_s0  ;;  %837 = vrot.lane.b32.xlu1 %v760_v62, %s5945_s0  ;;  %v1261_v62 = vrot.slane %v6329_v22, 4  ;;  %v1356_v22 = vsel %vm905_vm10, %v1355_v3, %v1354_v1  ;;  %v4127_v1 = vld [vmem:[%s8294_s3 + $0x3b0] sm:$0xff]  ;;  %v4111_v3 = vld [vmem:[%s8294_s3 + $0x340] sm:$0xff] }
 0x27c   :  { %5058 = vmatpush3.msra.mxu0 %v4023_v9  ;;  %5087 = vmatpush3.msra.mxu1 %v4038_v5  ;;  %v4090_v9 = vld [vmem:[%s8294_s3 + $0x2b8] sm:$0xff]  ;;  %v4105_v5 = vld [vmem:[%s8294_s3 + $0x320] sm:$0xff] }
 0x27d   :  { %5059 = vmatprep.subr.mxu0 %v5942_v2  ;;  %5088 = vmatprep.subr.mxu1 %v5942_v2  ;;  %v1263_v24 = vsel %vm905_vm10, %v1262_v63, %v1261_v62  ;;  %v4113_v62 = vld [vmem:[%s8294_s3 + $0x350] sm:$0xff]  ;;  %v4128_v63 = vld [vmem:[%s8294_s3 + $0x3b8] sm:$0xff] }
 0x27e   :  { %5060 = vmatpush3.msra.mxu0 %v4022_v10  ;;  %5089 = vmatpush3.msra.mxu1 %v4037_v11  ;;  %v4089_v10 = vld [vmem:[%s8294_s3 + $0x2b0] sm:$0xff]  ;;  %v4104_v11 = vld [vmem:[%s8294_s3 + $0x318] sm:$0xff] }
 0x27f   :  { %5061 = vmatprep.subr.mxu0 %v5942_v2  ;;  %5090 = vmatprep.subr.mxu1 %v5942_v2 }
 0x280   :  { %735 = vperm.xlu1 %5937, %v721_v12   ;;  %5062 = vmatpush3.msra.mxu0 %v4021_v13  ;;  %v4088_v12 = vld [vmem:[%s8294_s3 + $0x2a8] sm:$0xff]  ;;  %v4103_v13 = vld [vmem:[%s8294_s3 + $0x310] sm:$0xff] }
 0x281   :  { %5063 = vmatprep.mubr.msk.f32.mxu0 %vm5947_vm9, %v5942_v2  ;;  %5091 = vmatpush3.msra.mxu1 %v4036_v16  ;;  %v4086_v16 = vld [vmem:[%s8294_s3 + $0x298] sm:$0xff] }
 0x282   :  { %5092 = vmatprep.mubr.msk.f32.mxu1 %vm5947_vm9, %v5942_v2  ;;  %5064 = vmatmul.mubr.msk.f32.vlgmr.msra.gmra.mxu0 %vm907_vm11, %v1077_v19  ;;  %v4100_v19 = vld [vmem:[%s8294_s3 + $0x2f8] sm:$0xff] }
 0x283   :  { %5093 = vmatmul.mubr.msk.f32.vlgmr.msra.gmra.mxu1 %vm907_vm11, %v1170_v21  ;;  %5095 = vmatprep.subr.mxu0 %v5942_v2  ;;  %v4099_v21 = vld [vmem:[%s8294_s3 + $0x2f0] sm:$0xff] }
 0x284   :  { %5124 = vmatprep.subr.mxu1 %v5942_v2  ;;  %5096 = vmatpush3.msk.msra.mxu0 %vm910_vm8, %v4063_v20  ;;  %v4084_v20 = vld [vmem:[%s8294_s3 + $0x288] sm:$0xff] }
 0x285   :  { %5125 = vmatpush3.msk.msra.mxu1 %vm910_vm8, %v4078_v25  ;;  %5097 = vmatprep.subr.mxu0 %v5942_v2  ;;  %v4083_v25 = vld [vmem:[%s8294_s3 + $0x280] sm:$0xff] }
 0x286   :  { %5126 = vmatprep.subr.mxu1 %v5942_v2  ;;  %5098 = vmatpush3.msra.mxu0 %v4062_v27  ;;  %v4098_v27 = vld [vmem:[%s8294_s3 + $0x2e8] sm:$0xff] }
 0x287   :  { %5127 = vmatpush3.msra.mxu1 %v4077_v28  ;;  %5099 = vmatprep.subr.mxu0 %v5942_v2  ;;  %v4082_v28 = vld [vmem:[%s8294_s3 + $0x278] sm:$0xff] }
 0x288   :  { %5128 = vmatprep.subr.mxu1 %v5942_v2  ;;  %5100 = vmatpush3.msra.mxu0 %v4061_v29  ;;  %v4097_v29 = vld [vmem:[%s8294_s3 + $0x2e0] sm:$0xff] }
 0x289   :  { %5129 = vmatpush3.msra.mxu1 %v4076_v30  ;;  %5101 = vmatprep.subr.mxu0 %v5942_v2  ;;  %v4081_v30 = vld [vmem:[%s8294_s3 + $0x270] sm:$0xff] }
 0x28a   :  { %5130 = vmatprep.subr.mxu1 %v5942_v2  ;;  %5102 = vmatpush3.msra.mxu0 %v4060_v32  ;;  %v4096_v32 = vld [vmem:[%s8294_s3 + $0x2d8] sm:$0xff] }
 0x28b   :  { %5131 = vmatpush3.msra.mxu1 %v4075_v33  ;;  %5103 = vmatprep.subr.mxu0 %v5942_v2  ;;  %v4123_v33 = vld [vmem:[%s8294_s3 + $0x3a0] sm:$0x7] }
 0x28c   :  { %5132 = vmatprep.subr.mxu1 %v5942_v2  ;;  %5104 = vmatpush3.msra.mxu0 %v4059_v35  ;;  %v4138_v35 = vld [vmem:[%s8294_s3 + $0x408] sm:$0x7] }
 0x28d   :  { %5133 = vmatpush3.msra.mxu1 %v4074_v36  ;;  %5105 = vmatprep.subr.mxu0 %v5942_v2  ;;  %v4122_v36 = vld [vmem:[%s8294_s3 + $0x398] sm:$0xff] }
 0x28e   :  { %5134 = vmatprep.subr.mxu1 %v5942_v2  ;;  %5106 = vmatpush3.msra.mxu0 %v4058_v37  ;;  %v4136_v37 = vld [vmem:[%s8294_s3 + $0x3f8] sm:$0xff] }
 0x28f   :  { %5135 = vmatpush3.msra.mxu1 %v4073_v39  ;;  %5107 = vmatprep.subr.mxu0 %v5942_v2  ;;  %v4120_v39 = vld [vmem:[%s8294_s3 + $0x388] sm:$0xff] }
 0x290   :  { %5136 = vmatprep.subr.mxu1 %v5942_v2  ;;  %5108 = vmatpush3.msra.mxu0 %v4057_v41  ;;  %v4135_v41 = vld [vmem:[%s8294_s3 + $0x3f0] sm:$0xff] }
 0x291   :  { %5137 = vmatpush3.msra.mxu1 %v4072_v43  ;;  %5109 = vmatprep.subr.mxu0 %v5942_v2  ;;  %v4119_v43 = vld [vmem:[%s8294_s3 + $0x380] sm:$0xff] }
 0x292   :  { %5138 = vmatprep.subr.mxu1 %v5942_v2  ;;  %5110 = vmatpush3.msra.mxu0 %v4056_v45  ;;  %v4134_v45 = vld [vmem:[%s8294_s3 + $0x3e8] sm:$0xff] }
 0x293   :  { %5139 = vmatpush3.msra.mxu1 %v4071_v48  ;;  %5111 = vmatprep.subr.mxu0 %v5942_v2  ;;  %v4118_v48 = vld [vmem:[%s8294_s3 + $0x378] sm:$0xff] }
 0x294   :  { %5140 = vmatprep.subr.mxu1 %v5942_v2  ;;  %5112 = vmatpush3.msra.mxu0 %v4055_v49  ;;  %v4133_v49 = vld [vmem:[%s8294_s3 + $0x3e0] sm:$0xff] }
 0x295   :  { %5141 = vmatpush3.msra.mxu1 %v4070_v50  ;;  %5113 = vmatprep.subr.mxu0 %v5942_v2  ;;  %v4117_v50 = vld [vmem:[%s8294_s3 + $0x370] sm:$0xff] }
 0x296   :  { %5142 = vmatprep.subr.mxu1 %v5942_v2  ;;  %5114 = vmatpush3.msra.mxu0 %v4054_v51  ;;  %v4132_v51 = vld [vmem:[%s8294_s3 + $0x3d8] sm:$0xff] }
 0x297   :  { %5143 = vmatpush3.msra.mxu1 %v4069_v52  ;;  %5115 = vmatprep.subr.mxu0 %v5942_v2  ;;  %v4116_v52 = vld [vmem:[%s8294_s3 + $0x368] sm:$0xff] }
 0x298   :  { %5144 = vmatprep.subr.mxu1 %v5942_v2  ;;  %5116 = vmatpush3.msra.mxu0 %v4053_v53  ;;  %v4131_v53 = vld [vmem:[%s8294_s3 + $0x3d0] sm:$0xff] }
 0x299   :  { %5145 = vmatpush3.msra.mxu1 %v4068_v57  ;;  %5117 = vmatprep.subr.mxu0 %v5942_v2  ;;  %v4115_v57 = vld [vmem:[%s8294_s3 + $0x360] sm:$0xff] }
 0x29a   :  { %5146 = vmatprep.subr.mxu1 %v5942_v2  ;;  %5118 = vmatpush3.msra.mxu0 %v4052_v58  ;;  %v4130_v58 = vld [vmem:[%s8294_s3 + $0x3c8] sm:$0xff] }
 0x29b   :  { %5147 = vmatpush3.msra.mxu1 %v4067_v31  ;;  %5119 = vmatprep.subr.mxu0 %v5942_v2  ;;  %v4114_v31 = vld [vmem:[%s8294_s3 + $0x358] sm:$0xff] }
 0x29c   :  { %5148 = vmatprep.subr.mxu1 %v5942_v2  ;;  %5120 = vmatpush3.msra.mxu0 %v4051_v34  ;;  %v4129_v34 = vld [vmem:[%s8294_s3 + $0x3c0] sm:$0xff] }
 0x29d   :  { %5121 = vmatprep.mubr.msk.f32.mxu0 %vm5947_vm9, %v5942_v2  ;;  %5149 = vmatpush3.msra.mxu1 %v4066_v0  ;;  %v4112_v0 = vld [vmem:[%s8294_s3 + $0x348] sm:$0xff] }
 0x29e   :  { %5150 = vmatprep.mubr.msk.f32.mxu1 %vm5947_vm9, %v5942_v2  ;;  %5122 = vmatmul.mubr.msk.f32.vlgmr.msra.gmra.mxu0 %vm907_vm11, %v1263_v24  ;;  %v4126_v24 = vld [vmem:[%s8294_s3 + $0x3a8] sm:$0xff] }
 0x29f   :  { %5151 = vmatmul.mubr.msk.f32.vlgmr.msra.gmra.mxu1 %vm907_vm11, %v1356_v22  ;;  %5153 = vmatprep.subr.mxu0 %v5942_v2 }
 0x2a0   :  { %5182 = vmatprep.subr.mxu1 %v5942_v2  ;;  %5154 = vmatpush3.msk.msra.mxu0 %vm910_vm8, %v4093_v26 }
 0x2a1   :  { %5183 = vmatpush3.msk.msra.mxu1 %vm910_vm8, %v4108_v23  ;;  %5155 = vmatprep.subr.mxu0 %v5942_v2 }
 0x2a2   :  { %5184 = vmatprep.subr.mxu1 %v5942_v2  ;;  %5156 = vmatpush3.msra.mxu0 %v4092_v60 }
 0x2a3   :  { %5185 = vmatpush3.msra.mxu1 %v4107_v61  ;;  %5157 = vmatprep.subr.mxu0 %v5942_v2 }
 0x2a4   :  { %5186 = vmatprep.subr.mxu1 %v5942_v2  ;;  %5158 = vmatpush3.msra.mxu0 %v4091_v4 }
 0x2a5   :  { %5187 = vmatpush3.msra.mxu1 %v4106_v6  ;;  %5159 = vmatprep.subr.mxu0 %v5942_v2 }
 0x2a6   :  { %5188 = vmatprep.subr.mxu1 %v5942_v2  ;;  %5160 = vmatpush3.msra.mxu0 %v4090_v9 }
 0x2a7   :  { %5189 = vmatpush3.msra.mxu1 %v4105_v5  ;;  %5161 = vmatprep.subr.mxu0 %v5942_v2 }
 0x2a8   :  { %5190 = vmatprep.subr.mxu1 %v5942_v2  ;;  %5162 = vmatpush3.msra.mxu0 %v4089_v10 }
 0x2a9   :  { %5191 = vmatpush3.msra.mxu1 %v4104_v11  ;;  %5163 = vmatprep.subr.mxu0 %v5942_v2 }
 0x2aa   :  { %5192 = vmatprep.subr.mxu1 %v5942_v2  ;;  %5164 = vmatpush3.msra.mxu0 %v4088_v12 }
 0x2ab   :  { %5193 = vmatpush3.msra.mxu1 %v4103_v13  ;;  %5165 = vmatprep.subr.mxu0 %v5942_v2 }
 0x2ac   :  { %5194 = vmatprep.subr.mxu1 %v5942_v2  ;;  %5166 = vmatpush3.msra.mxu0 %v4087_v14 }
 0x2ad   :  { %5195 = vmatpush3.msra.mxu1 %v4102_v15  ;;  %5167 = vmatprep.subr.mxu0 %v5942_v2 }
 0x2ae   :  { %5196 = vmatprep.subr.mxu1 %v5942_v2  ;;  %5168 = vmatpush3.msra.mxu0 %v4086_v16 }
 0x2af   :  { %5197 = vmatpush3.msra.mxu1 %v4101_v17  ;;  %5169 = vmatprep.subr.mxu0 %v5942_v2 }
 0x2b0   :  { %5198 = vmatprep.subr.mxu1 %v5942_v2  ;;  %5170 = vmatpush3.msra.mxu0 %v4085_v18 }
 0x2b1   :  { %5199 = vmatpush3.msra.mxu1 %v4100_v19  ;;  %5171 = vmatprep.subr.mxu0 %v5942_v2  ;;  %v4152_v19 = vld [vmem:[%s8294_s3 + $0x468] sm:$0xff] }
 0x2b2   :  { %5200 = vmatprep.subr.mxu1 %v5942_v2  ;;  %5172 = vmatpush3.msra.mxu0 %v4084_v20  ;;  %v4167_v20 = vld [vmem:[%s8294_s3 + $0x4d0] sm:$0xff] }
 0x2b3   :  { %5201 = vmatpush3.msra.mxu1 %v4099_v21  ;;  %5173 = vmatprep.subr.mxu0 %v5942_v2 }
 0x2b4   :  { %5202 = vmatprep.subr.mxu1 %v5942_v2  ;;  %5174 = vmatpush3.msra.mxu0 %v4083_v25 }
 0x2b5   :  { %5203 = vmatpush3.msra.mxu1 %v4098_v27  ;;  %5175 = vmatprep.subr.mxu0 %v5942_v2 }
 0x2b6   :  { %5204 = vmatprep.subr.mxu1 %v5942_v2  ;;  %5176 = vmatpush3.msra.mxu0 %v4082_v28 }
 0x2b7   :  { %5205 = vmatpush3.msra.mxu1 %v4097_v29  ;;  %5177 = vmatprep.subr.mxu0 %v5942_v2  ;;  %v4151_v29 = vld [vmem:[%s8294_s3 + $0x460] sm:$0xff] }
 0x2b8   :  { %5206 = vmatprep.subr.mxu1 %v5942_v2  ;;  %5178 = vmatpush3.msra.mxu0 %v4081_v30  ;;  %v4166_v30 = vld [vmem:[%s8294_s3 + $0x4c8] sm:$0xff] }
 0x2b9   :  { %5179 = vmatprep.mubr.msk.f32.mxu0 %vm5947_vm9, %v5942_v2  ;;  %5207 = vmatpush3.msra.mxu1 %v4096_v32 }
 0x2ba   :  { %5208 = vmatprep.mubr.msk.f32.mxu1 %vm5947_vm9, %v5942_v2  ;;  %5180 = vmatmul.mubr.msk.f32.vlgmr.msra.gmra.mxu0 %vm907_vm11, %v6368_v46  ;;  %v4137_v46 = vld [vmem:[%s8294_s3 + $0x400] sm:$0xff] }
 0x2bb   :  { %5209 = vmatmul.mubr.msk.f32.vlgmr.msra.gmra.mxu1 %vm907_vm11, %v6371_v47  ;;  %5211 = vmatprep.subr.mxu0 %v5942_v2  ;;  %v4121_v47 = vld [vmem:[%s8294_s3 + $0x390] sm:$0xff] }
 0x2bc   :  { %5240 = vmatprep.subr.mxu1 %v5942_v2  ;;  %5212 = vmatpush3.msk.msra.mxu0 %vm910_vm8, %v4123_v33 }
 0x2bd   :  { %5241 = vmatpush3.msk.msra.mxu1 %vm910_vm8, %v4138_v35  ;;  %5213 = vmatprep.subr.mxu0 %v5942_v2  ;;  %v4150_v35 = vld [vmem:[%s8294_s3 + $0x458] sm:$0xff] }
 0x2be   :  { %5242 = vmatprep.subr.mxu1 %v5942_v2  ;;  %5214 = vmatpush3.msra.mxu0 %v4122_v36  ;;  %v4165_v36 = vld [vmem:[%s8294_s3 + $0x4c0] sm:$0xff] }
 0x2bf   :  { %5243 = vmatpush3.msra.mxu1 %v4137_v46  ;;  %5215 = vmatprep.subr.mxu0 %v5942_v2  ;;  %v714_v46 = vadd.f32 %v6247_v42, %v6252_v44  ;;  %v4148_v42 = vld [vmem:[%s8294_s3 + $0x448] sm:$0xff]  ;;  %v4163_v44 = vld [vmem:[%s8294_s3 + $0x4b0] sm:$0xff] }
 0x2c0   :  { %5244 = vmatprep.subr.mxu1 %v5942_v2  ;;  %5216 = vmatpush3.msra.mxu0 %v4121_v47  ;;  %v4149_v47 = vld [vmem:[%s8294_s3 + $0x450] sm:$0xff] }
 0x2c1   :  { %5245 = vmatpush3.msra.mxu1 %v4136_v37  ;;  %5217 = vmatprep.subr.mxu0 %v5942_v2  ;;  %v4164_v37 = vld [vmem:[%s8294_s3 + $0x4b8] sm:$0xff] }
 0x2c2   :  { %5246 = vmatprep.subr.mxu1 %v5942_v2  ;;  %5218 = vmatpush3.msra.mxu0 %v4120_v39  ;;  %v698_v39 = vpop.f32.mrf.mxu1 }
 0x2c3   :  { %5247 = vmatpush3.msra.mxu1 %v4135_v41  ;;  %5219 = vmatprep.subr.mxu0 %v5942_v2 }
 0x2c4   :  { %5248 = vmatprep.subr.mxu1 %v5942_v2  ;;  %5220 = vmatpush3.msra.mxu0 %v4119_v43 }
 0x2c5   :  { %5249 = vmatpush3.msra.mxu1 %v4134_v45  ;;  %5221 = vmatprep.subr.mxu0 %v5942_v2  ;;  %v713_v45 = vadd.f32 %v6236_v38, %v6242_v40  ;;  %v4161_v40 = vld [vmem:[%s8294_s3 + $0x4a0] sm:$0xff] }
 0x2c6   :  { %5250 = vmatprep.subr.mxu1 %v5942_v2  ;;  %5222 = vmatpush3.msra.mxu0 %v4118_v48  ;;  %v715_v48 = vadd.f32 %v698_v39, %v6177_v8  ;;  %v4146_v8 = vld [vmem:[%s8294_s3 + $0x438] sm:$0xff]  ;;  %v4173_v39 = vld [vmem:[%s8294_s3 + $0x4f0] sm:$0xff] }
 0x2c7   :  { %5251 = vmatpush3.msra.mxu1 %v4133_v49  ;;  %5223 = vmatprep.subr.mxu0 %v5942_v2 }
 0x2c8   :  { %5252 = vmatprep.subr.mxu1 %v5942_v2  ;;  %5224 = vmatpush3.msra.mxu0 %v4117_v50  ;;  %v4147_v50 = vld [vmem:[%s8294_s3 + $0x440] sm:$0xff] }
 0x2c9   :  { %5253 = vmatpush3.msra.mxu1 %v4132_v51  ;;  %5225 = vmatprep.subr.mxu0 %v5942_v2  ;;  %v4162_v51 = vld [vmem:[%s8294_s3 + $0x4a8] sm:$0xff] }
 0x2ca   :  { %5254 = vmatprep.subr.mxu1 %v5942_v2  ;;  %5226 = vmatpush3.msra.mxu0 %v4116_v52 }
 0x2cb   :  { %5255 = vmatpush3.msra.mxu1 %v4131_v53  ;;  %5227 = vmatprep.subr.mxu0 %v5942_v2 }
 0x2cc   :  { %5256 = vmatprep.subr.mxu1 %v5942_v2  ;;  %5228 = vmatpush3.msra.mxu0 %v4115_v57 }
 0x2cd   :  { %5257 = vmatpush3.msra.mxu1 %v4130_v58  ;;  %5229 = vmatprep.subr.mxu0 %v5942_v2  ;;  %v4145_v58 = vld [vmem:[%s8294_s3 + $0x430] sm:$0xff] }
 0x2ce   :  { %5258 = vmatprep.subr.mxu1 %v5942_v2  ;;  %5230 = vmatpush3.msra.mxu0 %v4114_v31  ;;  %v4160_v31 = vld [vmem:[%s8294_s3 + $0x498] sm:$0xff] }
 0x2cf   :  { %5259 = vmatpush3.msra.mxu1 %v4129_v34  ;;  %5231 = vmatprep.subr.mxu0 %v5942_v2  ;;  %v4144_v34 = vld [vmem:[%s8294_s3 + $0x428] sm:$0xff] }
 0x2d0   :  { %5260 = vmatprep.subr.mxu1 %v5942_v2  ;;  %5232 = vmatpush3.msra.mxu0 %v4113_v62  ;;  %v4159_v62 = vld [vmem:[%s8294_s3 + $0x490] sm:$0xff] }
 0x2d1   :  { %5261 = vmatpush3.msra.mxu1 %v4128_v63  ;;  %5233 = vmatprep.subr.mxu0 %v5942_v2  ;;  %v4143_v63 = vld [vmem:[%s8294_s3 + $0x420] sm:$0xff] }
 0x2d2   :  { %5262 = vmatprep.subr.mxu1 %v5942_v2  ;;  %5234 = vmatpush3.msra.mxu0 %v4112_v0  ;;  %v4158_v0 = vld [vmem:[%s8294_s3 + $0x488] sm:$0xff] }
 0x2d3   :  { %5263 = vmatpush3.msra.mxu1 %v4127_v1  ;;  %5235 = vmatprep.subr.mxu0 %v5942_v2  ;;  %v4142_v1 = vld [vmem:[%s8294_s3 + $0x418] sm:$0xff] }
 0x2d4   :  { %5264 = vmatprep.subr.mxu1 %v5942_v2  ;;  %5236 = vmatpush3.msra.mxu0 %v4111_v3  ;;  %v4157_v3 = vld [vmem:[%s8294_s3 + $0x480] sm:$0xff] }
 0x2d5   :  { %5265 = vmatpush3.msra.mxu1 %v4126_v24  ;;  %5237 = vmatprep.mubr.msk.f32.mxu0 %vm5947_vm9, %v5942_v2  ;;  %v722_v24 = vld [vmem:[%s8292_s2 + $0x18] sm:$0xff] }
 0x2d6   :  { %5266 = vmatprep.mubr.msk.f32.mxu1 %vm5947_vm9, %v5942_v2  ;;  %5269 = vmatprep.subr.mxu0 %v5942_v2 }
 0x2d7   :  { %5298 = vmatprep.subr.mxu1 %v5942_v2 }
 0x2e2   :  { %v790_v26 = vpop.permute.xlu0 %789 }
 0x2e3   :  { %v788_v22 = vpop.permute.xlu1 %787 }
 0x2e4   :  { %v806_v61 = vsel %vm96_vm4, %v788_v22, %v790_v26  ;;  %v4141_v26 = vld [vmem:[%s8294_s3 + $0x410] sm:$0xff] }
 0x2e5   :  { %v822_v6 = vmax.f32 %v6400_v56, %v806_v61  ;;  %v4153_v56 = vld [vmem:[%s8294_s3 + $0x470] sm:$0x7] }
 0x2e8   :  { %v836_v23 = vpop.permute.xlu0 %835  ;;  %v786_v60 = vpop.permute.xlu1 %785 }
 0x2e9   :  { %v805_v4 = vsel %vm96_vm4, %v786_v60, %v788_v22  ;;  %v4156_v60 = vld [vmem:[%s8294_s3 + $0x478] sm:$0xff] }
 0x2ea   :  { %v821_v9 = vmax.f32 %v6425_v59, %v805_v4  ;;  %v4168_v59 = vld [vmem:[%s8294_s3 + $0x4d8] sm:$0x7] }
 0x2ed   :  { %v834_v5 = vpop.permute.xlu0 %833  ;;  %v838_v10 = vpop.permute.xlu1 %837 }
 0x2ee   :  { %v853_v11 = vsel %vm507_vm7, %v834_v5, %v836_v23  ;;  %v854_v12 = vsel %vm507_vm7, %v836_v23, %v838_v10  ;;  %v4198_v10 = vld [vmem:[%s8294_s3 + $0x5a8] sm:$0x7] }
 0x2ef   :  { %v6839_v13 = vmax.f32 %v821_v9, %v853_v11  ;;  %v6841_v14 = vmax.f32 %v822_v6, %v854_v12  ;;  %v4183_v9 = vld [vmem:[%s8294_s3 + $0x540] sm:$0x7]  ;;  %v4182_v11 = vld [vmem:[%s8294_s3 + $0x538] sm:$0xff] }
 0x2f0   :  { %v4197_v12 = vld [vmem:[%s8294_s3 + $0x5a0] sm:$0xff] }
 0x2f1   :  { %v1635_v15 = vrot.slane %v6841_v14, 7  ;;  %v1727_v16 = vrot.slane %v6839_v13, 1  ;;  %v2191_v21 = vrot.slane %v6839_v13, 6  ;;  %v2192_v25 = vrot.slane %v6841_v14, 5 }
 0x2f2   :  { %v2284_v27 = vrot.slane %v6839_v13, 7  ;;  %v2285_v28 = vrot.slane %v6841_v14, 6  ;;  %v1819_v22 = vrot.slane %v6839_v13, 2  ;;  %v1820_v23 = vrot.slane %v6841_v14, 1 }
 0x2f3   :  { %v1636_v17 = vsel %vm905_vm10, %v1635_v15, %v6839_v13  ;;  %v1728_v18 = vsel %vm905_vm10, %v6841_v14, %v1727_v16  ;;  %v6878_v32 = vsel %vm905_vm10, %v2192_v25, %v2191_v21  ;;  %v1912_v61 = vrot.slane %v6839_v13, 3  ;;  %v4181_v15 = vld [vmem:[%s8294_s3 + $0x530] sm:$0xff]  ;;  %v4196_v16 = vld [vmem:[%s8294_s3 + $0x598] sm:$0xff] }
 0x2f4   :  { %5238 = vmatmul.mubr.msk.f32.vlgmr.msra.gmra.mxu0 %vm907_vm11, %v1636_v17  ;;  %5267 = vmatmul.mubr.msk.f32.vlgmr.msra.gmra.mxu1 %vm907_vm11, %v1728_v18  ;;  %v6881_v33 = vsel %vm905_vm10, %v2285_v28, %v2284_v27  ;;  %v1913_v4 = vrot.slane %v6841_v14, 2  ;;  %v1821_v6 = vsel %vm905_vm10, %v1820_v23, %v1819_v22  ;;  %v4179_v17 = vld [vmem:[%s8294_s3 + $0x520] sm:$0xff]  ;;  %v4194_v18 = vld [vmem:[%s8294_s3 + $0x588] sm:$0xff]  ;;  %v4177_v21 = vld [vmem:[%s8294_s3 + $0x510] sm:$0xff] }
 0x2f5   :  { %5270 = vmatpush3.msk.msra.mxu0 %vm910_vm8, %v4153_v56  ;;  %5299 = vmatpush3.msk.msra.mxu1 %vm910_vm8, %v4168_v59  ;;  %v4180_v56 = vld [vmem:[%s8294_s3 + $0x528] sm:$0xff]  ;;  %v4195_v59 = vld [vmem:[%s8294_s3 + $0x590] sm:$0xff]  ;;  %v4192_v25 = vld [vmem:[%s8294_s3 + $0x578] sm:$0xff] }
 0x2f6   :  { %5271 = vmatprep.subr.mxu0 %v5942_v2  ;;  %5300 = vmatprep.subr.mxu1 %v5942_v2  ;;  %v1914_v5 = vsel %vm905_vm10, %v1913_v4, %v1912_v61  ;;  %v4176_v27 = vld [vmem:[%s8294_s3 + $0x508] sm:$0xff]  ;;  %v4191_v28 = vld [vmem:[%s8294_s3 + $0x570] sm:$0xff]  ;;  %v4207_v23 = vld [vmem:[%s8294_s3 + $0x5e0] sm:$0xff] }
 0x2f7   :  { %5272 = vmatpush3.msra.mxu0 %v4152_v19  ;;  %5301 = vmatpush3.msra.mxu1 %v4167_v20  ;;  %v4178_v19 = vld [vmem:[%s8294_s3 + $0x518] sm:$0xff]  ;;  %v4193_v20 = vld [vmem:[%s8294_s3 + $0x580] sm:$0xff]  ;;  %v4223_v22 = vld [vmem:[%s8294_s3 + $0x650] sm:$0xff] }
 0x2f8   :  { %5273 = vmatprep.subr.mxu0 %v5942_v2  ;;  %5302 = vmatprep.subr.mxu1 %v5942_v2  ;;  %v4206_v61 = vld [vmem:[%s8294_s3 + $0x5d8] sm:$0xff]  ;;  %v4221_v4 = vld [vmem:[%s8294_s3 + $0x640] sm:$0xff] }
 0x2f9   :  { %5274 = vmatpush3.msra.mxu0 %v4151_v29  ;;  %5303 = vmatpush3.msra.mxu1 %v4166_v30  ;;  %v4175_v29 = vld [vmem:[%s8294_s3 + $0x500] sm:$0xff]  ;;  %v7067_v30 = vpop.f32.mrf.mxu0 }
 0x2fa   :  { %5275 = vmatprep.subr.mxu0 %v5942_v2  ;;  %5304 = vmatprep.subr.mxu1 %v5942_v2 }
 0x2fb   :  { %5276 = vmatpush3.msra.mxu0 %v4150_v35  ;;  %5305 = vmatpush3.msra.mxu1 %v4165_v36  ;;  %v736_v41 = vpop.permute.xlu1 %735  ;;  %v4190_v35 = vld [vmem:[%s8294_s3 + $0x568] sm:$0xff]  ;;  %v4174_v36 = vld [vmem:[%s8294_s3 + $0x4f8] sm:$0xff] }
 0x2fc   :  { %v750_v43 = vadd.f32 %v736_v41, %v714_v46  ;;  %5277 = vmatprep.subr.mxu0 %v5942_v2  ;;  %5306 = vmatprep.subr.mxu1 %v5942_v2  ;;  %v749_v52 = vadd.f32 %v736_v41, %v713_v45  ;;  %v751_v38 = vadd.f32 %v736_v41, %v715_v48  ;;  %v4189_v46 = vld [vmem:[%s8294_s3 + $0x560] sm:$0xff]  ;;  %v4172_v45 = vld [vmem:[%s8294_s3 + $0x4e8] sm:$0xff]  ;;  %v4187_v48 = vld [vmem:[%s8294_s3 + $0x550] sm:$0xff] }
 0x2fd   :  { %5278 = vmatpush3.msra.mxu0 %v4149_v47  ;;  %5307 = vmatpush3.msra.mxu1 %v4164_v37 }
 0x2fe   :  { %5279 = vmatprep.subr.mxu0 %v5942_v2  ;;  %5308 = vmatprep.subr.mxu1 %v5942_v2  ;;  %v6914_v49 = vmax.f32 %v750_v43, 0.0  ;;  %v763_v53 = vmax.f32 %v751_v38, 0.0  ;;  %v6936_v57 = vmax.f32 %v749_v52, 0.0  ;;  %v4188_v43 = vld [vmem:[%s8294_s3 + $0x558] sm:$0xff]  ;;  %v2006_v52 = vrot.slane %v6841_v14, 3  ;;  %v4186_v38 = vld [vmem:[%s8294_s3 + $0x548] sm:$0xff] }
 0x2ff   :  { %5280 = vmatpush3.msra.mxu0 %v4148_v42  ;;  %5309 = vmatpush3.msra.mxu1 %v4163_v44 }
 0x300   :  { %5281 = vmatprep.subr.mxu0 %v5942_v2  ;;  %5310 = vmatprep.subr.mxu1 %v5942_v2 }
 0x301   :  { %841 = vrot.lane.b32.xlu1 %v6914_v49, %s5945_s0  ;;  %793 = vrot.lane.b32.xlu0 %v6914_v49, %s5944_s10 }
 0x302   :  { %5282 = vmatpush3.msra.mxu0 %v4147_v50  ;;  %5311 = vmatpush3.msra.mxu1 %v4162_v51  ;;  %v4171_v50 = vld [vmem:[%s8294_s3 + $0x4e0] sm:$0xff]  ;;  %v2005_v51 = vrot.slane %v6839_v13, 4 }
 0x303   :  { %5283 = vmatprep.subr.mxu0 %v5942_v2  ;;  %5312 = vmatprep.subr.mxu1 %v5942_v2 }
 0x304   :  { %5284 = vmatpush3.msra.mxu0 %v4146_v8  ;;  %5313 = vmatpush3.msra.mxu1 %v4161_v40  ;;  %v2098_v8 = vrot.slane %v6839_v13, 5  ;;  %v2099_v40 = vrot.slane %v6841_v14, 4  ;;  %v4228_v14 = vld [vmem:[%s8294_s3 + $0x678] sm:$0x7] }
 0x305   :  { %5285 = vmatprep.subr.mxu0 %v5942_v2  ;;  %5314 = vmatprep.subr.mxu1 %v5942_v2 }
 0x306   :  { %795 = vrot.lane.b32.xlu1 %v763_v53, %s5944_s10  ;;  %791 = vrot.lane.b32.xlu0 %v6936_v57, %s5944_s10  ;;  %v2100_v13 = vsel %vm905_vm10, %v2099_v40, %v2098_v8  ;;  %v4248_v40 = vld [vmem:[%s8294_s3 + $0x6f8] sm:$0xff] }
 0x307   :  { %5286 = vmatpush3.msra.mxu0 %v4145_v58  ;;  %5315 = vmatpush3.msra.mxu1 %v4160_v31  ;;  %v4213_v58 = vld [vmem:[%s8294_s3 + $0x610] sm:$0x7]  ;;  %v4212_v31 = vld [vmem:[%s8294_s3 + $0x608] sm:$0xff] }
 0x308   :  { %5287 = vmatprep.subr.mxu0 %v5942_v2  ;;  %5316 = vmatprep.subr.mxu1 %v5942_v2 }
 0x309   :  { %5288 = vmatpush3.msra.mxu0 %v4144_v34  ;;  %5317 = vmatpush3.msra.mxu1 %v4159_v62  ;;  %v4227_v34 = vld [vmem:[%s8294_s3 + $0x670] sm:$0xff]  ;;  %v4211_v62 = vld [vmem:[%s8294_s3 + $0x600] sm:$0xff] }
 0x30a   :  { %5289 = vmatprep.subr.mxu0 %v5942_v2  ;;  %5318 = vmatprep.subr.mxu1 %v5942_v2 }
 0x30b   :  { %839 = vrot.lane.b32.xlu1 %v6936_v57, %s5945_s0  ;;  %843 = vrot.lane.b32.xlu0 %v763_v53, %s5945_s0  ;;  %v2007_v53 = vsel %vm905_vm10, %v2006_v52, %v2005_v51  ;;  %v4234_v51 = vld [vmem:[%s8294_s3 + $0x698] sm:$0xff]  ;;  %v4249_v52 = vld [vmem:[%s8294_s3 + $0x700] sm:$0xff] }
 0x30c   :  { %5290 = vmatpush3.msra.mxu0 %v4143_v63  ;;  %5319 = vmatpush3.msra.mxu1 %v4158_v0  ;;  %v4226_v63 = vld [vmem:[%s8294_s3 + $0x668] sm:$0xff]  ;;  %v4210_v0 = vld [vmem:[%s8294_s3 + $0x5f8] sm:$0xff] }
 0x30d   :  { %5291 = vmatprep.subr.mxu0 %v5942_v2  ;;  %5320 = vmatprep.subr.mxu1 %v5942_v2 }
 0x30e   :  { %5292 = vmatpush3.msra.mxu0 %v4142_v1  ;;  %5321 = vmatpush3.msra.mxu1 %v4157_v3  ;;  %v4225_v1 = vld [vmem:[%s8294_s3 + $0x660] sm:$0xff]  ;;  %v4209_v3 = vld [vmem:[%s8294_s3 + $0x5f0] sm:$0xff] }
 0x30f   :  { %5293 = vmatprep.subr.mxu0 %v5942_v2  ;;  %5322 = vmatprep.subr.mxu1 %v5942_v2 }
 0x310   :  { %740 = vperm.xlu0 %5936, %v722_v24   ;;  %5294 = vmatpush3.msra.mxu0 %v4141_v26  ;;  %v4224_v24 = vld [vmem:[%s8294_s3 + $0x658] sm:$0xff]  ;;  %v4208_v26 = vld [vmem:[%s8294_s3 + $0x5e8] sm:$0xff] }
 0x311   :  { %5295 = vmatprep.mubr.msk.f32.mxu0 %vm5947_vm9, %v5942_v2  ;;  %5323 = vmatpush3.msra.mxu1 %v4156_v60  ;;  %v4222_v60 = vld [vmem:[%s8294_s3 + $0x648] sm:$0xff] }
 0x312   :  { %5324 = vmatprep.mubr.msk.f32.mxu1 %vm5947_vm9, %v5942_v2  ;;  %5296 = vmatmul.mubr.msk.f32.vlgmr.msra.gmra.mxu0 %vm907_vm11, %v1821_v6  ;;  %v4205_v6 = vld [vmem:[%s8294_s3 + $0x5d0] sm:$0xff] }
 0x313   :  { %5325 = vmatmul.mubr.msk.f32.vlgmr.msra.gmra.mxu1 %vm907_vm11, %v1914_v5  ;;  %5327 = vmatprep.subr.mxu0 %v5942_v2  ;;  %v4204_v5 = vld [vmem:[%s8294_s3 + $0x5c8] sm:$0xff] }
 0x314   :  { %5356 = vmatprep.subr.mxu1 %v5942_v2  ;;  %5328 = vmatpush3.msk.msra.mxu0 %vm910_vm8, %v4183_v9  ;;  %v4220_v9 = vld [vmem:[%s8294_s3 + $0x638] sm:$0xff] }
 0x315   :  { %5357 = vmatpush3.msk.msra.mxu1 %vm910_vm8, %v4198_v10  ;;  %5329 = vmatprep.subr.mxu0 %v5942_v2  ;;  %v4219_v10 = vld [vmem:[%s8294_s3 + $0x630] sm:$0xff] }
 0x316   :  { %5358 = vmatprep.subr.mxu1 %v5942_v2  ;;  %5330 = vmatpush3.msra.mxu0 %v4182_v11  ;;  %v4203_v11 = vld [vmem:[%s8294_s3 + $0x5c0] sm:$0xff] }
 0x317   :  { %5359 = vmatpush3.msra.mxu1 %v4197_v12  ;;  %5331 = vmatprep.subr.mxu0 %v5942_v2  ;;  %v4218_v12 = vld [vmem:[%s8294_s3 + $0x628] sm:$0xff] }
 0x318   :  { %5360 = vmatprep.subr.mxu1 %v5942_v2  ;;  %5332 = vmatpush3.msra.mxu0 %v4181_v15 }
 0x319   :  { %5361 = vmatpush3.msra.mxu1 %v4196_v16  ;;  %5333 = vmatprep.subr.mxu0 %v5942_v2  ;;  %v4202_v16 = vld [vmem:[%s8294_s3 + $0x5b8] sm:$0xff] }
 0x31a   :  { %5362 = vmatprep.subr.mxu1 %v5942_v2  ;;  %5334 = vmatpush3.msra.mxu0 %v4180_v56 }
 0x31b   :  { %5363 = vmatpush3.msra.mxu1 %v4195_v59  ;;  %5335 = vmatprep.subr.mxu0 %v5942_v2 }
 0x31c   :  { %5364 = vmatprep.subr.mxu1 %v5942_v2  ;;  %5336 = vmatpush3.msra.mxu0 %v4179_v17  ;;  %v4217_v17 = vld [vmem:[%s8294_s3 + $0x620] sm:$0xff] }
 0x31d   :  { %5365 = vmatpush3.msra.mxu1 %v4194_v18  ;;  %5337 = vmatprep.subr.mxu0 %v5942_v2 }
 0x31e   :  { %5366 = vmatprep.subr.mxu1 %v5942_v2  ;;  %5338 = vmatpush3.msra.mxu0 %v4178_v19  ;;  %v4201_v19 = vld [vmem:[%s8294_s3 + $0x5b0] sm:$0xff] }
 0x31f   :  { %5367 = vmatpush3.msra.mxu1 %v4193_v20  ;;  %5339 = vmatprep.subr.mxu0 %v5942_v2 }
 0x320   :  { %5368 = vmatprep.subr.mxu1 %v5942_v2  ;;  %5340 = vmatpush3.msra.mxu0 %v4177_v21 }
 0x321   :  { %5369 = vmatpush3.msra.mxu1 %v4192_v25  ;;  %5341 = vmatprep.subr.mxu0 %v5942_v2  ;;  %v4216_v25 = vld [vmem:[%s8294_s3 + $0x618] sm:$0xff] }
 0x322   :  { %5370 = vmatprep.subr.mxu1 %v5942_v2  ;;  %5342 = vmatpush3.msra.mxu0 %v4176_v27  ;;  %v4243_v27 = vld [vmem:[%s8294_s3 + $0x6e0] sm:$0x7] }
 0x323   :  { %5371 = vmatpush3.msra.mxu1 %v4191_v28  ;;  %5343 = vmatprep.subr.mxu0 %v5942_v2  ;;  %v4258_v28 = vld [vmem:[%s8294_s3 + $0x748] sm:$0x7] }
 0x324   :  { %5372 = vmatprep.subr.mxu1 %v5942_v2  ;;  %5344 = vmatpush3.msra.mxu0 %v4175_v29  ;;  %v980_v47 = vpop.f32.mrf.mxu0  ;;  %v1057_v37 = vpop.f32.mrf.mxu1  ;;  %v4242_v29 = vld [vmem:[%s8294_s3 + $0x6d8] sm:$0xff] }
 0x325   :  { %5373 = vmatpush3.msra.mxu1 %v4190_v35  ;;  %5345 = vmatprep.subr.mxu0 %v5942_v2  ;;  %v7085_v41 = vadd.f32 %v1057_v37, %v980_v47  ;;  %v4256_v35 = vld [vmem:[%s8294_s3 + $0x738] sm:$0xff]  ;;  %v4239_v47 = vld [vmem:[%s8294_s3 + $0x6c0] sm:$0xff]  ;;  %v4254_v37 = vld [vmem:[%s8294_s3 + $0x728] sm:$0xff] }
 0x326   :  { %5374 = vmatprep.subr.mxu1 %v5942_v2  ;;  %5346 = vmatpush3.msra.mxu0 %v4174_v36  ;;  %v5007_v42 = vpop.f32.mrf.mxu0  ;;  %v5036_v44 = vpop.f32.mrf.mxu1  ;;  %v4240_v36 = vld [vmem:[%s8294_s3 + $0x6c8] sm:$0xff] }
 0x327   :  { %5375 = vmatpush3.msra.mxu1 %v4189_v46  ;;  %5347 = vmatprep.subr.mxu0 %v5942_v2  ;;  %v4255_v46 = vld [vmem:[%s8294_s3 + $0x730] sm:$0xff]  ;;  %v4252_v42 = vld [vmem:[%s8294_s3 + $0x718] sm:$0xff]  ;;  %v4236_v44 = vld [vmem:[%s8294_s3 + $0x6a8] sm:$0xff] }
 0x328   :  { %5376 = vmatprep.subr.mxu1 %v5942_v2  ;;  %5348 = vmatpush3.msra.mxu0 %v4173_v39  ;;  %v4238_v39 = vld [vmem:[%s8294_s3 + $0x6b8] sm:$0xff] }
 0x329   :  { %5377 = vmatpush3.msra.mxu1 %v4188_v43  ;;  %5349 = vmatprep.subr.mxu0 %v5942_v2  ;;  %v4237_v43 = vld [vmem:[%s8294_s3 + $0x6b0] sm:$0xff] }
 0x32a   :  { %5378 = vmatprep.subr.mxu1 %v5942_v2  ;;  %5350 = vmatpush3.msra.mxu0 %v4172_v45  ;;  %v4251_v45 = vld [vmem:[%s8294_s3 + $0x710] sm:$0xff] }
 0x32b   :  { %5379 = vmatpush3.msra.mxu1 %v4187_v48  ;;  %5351 = vmatprep.subr.mxu0 %v5942_v2  ;;  %v4235_v48 = vld [vmem:[%s8294_s3 + $0x6a0] sm:$0xff] }
 0x32c   :  { %5380 = vmatprep.subr.mxu1 %v5942_v2  ;;  %5352 = vmatpush3.msra.mxu0 %v4171_v50  ;;  %v4250_v50 = vld [vmem:[%s8294_s3 + $0x708] sm:$0xff] }
 0x32d   :  { %5353 = vmatprep.mubr.msk.f32.mxu0 %vm5947_vm9, %v5942_v2  ;;  %5381 = vmatpush3.msra.mxu1 %v4186_v38  ;;  %v4233_v38 = vld [vmem:[%s8294_s3 + $0x690] sm:$0xff] }
 0x32e   :  { %5382 = vmatprep.mubr.msk.f32.mxu1 %vm5947_vm9, %v5942_v2  ;;  %5354 = vmatmul.mubr.msk.f32.vlgmr.msra.gmra.mxu0 %vm907_vm11, %v2007_v53 }
 0x32f   :  { %5383 = vmatmul.mubr.msk.f32.vlgmr.msra.gmra.mxu1 %vm907_vm11, %v2100_v13  ;;  %5385 = vmatprep.subr.mxu0 %v5942_v2  ;;  %v4232_v13 = vld [vmem:[%s8294_s3 + $0x688] sm:$0xff] }
 0x330   :  { %5414 = vmatprep.subr.mxu1 %v5942_v2  ;;  %5386 = vmatpush3.msk.msra.mxu0 %vm910_vm8, %v4213_v58 }
 0x331   :  { %5415 = vmatpush3.msk.msra.mxu1 %vm910_vm8, %v4228_v14  ;;  %5387 = vmatprep.subr.mxu0 %v5942_v2 }
 0x332   :  { %5416 = vmatprep.subr.mxu1 %v5942_v2  ;;  %5388 = vmatpush3.msra.mxu0 %v4212_v31  ;;  %v4247_v31 = vld [vmem:[%s8294_s3 + $0x6f0] sm:$0xff] }
 0x333   :  { %5417 = vmatpush3.msra.mxu1 %v4227_v34  ;;  %5389 = vmatprep.subr.mxu0 %v5942_v2 }
 0x334   :  { %5418 = vmatprep.subr.mxu1 %v5942_v2  ;;  %5390 = vmatpush3.msra.mxu0 %v4211_v62 }
 0x335   :  { %5419 = vmatpush3.msra.mxu1 %v4226_v63  ;;  %5391 = vmatprep.subr.mxu0 %v5942_v2  ;;  %v4231_v63 = vld [vmem:[%s8294_s3 + $0x680] sm:$0xff] }
 0x336   :  { %5420 = vmatprep.subr.mxu1 %v5942_v2  ;;  %5392 = vmatpush3.msra.mxu0 %v4210_v0  ;;  %v4246_v0 = vld [vmem:[%s8294_s3 + $0x6e8] sm:$0xff] }
 0x337   :  { %5421 = vmatpush3.msra.mxu1 %v4225_v1  ;;  %5393 = vmatprep.subr.mxu0 %v5942_v2 }
 0x338   :  { %5422 = vmatprep.subr.mxu1 %v5942_v2  ;;  %5394 = vmatpush3.msra.mxu0 %v4209_v3 }
 0x339   :  { %5423 = vmatpush3.msra.mxu1 %v4224_v24  ;;  %5395 = vmatprep.subr.mxu0 %v5942_v2 }
 0x33a   :  { %5424 = vmatprep.subr.mxu1 %v5942_v2  ;;  %5396 = vmatpush3.msra.mxu0 %v4208_v26 }
 0x33b   :  { %5425 = vmatpush3.msra.mxu1 %v4223_v22  ;;  %5397 = vmatprep.subr.mxu0 %v5942_v2 }
 0x33c   :  { %5426 = vmatprep.subr.mxu1 %v5942_v2  ;;  %5398 = vmatpush3.msra.mxu0 %v4207_v23 }
 0x33d   :  { %5427 = vmatpush3.msra.mxu1 %v4222_v60  ;;  %5399 = vmatprep.subr.mxu0 %v5942_v2 }
 0x33e   :  { %5428 = vmatprep.subr.mxu1 %v5942_v2  ;;  %5400 = vmatpush3.msra.mxu0 %v4206_v61 }
 0x33f   :  { %5429 = vmatpush3.msra.mxu1 %v4221_v4  ;;  %5401 = vmatprep.subr.mxu0 %v5942_v2 }
 0x340   :  { %5430 = vmatprep.subr.mxu1 %v5942_v2  ;;  %5402 = vmatpush3.msra.mxu0 %v4205_v6 }
 0x341   :  { %5431 = vmatpush3.msra.mxu1 %v4220_v9  ;;  %5403 = vmatprep.subr.mxu0 %v5942_v2 }
 0x342   :  { %5432 = vmatprep.subr.mxu1 %v5942_v2  ;;  %5404 = vmatpush3.msra.mxu0 %v4204_v5  ;;  %v1149_v15 = vpop.f32.mrf.mxu0 }
 0x343   :  { %5433 = vmatpush3.msra.mxu1 %v4219_v10  ;;  %5405 = vmatprep.subr.mxu0 %v5942_v2  ;;  %v1153_v56 = vadd.f32 %v1149_v15, %v7085_v41  ;;  %v1242_v59 = vpop.f32.mrf.mxu1  ;;  %v4253_v41 = vld [vmem:[%s8294_s3 + $0x720] sm:$0xff] }
 0x344   :  { %5434 = vmatprep.subr.mxu1 %v5942_v2  ;;  %5406 = vmatpush3.msra.mxu0 %v4203_v11  ;;  %v5065_v18 = vpop.f32.mrf.mxu0 }
 0x345   :  { %5435 = vmatpush3.msra.mxu1 %v4218_v12  ;;  %5407 = vmatprep.subr.mxu0 %v5942_v2  ;;  %v7222_v20 = vadd.f32 %v1242_v59, %v1153_v56  ;;  %v5094_v21 = vpop.f32.mrf.mxu1 }
 0x346   :  { %5436 = vmatprep.subr.mxu1 %v5942_v2  ;;  %5408 = vmatpush3.msra.mxu0 %v4202_v16 }
 0x347   :  { %5437 = vmatpush3.msra.mxu1 %v4217_v17  ;;  %5409 = vmatprep.subr.mxu0 %v5942_v2 }
 0x348   :  { %5438 = vmatprep.subr.mxu1 %v5942_v2  ;;  %5410 = vmatpush3.msra.mxu0 %v4201_v19 }
 0x349   :  { %5411 = vmatprep.mubr.msk.f32.mxu0 %vm5947_vm9, %v5942_v2  ;;  %5439 = vmatpush3.msra.mxu1 %v4216_v25 }
 0x34a   :  { %5440 = vmatprep.mubr.msk.f32.mxu1 %vm5947_vm9, %v5942_v2  ;;  %5412 = vmatmul.mubr.msk.f32.vlgmr.msra.gmra.mxu0 %vm907_vm11, %v6878_v32  ;;  %v4257_v32 = vld [vmem:[%s8294_s3 + $0x740] sm:$0xff] }
 0x34b   :  { %5441 = vmatmul.mubr.msk.f32.vlgmr.msra.gmra.mxu1 %vm907_vm11, %v6881_v33  ;;  %5443 = vmatprep.subr.mxu0 %v5942_v2  ;;  %v4241_v33 = vld [vmem:[%s8294_s3 + $0x6d0] sm:$0xff] }
 0x34c   :  { %5472 = vmatprep.subr.mxu1 %v5942_v2  ;;  %5444 = vmatpush3.msk.msra.mxu0 %vm910_vm8, %v4243_v27  ;;  %v4287_v27 = vld [vmem:[%s8294_s3 + $0x810] sm:$0xff] }
 0x34d   :  { %5473 = vmatpush3.msk.msra.mxu1 %vm910_vm8, %v4258_v28  ;;  %5445 = vmatprep.subr.mxu0 %v5942_v2  ;;  %v4272_v28 = vld [vmem:[%s8294_s3 + $0x7a8] sm:$0xff] }
 0x34e   :  { %5474 = vmatprep.subr.mxu1 %v5942_v2  ;;  %5446 = vmatpush3.msra.mxu0 %v4242_v29 }
 0x34f   :  { %5475 = vmatpush3.msra.mxu1 %v4257_v32  ;;  %5447 = vmatprep.subr.mxu0 %v5942_v2 }
 0x350   :  { %5476 = vmatprep.subr.mxu1 %v5942_v2  ;;  %5448 = vmatpush3.msra.mxu0 %v4241_v33 }
 0x351   :  { %5477 = vmatpush3.msra.mxu1 %v4256_v35  ;;  %5449 = vmatprep.subr.mxu0 %v5942_v2  ;;  %v4286_v35 = vld [vmem:[%s8294_s3 + $0x808] sm:$0xff] }
 0x352   :  { %5478 = vmatprep.subr.mxu1 %v5942_v2  ;;  %5450 = vmatpush3.msra.mxu0 %v4240_v36  ;;  %v4271_v36 = vld [vmem:[%s8294_s3 + $0x7a0] sm:$0xff] }
 0x353   :  { %5479 = vmatpush3.msra.mxu1 %v4255_v46  ;;  %5451 = vmatprep.subr.mxu0 %v5942_v2 }
 0x354   :  { %5480 = vmatprep.subr.mxu1 %v5942_v2  ;;  %5452 = vmatpush3.msra.mxu0 %v4239_v47 }
 0x355   :  { %5481 = vmatpush3.msra.mxu1 %v4254_v37  ;;  %5453 = vmatprep.subr.mxu0 %v5942_v2  ;;  %v4285_v37 = vld [vmem:[%s8294_s3 + $0x800] sm:$0xff] }
 0x356   :  { %5482 = vmatprep.subr.mxu1 %v5942_v2  ;;  %5454 = vmatpush3.msra.mxu0 %v4238_v39  ;;  %v4270_v39 = vld [vmem:[%s8294_s3 + $0x798] sm:$0xff] }
 0x357   :  { %5483 = vmatpush3.msra.mxu1 %v4253_v41  ;;  %5455 = vmatprep.subr.mxu0 %v5942_v2  ;;  %v717_v41 = vadd.f32 %v7067_v30, %v6274_v54  ;;  %v4283_v54 = vld [vmem:[%s8294_s3 + $0x7f0] sm:$0xff]  ;;  %v4268_v30 = vld [vmem:[%s8294_s3 + $0x788] sm:$0xff] }
 0x358   :  { %5484 = vmatprep.subr.mxu1 %v5942_v2  ;;  %5456 = vmatpush3.msra.mxu0 %v4237_v43  ;;  %v4284_v43 = vld [vmem:[%s8294_s3 + $0x7f8] sm:$0xff] }
 0x359   :  { %5485 = vmatpush3.msra.mxu1 %v4252_v42  ;;  %5457 = vmatprep.subr.mxu0 %v5942_v2 }
 0x35a   :  { %5486 = vmatprep.subr.mxu1 %v5942_v2  ;;  %5458 = vmatpush3.msra.mxu0 %v4236_v44  ;;  %v4269_v44 = vld [vmem:[%s8294_s3 + $0x790] sm:$0xff] }
 0x35b   :  { %5487 = vmatpush3.msra.mxu1 %v4251_v45  ;;  %5459 = vmatprep.subr.mxu0 %v5942_v2 }
 0x35c   :  { %5488 = vmatprep.subr.mxu1 %v5942_v2  ;;  %5460 = vmatpush3.msra.mxu0 %v4235_v48 }
 0x35d   :  { %5489 = vmatpush3.msra.mxu1 %v4250_v50  ;;  %5461 = vmatprep.subr.mxu0 %v5942_v2 }
 0x35e   :  { %v1335_v8 = vpop.f32.mrf.mxu0  ;;  %5490 = vmatprep.subr.mxu1 %v5942_v2  ;;  %5462 = vmatpush3.msra.mxu0 %v4234_v51 }
 0x35f   :  { %v1339_v53 = vadd.f32 %v1335_v8, %v7222_v20  ;;  %v1428_v58 = vpop.f32.mrf.mxu1  ;;  %5491 = vmatpush3.msra.mxu1 %v4249_v52  ;;  %5463 = vmatprep.subr.mxu0 %v5942_v2  ;;  %v4273_v20 = vld [vmem:[%s8294_s3 + $0x7b0] sm:$0x7]  ;;  %v4282_v52 = vld [vmem:[%s8294_s3 + $0x7e8] sm:$0xff]  ;;  %v4266_v8 = vld [vmem:[%s8294_s3 + $0x778] sm:$0xff] }
 0x360   :  { %v5123_v14 = vpop.f32.mrf.mxu0  ;;  %5492 = vmatprep.subr.mxu1 %v5942_v2  ;;  %5464 = vmatpush3.msra.mxu0 %v4233_v38 }
 0x361   :  { %v1432_v34 = vadd.f32 %v1428_v58, %v1339_v53  ;;  %v5152_v62 = vpop.f32.mrf.mxu1  ;;  %5493 = vmatpush3.msra.mxu1 %v4248_v40  ;;  %5465 = vmatprep.subr.mxu0 %v5942_v2  ;;  %v4281_v40 = vld [vmem:[%s8294_s3 + $0x7e0] sm:$0xff]  ;;  %v4280_v58 = vld [vmem:[%s8294_s3 + $0x7d8] sm:$0xff]  ;;  %v4279_v14 = vld [vmem:[%s8294_s3 + $0x7d0] sm:$0xff] }
 0x362   :  { %5494 = vmatprep.subr.mxu1 %v5942_v2  ;;  %5466 = vmatpush3.msra.mxu0 %v4232_v13  ;;  %v4264_v13 = vld [vmem:[%s8294_s3 + $0x768] sm:$0xff]  ;;  %v4262_v62 = vld [vmem:[%s8294_s3 + $0x758] sm:$0xff] }
 0x363   :  { %5495 = vmatpush3.msra.mxu1 %v4247_v31  ;;  %5467 = vmatprep.subr.mxu0 %v5942_v2  ;;  %v4263_v31 = vld [vmem:[%s8294_s3 + $0x760] sm:$0xff] }
 0x364   :  { %5496 = vmatprep.subr.mxu1 %v5942_v2  ;;  %5468 = vmatpush3.msra.mxu0 %v4231_v63  ;;  %v4277_v63 = vld [vmem:[%s8294_s3 + $0x7c0] sm:$0xff] }
 0x365   :  { %5497 = vmatpush3.msra.mxu1 %v4246_v0  ;;  %5469 = vmatprep.mubr.msk.f32.mxu0 %vm5947_vm9, %v5942_v2  ;;  %v4261_v0 = vld [vmem:[%s8294_s3 + $0x750] sm:$0xff] }
 0x366   :  { %5498 = vmatprep.mubr.msk.f32.mxu1 %vm5947_vm9, %v5942_v2  ;;  %5501 = vmatprep.subr.mxu0 %v5942_v2 }
 0x367   :  { %5530 = vmatprep.subr.mxu1 %v5942_v2 }
 0x373   :  { %v842_v1 = vpop.permute.xlu1 %841  ;;  %v794_v3 = vpop.permute.xlu0 %793 }
 0x378   :  { %v796_v24 = vpop.permute.xlu1 %795  ;;  %v792_v26 = vpop.permute.xlu0 %791 }
 0x379   :  { %v807_v22 = vsel %vm96_vm4, %v792_v26, %v794_v3  ;;  %v808_v61 = vsel %vm96_vm4, %v794_v3, %v796_v24  ;;  %v4276_v24 = vld [vmem:[%s8294_s3 + $0x7b8] sm:$0xff] }
 0x37a   :  { %v1521_v23 = vpop.f32.mrf.mxu0  ;;  %v823_v9 = vmax.f32 %v6936_v57, %v807_v22  ;;  %v824_v12 = vmax.f32 %v6914_v49, %v808_v61  ;;  %v4288_v57 = vld [vmem:[%s8294_s3 + $0x818] sm:$0x7] }
 0x37b   :  { %v1614_v60 = vpop.f32.mrf.mxu1  ;;  %v1525_v4 = vadd.f32 %v1521_v23, %v1432_v34  ;;  %v4278_v34 = vld [vmem:[%s8294_s3 + $0x7c8] sm:$0xff] }
 0x37c   :  { %v5181_v6 = vpop.f32.mrf.mxu0 }
 0x37d   :  { %v5210_v5 = vpop.f32.mrf.mxu1  ;;  %v840_v10 = vpop.permute.xlu1 %839  ;;  %v7354_v11 = vadd.f32 %v1614_v60, %v1525_v4  ;;  %v4303_v60 = vld [vmem:[%s8294_s3 + $0x880] sm:$0x7]  ;;  %v4318_v4 = vld [vmem:[%s8294_s3 + $0x8e8] sm:$0x7]  ;;  %v4302_v6 = vld [vmem:[%s8294_s3 + $0x878] sm:$0xff] }
 0x37e   :  { %v855_v15 = vsel %vm507_vm7, %v840_v10, %v842_v1  ;;  %v844_v16 = vpop.permute.xlu0 %843  ;;  %v4301_v5 = vld [vmem:[%s8294_s3 + $0x870] sm:$0xff]  ;;  %v4316_v10 = vld [vmem:[%s8294_s3 + $0x8d8] sm:$0xff] }
 0x37f   :  { %v7358_v56 = vmax.f32 %v823_v9, %v855_v15  ;;  %v856_v59 = vsel %vm507_vm7, %v842_v1, %v844_v16  ;;  %v4317_v9 = vld [vmem:[%s8294_s3 + $0x8e0] sm:$0xff]  ;;  %v4315_v15 = vld [vmem:[%s8294_s3 + $0x8d0] sm:$0xff] }
 0x380   :  { %v7361_v17 = vmax.f32 %v824_v12, %v856_v59  ;;  %v4300_v12 = vld [vmem:[%s8294_s3 + $0x868] sm:$0xff]  ;;  %v4299_v16 = vld [vmem:[%s8294_s3 + $0x860] sm:$0xff] }
 0x381   :  { %v2471_v18 = vrot.slane %v7358_v56, 1  ;;  %v2935_v21 = vrot.slane %v7358_v56, 6  ;;  %v3028_v32 = vrot.slane %v7358_v56, 7  ;;  %v2563_v1 = vrot.slane %v7358_v56, 2  ;;  %v4314_v59 = vld [vmem:[%s8294_s3 + $0x8c8] sm:$0xff] }
 0x382   :  { %v2379_v19 = vrot.slane %v7361_v17, 7  ;;  %v2936_v29 = vrot.slane %v7361_v17, 5  ;;  %v3029_v33 = vrot.slane %v7361_v17, 6  ;;  %v2564_v3 = vrot.slane %v7361_v17, 1 }
 0x383   :  { %v2472_v49 = vsel %vm905_vm10, %v7361_v17, %v2471_v18  ;;  %v2656_v26 = vrot.slane %v7358_v56, 3  ;;  %v2657_v22 = vrot.slane %v7361_v17, 2  ;;  %v4298_v18 = vld [vmem:[%s8294_s3 + $0x858] sm:$0xff] }
 0x384   :  { %v2380_v25 = vsel %vm905_vm10, %v2379_v19, %v7358_v56  ;;  %5499 = vmatmul.mubr.msk.f32.vlgmr.msra.gmra.mxu1 %vm907_vm11, %v2472_v49  ;;  %v7398_v46 = vsel %vm905_vm10, %v2936_v29, %v2935_v21  ;;  %v7401_v47 = vsel %vm905_vm10, %v3029_v33, %v3028_v32  ;;  %v2565_v23 = vsel %vm905_vm10, %v2564_v3, %v2563_v1  ;;  %v4313_v19 = vld [vmem:[%s8294_s3 + $0x8c0] sm:$0xff]  ;;  %v4312_v49 = vld [vmem:[%s8294_s3 + $0x8b8] sm:$0xff]  ;;  %v4311_v21 = vld [vmem:[%s8294_s3 + $0x8b0] sm:$0xff] }
 0x385   :  { %5470 = vmatmul.mubr.msk.f32.vlgmr.msra.gmra.mxu0 %vm907_vm11, %v2380_v25  ;;  %5531 = vmatpush3.msk.msra.mxu1 %vm910_vm8, %v4288_v57  ;;  %v2658_v61 = vsel %vm905_vm10, %v2657_v22, %v2656_v26  ;;  %v4297_v57 = vld [vmem:[%s8294_s3 + $0x850] sm:$0xff]  ;;  %v4295_v25 = vld [vmem:[%s8294_s3 + $0x840] sm:$0xff]  ;;  %v4326_v1 = vld [vmem:[%s8294_s3 + $0x918] sm:$0xff] }
 0x386   :  { %5502 = vmatpush3.msk.msra.mxu0 %vm910_vm8, %v4273_v20  ;;  %5532 = vmatprep.subr.mxu1 %v5942_v2  ;;  %v4296_v20 = vld [vmem:[%s8294_s3 + $0x848] sm:$0xff]  ;;  %v4309_v29 = vld [vmem:[%s8294_s3 + $0x8a0] sm:$0xff]  ;;  %v4340_v26 = vld [vmem:[%s8294_s3 + $0x978] sm:$0xff] }
 0x387   :  { %5503 = vmatprep.subr.mxu0 %v5942_v2  ;;  %5533 = vmatpush3.msra.mxu1 %v4287_v27  ;;  %v4310_v27 = vld [vmem:[%s8294_s3 + $0x8a8] sm:$0xff]  ;;  %v4341_v3 = vld [vmem:[%s8294_s3 + $0x980] sm:$0xff] }
 0x388   :  { %5504 = vmatpush3.msra.mxu0 %v4272_v28  ;;  %5534 = vmatprep.subr.mxu1 %v5942_v2  ;;  %v4294_v28 = vld [vmem:[%s8294_s3 + $0x838] sm:$0xff]  ;;  %v4324_v22 = vld [vmem:[%s8294_s3 + $0x908] sm:$0xff] }
 0x389   :  { %5505 = vmatprep.subr.mxu0 %v5942_v2  ;;  %5535 = vmatpush3.msra.mxu1 %v4286_v35  ;;  %v4293_v35 = vld [vmem:[%s8294_s3 + $0x830] sm:$0xff] }
 0x38a   :  { %5506 = vmatpush3.msra.mxu0 %v4271_v36  ;;  %5536 = vmatprep.subr.mxu1 %v5942_v2 }
 0x38b   :  { %5507 = vmatprep.subr.mxu0 %v5942_v2  ;;  %5537 = vmatpush3.msra.mxu1 %v4285_v37  ;;  %v741_v42 = vpop.permute.xlu0 %740  ;;  %v4308_v37 = vld [vmem:[%s8294_s3 + $0x898] sm:$0xff] }
 0x38c   :  { %5508 = vmatpush3.msra.mxu0 %v4270_v39  ;;  %v753_v45 = vadd.f32 %v741_v42, %v717_v41  ;;  %v754_v48 = vadd.f32 %v741_v42, %v6309_v7  ;;  %5538 = vmatprep.subr.mxu1 %v5942_v2  ;;  %v4267_v7 = vld [vmem:[%s8294_s3 + $0x780] sm:$0xff]  ;;  %v752_v38 = vadd.f32 %v741_v42, %v6276_v55  ;;  %v4265_v55 = vld [vmem:[%s8294_s3 + $0x770] sm:$0xff] }
 0x38d   :  { %5509 = vmatprep.subr.mxu0 %v5942_v2  ;;  %5539 = vmatpush3.msra.mxu1 %v4284_v43  ;;  %v4292_v43 = vld [vmem:[%s8294_s3 + $0x828] sm:$0xff] }
 0x38e   :  { %5510 = vmatpush3.msra.mxu0 %v4269_v44  ;;  %5540 = vmatprep.subr.mxu1 %v5942_v2  ;;  %v766_v50 = vmax.f32 %v754_v48, 0.0  ;;  %v7431_v51 = vmax.f32 %v753_v45, 0.0  ;;  %v7458_v53 = vmax.f32 %v752_v38, 0.0  ;;  %v4291_v44 = vld [vmem:[%s8294_s3 + $0x820] sm:$0xff]  ;;  %v2749_v45 = vrot.slane %v7358_v56, 4  ;;  %v4332_v38 = vld [vmem:[%s8294_s3 + $0x948] sm:$0xff] }
 0x38f   :  { %5511 = vmatprep.subr.mxu0 %v5942_v2  ;;  %5541 = vmatpush3.msra.mxu1 %v4283_v54  ;;  %v2750_v48 = vrot.slane %v7361_v17, 3  ;;  %v4306_v54 = vld [vmem:[%s8294_s3 + $0x888] sm:$0xff] }
 0x390   :  { %5512 = vmatpush3.msra.mxu0 %v4268_v30  ;;  %5542 = vmatprep.subr.mxu1 %v5942_v2  ;;  %v2842_v30 = vrot.slane %v7358_v56, 5 }
 0x391   :  { %5513 = vmatprep.subr.mxu0 %v5942_v2  ;;  %801 = vrot.lane.b32.xlu0 %v766_v50, %s5944_s10 }
 0x392   :  { %799 = vrot.lane.b32.xlu1 %v7431_v51, %s5944_s10  ;;  %5514 = vmatpush3.msra.mxu0 %v4267_v7  ;;  %v2751_v7 = vsel %vm905_vm10, %v2750_v48, %v2749_v45  ;;  %v4368_v45 = vld [vmem:[%s8294_s3 + $0xa38] sm:$0xff] }
 0x393   :  { %5543 = vmatpush3.msra.mxu1 %v4282_v52  ;;  %5515 = vmatprep.subr.mxu0 %v5942_v2  ;;  %v4333_v52 = vld [vmem:[%s8294_s3 + $0x950] sm:$0x7] }
 0x394   :  { %5544 = vmatprep.subr.mxu1 %v5942_v2  ;;  %5516 = vmatpush3.msra.mxu0 %v4266_v8  ;;  %v4347_v8 = vld [vmem:[%s8294_s3 + $0x9b0] sm:$0xff] }
 0x395   :  { %5545 = vmatpush3.msra.mxu1 %v4281_v40  ;;  %5517 = vmatprep.subr.mxu0 %v5942_v2  ;;  %v4331_v40 = vld [vmem:[%s8294_s3 + $0x940] sm:$0xff] }
 0x396   :  { %5546 = vmatprep.subr.mxu1 %v5942_v2  ;;  %847 = vrot.lane.b32.xlu0 %v7431_v51, %s5945_s0 }
 0x397   :  { %797 = vrot.lane.b32.xlu1 %v7458_v53, %s5944_s10  ;;  %5518 = vmatpush3.msra.mxu0 %v4265_v55  ;;  %v4346_v55 = vld [vmem:[%s8294_s3 + $0x9a8] sm:$0xff] }
 0x398   :  { %5547 = vmatpush3.msra.mxu1 %v4280_v58  ;;  %5519 = vmatprep.subr.mxu0 %v5942_v2  ;;  %v4330_v58 = vld [vmem:[%s8294_s3 + $0x938] sm:$0xff] }
 0x399   :  { %5548 = vmatprep.subr.mxu1 %v5942_v2  ;;  %5520 = vmatpush3.msra.mxu0 %v4264_v13  ;;  %v4345_v13 = vld [vmem:[%s8294_s3 + $0x9a0] sm:$0xff] }
 0x39a   :  { %5549 = vmatpush3.msra.mxu1 %v4279_v14  ;;  %5521 = vmatprep.subr.mxu0 %v5942_v2  ;;  %v4329_v14 = vld [vmem:[%s8294_s3 + $0x930] sm:$0xff] }
 0x39b   :  { %5550 = vmatprep.subr.mxu1 %v5942_v2  ;;  %845 = vrot.lane.b32.xlu0 %v7458_v53, %s5945_s0 }
 0x39c   :  { %849 = vrot.lane.b32.xlu1 %v766_v50, %s5945_s0  ;;  %5522 = vmatpush3.msra.mxu0 %v4263_v31  ;;  %v2843_v50 = vrot.slane %v7361_v17, 4  ;;  %v4348_v17 = vld [vmem:[%s8294_s3 + $0x9b8] sm:$0x7] }
 0x39d   :  { %5551 = vmatpush3.msra.mxu1 %v4278_v34  ;;  %5523 = vmatprep.subr.mxu0 %v5942_v2  ;;  %v4344_v31 = vld [vmem:[%s8294_s3 + $0x998] sm:$0xff]  ;;  %v4328_v34 = vld [vmem:[%s8294_s3 + $0x928] sm:$0xff] }
 0x39e   :  { %5552 = vmatprep.subr.mxu1 %v5942_v2  ;;  %5524 = vmatpush3.msra.mxu0 %v4262_v62  ;;  %v2844_v56 = vsel %vm905_vm10, %v2843_v50, %v2842_v30  ;;  %v4343_v62 = vld [vmem:[%s8294_s3 + $0x990] sm:$0xff]  ;;  %v4352_v30 = vld [vmem:[%s8294_s3 + $0x9c8] sm:$0xff] }
 0x39f   :  { %5553 = vmatpush3.msra.mxu1 %v4277_v63  ;;  %5525 = vmatprep.subr.mxu0 %v5942_v2  ;;  %v4327_v63 = vld [vmem:[%s8294_s3 + $0x920] sm:$0xff] }
 0x3a0   :  { %5554 = vmatprep.subr.mxu1 %v5942_v2  ;;  %5526 = vmatpush3.msra.mxu0 %v4261_v0  ;;  %v4342_v0 = vld [vmem:[%s8294_s3 + $0x988] sm:$0xff] }
 0x3a1   :  { %5527 = vmatprep.mubr.msk.f32.mxu0 %vm5947_vm9, %v5942_v2  ;;  %5555 = vmatpush3.msra.mxu1 %v4276_v24  ;;  %v4325_v24 = vld [vmem:[%s8294_s3 + $0x910] sm:$0xff] }
 0x3a2   :  { %5556 = vmatprep.mubr.msk.f32.mxu1 %vm5947_vm9, %v5942_v2  ;;  %5528 = vmatmul.mubr.msk.f32.vlgmr.msra.gmra.mxu0 %vm907_vm11, %v2565_v23  ;;  %v4339_v23 = vld [vmem:[%s8294_s3 + $0x970] sm:$0xff] }
 0x3a3   :  { %5557 = vmatmul.mubr.msk.f32.vlgmr.msra.gmra.mxu1 %vm907_vm11, %v2658_v61  ;;  %5559 = vmatprep.subr.mxu0 %v5942_v2  ;;  %v4338_v61 = vld [vmem:[%s8294_s3 + $0x968] sm:$0xff] }
 0x3a4   :  { %5588 = vmatprep.subr.mxu1 %v5942_v2  ;;  %5560 = vmatpush3.msk.msra.mxu0 %vm910_vm8, %v4303_v60  ;;  %v4323_v60 = vld [vmem:[%s8294_s3 + $0x900] sm:$0xff] }
 0x3a5   :  { %5589 = vmatpush3.msk.msra.mxu1 %vm910_vm8, %v4318_v4  ;;  %5561 = vmatprep.subr.mxu0 %v5942_v2 }
 0x3a6   :  { %5590 = vmatprep.subr.mxu1 %v5942_v2  ;;  %5562 = vmatpush3.msra.mxu0 %v4302_v6  ;;  %v4322_v6 = vld [vmem:[%s8294_s3 + $0x8f8] sm:$0xff] }
 0x3a7   :  { %5591 = vmatpush3.msra.mxu1 %v4317_v9  ;;  %5563 = vmatprep.subr.mxu0 %v5942_v2 }
 0x3a8   :  { %5592 = vmatprep.subr.mxu1 %v5942_v2  ;;  %5564 = vmatpush3.msra.mxu0 %v4301_v5 }
 0x3a9   :  { %5593 = vmatpush3.msra.mxu1 %v4316_v10  ;;  %5565 = vmatprep.subr.mxu0 %v5942_v2  ;;  %v4337_v10 = vld [vmem:[%s8294_s3 + $0x960] sm:$0xff] }
 0x3aa   :  { %5594 = vmatprep.subr.mxu1 %v5942_v2  ;;  %5566 = vmatpush3.msra.mxu0 %v4300_v12 }
 0x3ab   :  { %5595 = vmatpush3.msra.mxu1 %v4315_v15  ;;  %5567 = vmatprep.subr.mxu0 %v5942_v2  ;;  %v4321_v15 = vld [vmem:[%s8294_s3 + $0x8f0] sm:$0xff] }
 0x3ac   :  { %5596 = vmatprep.subr.mxu1 %v5942_v2  ;;  %5568 = vmatpush3.msra.mxu0 %v4299_v16 }
 0x3ad   :  { %5597 = vmatpush3.msra.mxu1 %v4314_v59  ;;  %5569 = vmatprep.subr.mxu0 %v5942_v2 }
 0x3ae   :  { %5598 = vmatprep.subr.mxu1 %v5942_v2  ;;  %5570 = vmatpush3.msra.mxu0 %v4298_v18  ;;  %v4336_v18 = vld [vmem:[%s8294_s3 + $0x958] sm:$0xff] }
 0x3af   :  { %5599 = vmatpush3.msra.mxu1 %v4313_v19  ;;  %5571 = vmatprep.subr.mxu0 %v5942_v2  ;;  %v4363_v19 = vld [vmem:[%s8294_s3 + $0xa20] sm:$0x7] }
 0x3b0   :  { %5600 = vmatprep.subr.mxu1 %v5942_v2  ;;  %5572 = vmatpush3.msra.mxu0 %v4297_v57  ;;  %v4378_v57 = vld [vmem:[%s8294_s3 + $0xa88] sm:$0x7] }
 0x3b1   :  { %5601 = vmatpush3.msra.mxu1 %v4312_v49  ;;  %5573 = vmatprep.subr.mxu0 %v5942_v2  ;;  %v4362_v49 = vld [vmem:[%s8294_s3 + $0xa18] sm:$0xff] }
 0x3b2   :  { %5602 = vmatprep.subr.mxu1 %v5942_v2  ;;  %5574 = vmatpush3.msra.mxu0 %v4296_v20  ;;  %v4376_v20 = vld [vmem:[%s8294_s3 + $0xa78] sm:$0xff] }
 0x3b3   :  { %5603 = vmatpush3.msra.mxu1 %v4311_v21  ;;  %5575 = vmatprep.subr.mxu0 %v5942_v2  ;;  %v4360_v21 = vld [vmem:[%s8294_s3 + $0xa08] sm:$0xff] }
 0x3b4   :  { %5604 = vmatprep.subr.mxu1 %v5942_v2  ;;  %5576 = vmatpush3.msra.mxu0 %v4295_v25  ;;  %v1708_v32 = vpop.f32.mrf.mxu0  ;;  %v1800_v33 = vpop.f32.mrf.mxu1  ;;  %v4375_v25 = vld [vmem:[%s8294_s3 + $0xa70] sm:$0xff] }
 0x3b5   :  { %5605 = vmatpush3.msra.mxu1 %v4310_v27  ;;  %5577 = vmatprep.subr.mxu0 %v5942_v2  ;;  %v1712_v36 = vadd.f32 %v1708_v32, %v7354_v11  ;;  %v4307_v11 = vld [vmem:[%s8294_s3 + $0x890] sm:$0xff]  ;;  %v4359_v27 = vld [vmem:[%s8294_s3 + $0xa00] sm:$0xff] }
 0x3b6   :  { %5606 = vmatprep.subr.mxu1 %v5942_v2  ;;  %5578 = vmatpush3.msra.mxu0 %v4294_v28  ;;  %v5239_v39 = vpop.f32.mrf.mxu0  ;;  %v5268_v41 = vpop.f32.mrf.mxu1  ;;  %v4374_v28 = vld [vmem:[%s8294_s3 + $0xa68] sm:$0xff]  ;;  %v4373_v32 = vld [vmem:[%s8294_s3 + $0xa60] sm:$0xff] }
 0x3b7   :  { %5607 = vmatpush3.msra.mxu1 %v4309_v29  ;;  %5579 = vmatprep.subr.mxu0 %v5942_v2  ;;  %v7608_v42 = vadd.f32 %v1800_v33, %v1712_v36  ;;  %v4358_v29 = vld [vmem:[%s8294_s3 + $0x9f8] sm:$0xff]  ;;  %v4357_v33 = vld [vmem:[%s8294_s3 + $0x9f0] sm:$0xff]  ;;  %v4356_v36 = vld [vmem:[%s8294_s3 + $0x9e8] sm:$0xff] }
 0x3b8   :  { %5608 = vmatprep.subr.mxu1 %v5942_v2  ;;  %5580 = vmatpush3.msra.mxu0 %v4293_v35  ;;  %v4372_v35 = vld [vmem:[%s8294_s3 + $0xa58] sm:$0xff]  ;;  %v4355_v39 = vld [vmem:[%s8294_s3 + $0x9e0] sm:$0xff]  ;;  %v4370_v41 = vld [vmem:[%s8294_s3 + $0xa48] sm:$0xff] }
 0x3b9   :  { %5609 = vmatpush3.msra.mxu1 %v4308_v37  ;;  %5581 = vmatprep.subr.mxu0 %v5942_v2  ;;  %v4371_v37 = vld [vmem:[%s8294_s3 + $0xa50] sm:$0xff] }
 0x3ba   :  { %5610 = vmatprep.subr.mxu1 %v5942_v2  ;;  %5582 = vmatpush3.msra.mxu0 %v4292_v43  ;;  %v4354_v43 = vld [vmem:[%s8294_s3 + $0x9d8] sm:$0xff] }
 0x3bb   :  { %5611 = vmatpush3.msra.mxu1 %v4307_v11  ;;  %5583 = vmatprep.subr.mxu0 %v5942_v2  ;;  %v4353_v11 = vld [vmem:[%s8294_s3 + $0x9d0] sm:$0xff] }
 0x3bc   :  { %5612 = vmatprep.subr.mxu1 %v5942_v2  ;;  %5584 = vmatpush3.msra.mxu0 %v4291_v44 }
 0x3bd   :  { %5585 = vmatprep.mubr.msk.f32.mxu0 %vm5947_vm9, %v5942_v2  ;;  %5613 = vmatpush3.msra.mxu1 %v4306_v54 }
 0x3be   :  { %5614 = vmatprep.mubr.msk.f32.mxu1 %vm5947_vm9, %v5942_v2  ;;  %5586 = vmatmul.mubr.msk.f32.vlgmr.msra.gmra.mxu0 %vm907_vm11, %v2751_v7  ;;  %v4367_v7 = vld [vmem:[%s8294_s3 + $0xa30] sm:$0xff] }
 0x3bf   :  { %5615 = vmatmul.mubr.msk.f32.vlgmr.msra.gmra.mxu1 %vm907_vm11, %v2844_v56  ;;  %5617 = vmatprep.subr.mxu0 %v5942_v2 }
 0x3c0   :  { %5646 = vmatprep.subr.mxu1 %v5942_v2  ;;  %5618 = vmatpush3.msk.msra.mxu0 %vm910_vm8, %v4333_v52 }
 0x3c1   :  { %5647 = vmatpush3.msk.msra.mxu1 %vm910_vm8, %v4348_v17  ;;  %5619 = vmatprep.subr.mxu0 %v5942_v2  ;;  %v4351_v17 = vld [vmem:[%s8294_s3 + $0x9c0] sm:$0xff] }
 0x3c2   :  { %5648 = vmatprep.subr.mxu1 %v5942_v2  ;;  %5620 = vmatpush3.msra.mxu0 %v4332_v38  ;;  %v4366_v38 = vld [vmem:[%s8294_s3 + $0xa28] sm:$0xff] }
 0x3c3   :  { %5649 = vmatpush3.msra.mxu1 %v4347_v8  ;;  %5621 = vmatprep.subr.mxu0 %v5942_v2 }
 0x3c4   :  { %5650 = vmatprep.subr.mxu1 %v5942_v2  ;;  %5622 = vmatpush3.msra.mxu0 %v4331_v40 }
 0x3c5   :  { %5651 = vmatpush3.msra.mxu1 %v4346_v55  ;;  %5623 = vmatprep.subr.mxu0 %v5942_v2 }
 0x3c6   :  { %5652 = vmatprep.subr.mxu1 %v5942_v2  ;;  %5624 = vmatpush3.msra.mxu0 %v4330_v58 }
 0x3c7   :  { %5653 = vmatpush3.msra.mxu1 %v4345_v13  ;;  %5625 = vmatprep.subr.mxu0 %v5942_v2 }
 0x3c8   :  { %5654 = vmatprep.subr.mxu1 %v5942_v2  ;;  %5626 = vmatpush3.msra.mxu0 %v4329_v14 }
 0x3c9   :  { %5655 = vmatpush3.msra.mxu1 %v4344_v31  ;;  %5627 = vmatprep.subr.mxu0 %v5942_v2 }
 0x3ca   :  { %5656 = vmatprep.subr.mxu1 %v5942_v2  ;;  %5628 = vmatpush3.msra.mxu0 %v4328_v34 }
 0x3cb   :  { %5657 = vmatpush3.msra.mxu1 %v4343_v62  ;;  %5629 = vmatprep.subr.mxu0 %v5942_v2 }
 0x3cc   :  { %5658 = vmatprep.subr.mxu1 %v5942_v2  ;;  %5630 = vmatpush3.msra.mxu0 %v4327_v63 }
 0x3cd   :  { %5659 = vmatpush3.msra.mxu1 %v4342_v0  ;;  %5631 = vmatprep.subr.mxu0 %v5942_v2 }
 0x3ce   :  { %5660 = vmatprep.subr.mxu1 %v5942_v2  ;;  %5632 = vmatpush3.msra.mxu0 %v4326_v1 }
 0x3cf   :  { %5661 = vmatpush3.msra.mxu1 %v4341_v3  ;;  %5633 = vmatprep.subr.mxu0 %v5942_v2 }
 0x3d0   :  { %5662 = vmatprep.subr.mxu1 %v5942_v2  ;;  %5634 = vmatpush3.msra.mxu0 %v4325_v24 }
 0x3d1   :  { %5663 = vmatpush3.msra.mxu1 %v4340_v26  ;;  %5635 = vmatprep.subr.mxu0 %v5942_v2 }
 0x3d2   :  { %5664 = vmatprep.subr.mxu1 %v5942_v2  ;;  %5636 = vmatpush3.msra.mxu0 %v4324_v22  ;;  %v1893_v4 = vpop.f32.mrf.mxu0 }
 0x3d3   :  { %5665 = vmatpush3.msra.mxu1 %v4339_v23  ;;  %5637 = vmatprep.subr.mxu0 %v5942_v2  ;;  %v1897_v9 = vadd.f32 %v1893_v4, %v7608_v42  ;;  %v1986_v5 = vpop.f32.mrf.mxu1  ;;  %v4369_v42 = vld [vmem:[%s8294_s3 + $0xa40] sm:$0xff] }
 0x3d4   :  { %5666 = vmatprep.subr.mxu1 %v5942_v2  ;;  %5638 = vmatpush3.msra.mxu0 %v4323_v60  ;;  %v5297_v12 = vpop.f32.mrf.mxu0 }
 0x3d5   :  { %5667 = vmatpush3.msra.mxu1 %v4338_v61  ;;  %5639 = vmatprep.subr.mxu0 %v5942_v2  ;;  %v7737_v16 = vadd.f32 %v1986_v5, %v1897_v9  ;;  %v5326_v59 = vpop.f32.mrf.mxu1  ;;  %v4393_v5 = vld [vmem:[%s8294_s3 + $0xaf0] sm:$0x7] }
 0x3d6   :  { %5668 = vmatprep.subr.mxu1 %v5942_v2  ;;  %5640 = vmatpush3.msra.mxu0 %v4322_v6 }
 0x3d7   :  { %5669 = vmatpush3.msra.mxu1 %v4337_v10  ;;  %5641 = vmatprep.subr.mxu0 %v5942_v2 }
 0x3d8   :  { %5670 = vmatprep.subr.mxu1 %v5942_v2  ;;  %5642 = vmatpush3.msra.mxu0 %v4321_v15  ;;  %v4407_v15 = vld [vmem:[%s8294_s3 + $0xb50] sm:$0xff] }
 0x3d9   :  { %5643 = vmatprep.mubr.msk.f32.mxu0 %vm5947_vm9, %v5942_v2  ;;  %5671 = vmatpush3.msra.mxu1 %v4336_v18 }
 0x3da   :  { %5672 = vmatprep.mubr.msk.f32.mxu1 %vm5947_vm9, %v5942_v2  ;;  %5644 = vmatmul.mubr.msk.f32.vlgmr.msra.gmra.mxu0 %vm907_vm11, %v7398_v46  ;;  %v4377_v46 = vld [vmem:[%s8294_s3 + $0xa80] sm:$0xff] }
 0x3db   :  { %5673 = vmatmul.mubr.msk.f32.vlgmr.msra.gmra.mxu1 %vm907_vm11, %v7401_v47  ;;  %5675 = vmatprep.subr.mxu0 %v5942_v2  ;;  %v4361_v47 = vld [vmem:[%s8294_s3 + $0xa10] sm:$0xff] }
 0x3dc   :  { %5704 = vmatprep.subr.mxu1 %v5942_v2  ;;  %5676 = vmatpush3.msk.msra.mxu0 %vm910_vm8, %v4363_v19 }
 0x3dd   :  { %5705 = vmatpush3.msk.msra.mxu1 %vm910_vm8, %v4378_v57  ;;  %5677 = vmatprep.subr.mxu0 %v5942_v2  ;;  %v4406_v57 = vld [vmem:[%s8294_s3 + $0xb48] sm:$0xff] }
 0x3de   :  { %5706 = vmatprep.subr.mxu1 %v5942_v2  ;;  %5678 = vmatpush3.msra.mxu0 %v4362_v49  ;;  %v4391_v49 = vld [vmem:[%s8294_s3 + $0xae0] sm:$0xff] }
 0x3df   :  { %5707 = vmatpush3.msra.mxu1 %v4377_v46  ;;  %5679 = vmatprep.subr.mxu0 %v5942_v2 }
 0x3e0   :  { %5708 = vmatprep.subr.mxu1 %v5942_v2  ;;  %5680 = vmatpush3.msra.mxu0 %v4361_v47 }
 0x3e1   :  { %5709 = vmatpush3.msra.mxu1 %v4376_v20  ;;  %5681 = vmatprep.subr.mxu0 %v5942_v2  ;;  %v4405_v20 = vld [vmem:[%s8294_s3 + $0xb40] sm:$0xff] }
 0x3e2   :  { %5710 = vmatprep.subr.mxu1 %v5942_v2  ;;  %5682 = vmatpush3.msra.mxu0 %v4360_v21  ;;  %v4390_v21 = vld [vmem:[%s8294_s3 + $0xad8] sm:$0xff] }
 0x3e3   :  { %5711 = vmatpush3.msra.mxu1 %v4375_v25  ;;  %5683 = vmatprep.subr.mxu0 %v5942_v2  ;;  %v4404_v25 = vld [vmem:[%s8294_s3 + $0xb38] sm:$0xff] }
 0x3e4   :  { %5712 = vmatprep.subr.mxu1 %v5942_v2  ;;  %5684 = vmatpush3.msra.mxu0 %v4359_v27  ;;  %v4389_v27 = vld [vmem:[%s8294_s3 + $0xad0] sm:$0xff] }
 0x3e5   :  { %5713 = vmatpush3.msra.mxu1 %v4374_v28  ;;  %5685 = vmatprep.subr.mxu0 %v5942_v2  ;;  %v4403_v28 = vld [vmem:[%s8294_s3 + $0xb30] sm:$0xff] }
 0x3e6   :  { %5714 = vmatprep.subr.mxu1 %v5942_v2  ;;  %5686 = vmatpush3.msra.mxu0 %v4358_v29  ;;  %v4388_v29 = vld [vmem:[%s8294_s3 + $0xac8] sm:$0xff] }
 0x3e7   :  { %5715 = vmatpush3.msra.mxu1 %v4373_v32  ;;  %5687 = vmatprep.subr.mxu0 %v5942_v2  ;;  %v4402_v32 = vld [vmem:[%s8294_s3 + $0xb28] sm:$0xff] }
 0x3e8   :  { %5716 = vmatprep.subr.mxu1 %v5942_v2  ;;  %5688 = vmatpush3.msra.mxu0 %v4357_v33  ;;  %v4387_v33 = vld [vmem:[%s8294_s3 + $0xac0] sm:$0xff] }
 0x3e9   :  { %5717 = vmatpush3.msra.mxu1 %v4372_v35  ;;  %5689 = vmatprep.subr.mxu0 %v5942_v2  ;;  %v4401_v35 = vld [vmem:[%s8294_s3 + $0xb20] sm:$0xff] }
 0x3ea   :  { %5718 = vmatprep.subr.mxu1 %v5942_v2  ;;  %5690 = vmatpush3.msra.mxu0 %v4356_v36  ;;  %v4386_v36 = vld [vmem:[%s8294_s3 + $0xab8] sm:$0xff] }
 0x3eb   :  { %5719 = vmatpush3.msra.mxu1 %v4371_v37  ;;  %5691 = vmatprep.subr.mxu0 %v5942_v2  ;;  %v4400_v37 = vld [vmem:[%s8294_s3 + $0xb18] sm:$0xff] }
 0x3ec   :  { %5720 = vmatprep.subr.mxu1 %v5942_v2  ;;  %5692 = vmatpush3.msra.mxu0 %v4355_v39  ;;  %v4385_v39 = vld [vmem:[%s8294_s3 + $0xab0] sm:$0xff] }
 0x3ed   :  { %5721 = vmatpush3.msra.mxu1 %v4370_v41  ;;  %5693 = vmatprep.subr.mxu0 %v5942_v2  ;;  %v4399_v41 = vld [vmem:[%s8294_s3 + $0xb10] sm:$0xff] }
 0x3ee   :  { %v2079_v44 = vpop.f32.mrf.mxu0  ;;  %5722 = vmatprep.subr.mxu1 %v5942_v2  ;;  %5694 = vmatpush3.msra.mxu0 %v4354_v43  ;;  %v4384_v43 = vld [vmem:[%s8294_s3 + $0xaa8] sm:$0xff] }
 0x3ef   :  { %v2083_v48 = vadd.f32 %v2079_v44, %v7737_v16  ;;  %v2172_v54 = vpop.f32.mrf.mxu1  ;;  %5723 = vmatpush3.msra.mxu1 %v4369_v42  ;;  %5695 = vmatprep.subr.mxu0 %v5942_v2  ;;  %v4392_v16 = vld [vmem:[%s8294_s3 + $0xae8] sm:$0xff]  ;;  %v4397_v44 = vld [vmem:[%s8294_s3 + $0xb00] sm:$0xff] }
 0x3f0   :  { %v5355_v50 = vpop.f32.mrf.mxu0  ;;  %5724 = vmatprep.subr.mxu1 %v5942_v2  ;;  %5696 = vmatpush3.msra.mxu0 %v4353_v11  ;;  %v4398_v42 = vld [vmem:[%s8294_s3 + $0xb08] sm:$0xff]  ;;  %v4383_v11 = vld [vmem:[%s8294_s3 + $0xaa0] sm:$0xff] }
 0x3f1   :  { %v2176_v52 = vadd.f32 %v2172_v54, %v2083_v48  ;;  %v5384_v56 = vpop.f32.mrf.mxu1  ;;  %5725 = vmatpush3.msra.mxu1 %v4368_v45  ;;  %5697 = vmatprep.subr.mxu0 %v5942_v2  ;;  %v4382_v45 = vld [vmem:[%s8294_s3 + $0xa98] sm:$0xff] }
 0x3f2   :  { %5726 = vmatprep.subr.mxu1 %v5942_v2  ;;  %5698 = vmatpush3.msra.mxu0 %v4352_v30  ;;  %v4381_v30 = vld [vmem:[%s8294_s3 + $0xa90] sm:$0xff]  ;;  %v4396_v50 = vld [vmem:[%s8294_s3 + $0xaf8] sm:$0xff] }
 0x3f3   :  { %5727 = vmatpush3.msra.mxu1 %v4367_v7  ;;  %5699 = vmatprep.subr.mxu0 %v5942_v2 }
 0x3f4   :  { %5728 = vmatprep.subr.mxu1 %v5942_v2  ;;  %5700 = vmatpush3.msra.mxu0 %v4351_v17  ;;  %v4423_v17 = vld [vmem:[%s8294_s3 + $0xbc0] sm:$0x7] }
 0x3f5   :  { %5729 = vmatpush3.msra.mxu1 %v4366_v38  ;;  %5701 = vmatprep.mubr.msk.f32.mxu0 %vm5947_vm9, %v5942_v2 }
 0x3f6   :  { %5730 = vmatprep.mubr.msk.f32.mxu1 %vm5947_vm9, %v5942_v2  ;;  %5733 = vmatprep.subr.mxu0 %v5942_v2 }
 0x3f7   :  { %5762 = vmatprep.subr.mxu1 %v5942_v2 }
 0x403   :  { %v802_v8 = vpop.permute.xlu0 %801 }
 0x404   :  { %v800_v40 = vpop.permute.xlu1 %799 }
 0x405   :  { %v810_v31 = vsel %vm96_vm4, %v800_v40, %v802_v8  ;;  %v4438_v8 = vld [vmem:[%s8294_s3 + $0xc28] sm:$0x7] }
 0x406   :  { %v826_v26 = vmax.f32 %v7431_v51, %v810_v31  ;;  %v4435_v31 = vld [vmem:[%s8294_s3 + $0xc10] sm:$0xff] }
 0x408   :  { %v848_v55 = vpop.permute.xlu0 %847 }
 0x409   :  { %v798_v58 = vpop.permute.xlu1 %797 }
 0x40a   :  { %v2265_v13 = vpop.f32.mrf.mxu0  ;;  %v809_v14 = vsel %vm96_vm4, %v798_v58, %v800_v40  ;;  %v4422_v40 = vld [vmem:[%s8294_s3 + $0xbb8] sm:$0xff]  ;;  %v4421_v58 = vld [vmem:[%s8294_s3 + $0xbb0] sm:$0xff] }
 0x40b   :  { %v2269_v34 = vadd.f32 %v2265_v13, %v2176_v52  ;;  %v2358_v62 = vpop.f32.mrf.mxu1  ;;  %v825_v1 = vmax.f32 %v7458_v53, %v809_v14  ;;  %v4408_v53 = vld [vmem:[%s8294_s3 + $0xb58] sm:$0x7]  ;;  %v4420_v14 = vld [vmem:[%s8294_s3 + $0xba8] sm:$0xff] }
 0x40c   :  { %v5413_v63 = vpop.f32.mrf.mxu0  ;;  %v4436_v13 = vld [vmem:[%s8294_s3 + $0xc18] sm:$0xff] }
 0x40d   :  { %v7868_v0 = vadd.f32 %v2358_v62, %v2269_v34  ;;  %v5442_v3 = vpop.f32.mrf.mxu1  ;;  %v846_v24 = vpop.permute.xlu0 %845  ;;  %v4419_v34 = vld [vmem:[%s8294_s3 + $0xba0] sm:$0xff]  ;;  %v4434_v62 = vld [vmem:[%s8294_s3 + $0xc08] sm:$0xff]  ;;  %v4418_v63 = vld [vmem:[%s8294_s3 + $0xb98] sm:$0xff] }
 0x40e   :  { %v857_v22 = vsel %vm507_vm7, %v846_v24, %v848_v55  ;;  %v850_v23 = vpop.permute.xlu1 %849  ;;  %v4417_v3 = vld [vmem:[%s8294_s3 + $0xb90] sm:$0xff]  ;;  %v4432_v24 = vld [vmem:[%s8294_s3 + $0xbf8] sm:$0xff] }
 0x40f   :  { %v7873_v60 = vmax.f32 %v825_v1, %v857_v22  ;;  %v858_v61 = vsel %vm507_vm7, %v848_v55, %v850_v23  ;;  %v4437_v55 = vld [vmem:[%s8294_s3 + $0xc20] sm:$0xff]  ;;  %v4431_v22 = vld [vmem:[%s8294_s3 + $0xbf0] sm:$0xff] }
 0x410   :  { %v7876_v4 = vmax.f32 %v826_v26, %v858_v61  ;;  %v4433_v1 = vld [vmem:[%s8294_s3 + $0xc00] sm:$0xff]  ;;  %v4416_v26 = vld [vmem:[%s8294_s3 + $0xb88] sm:$0xff] }
 0x411   :  { %v3215_v6 = vrot.slane %v7873_v60, 1  ;;  %v3679_v10 = vrot.slane %v7873_v60, 6  ;;  %v3772_v18 = vrot.slane %v7873_v60, 7  ;;  %v3307_v48 = vrot.slane %v7873_v60, 2  ;;  %v4415_v23 = vld [vmem:[%s8294_s3 + $0xb80] sm:$0xff]  ;;  %v4430_v61 = vld [vmem:[%s8294_s3 + $0xbe8] sm:$0xff] }
 0x412   :  { %v3123_v9 = vrot.slane %v7876_v4, 7  ;;  %v3680_v59 = vrot.slane %v7876_v4, 5  ;;  %v3773_v19 = vrot.slane %v7876_v4, 6  ;;  %v3308_v54 = vrot.slane %v7876_v4, 1 }
 0x413   :  { %v3216_v51 = vsel %vm905_vm10, %v7876_v4, %v3215_v6  ;;  %v3400_v7 = vrot.slane %v7873_v60, 3  ;;  %v3401_v52 = vrot.slane %v7876_v4, 2  ;;  %v4414_v6 = vld [vmem:[%s8294_s3 + $0xb78] sm:$0xff] }
 0x414   :  { %v3124_v12 = vsel %vm905_vm10, %v3123_v9, %v7873_v60  ;;  %5731 = vmatmul.mubr.msk.f32.vlgmr.msra.gmra.mxu1 %vm907_vm11, %v3216_v51  ;;  %v7913_v46 = vsel %vm905_vm10, %v3680_v59, %v3679_v10  ;;  %v7916_v47 = vsel %vm905_vm10, %v3773_v19, %v3772_v18  ;;  %v3309_v56 = vsel %vm905_vm10, %v3308_v54, %v3307_v48  ;;  %v4429_v9 = vld [vmem:[%s8294_s3 + $0xbe0] sm:$0xff]  ;;  %v4428_v51 = vld [vmem:[%s8294_s3 + $0xbd8] sm:$0xff]  ;;  %v4445_v54 = vld [vmem:[%s8294_s3 + $0xc50] sm:$0xff] }
 0x415   :  { %5702 = vmatmul.mubr.msk.f32.vlgmr.msra.gmra.mxu0 %vm907_vm11, %v3124_v12  ;;  %5763 = vmatpush3.msk.msra.mxu1 %vm910_vm8, %v4408_v53  ;;  %v3402_v38 = vsel %vm905_vm10, %v3401_v52, %v3400_v7  ;;  %v4413_v53 = vld [vmem:[%s8294_s3 + $0xb70] sm:$0xff]  ;;  %v3493_v59 = vrot.slane %v7873_v60, 4  ;;  %v3494_v18 = vrot.slane %v7876_v4, 3  ;;  %v4461_v48 = vld [vmem:[%s8294_s3 + $0xcc0] sm:$0xff] }
 0x416   :  { %5734 = vmatpush3.msk.msra.mxu0 %vm910_vm8, %v4393_v5  ;;  %5764 = vmatprep.subr.mxu1 %v5942_v2  ;;  %v4412_v5 = vld [vmem:[%s8294_s3 + $0xb68] sm:$0xff]  ;;  %v4427_v12 = vld [vmem:[%s8294_s3 + $0xbd0] sm:$0xff]  ;;  %v4443_v52 = vld [vmem:[%s8294_s3 + $0xc40] sm:$0xff] }
 0x417   :  { %5735 = vmatprep.subr.mxu0 %v5942_v2  ;;  %5765 = vmatpush3.msra.mxu1 %v4407_v15  ;;  %v4459_v7 = vld [vmem:[%s8294_s3 + $0xcb0] sm:$0xff] }
 0x418   :  { %5736 = vmatpush3.msra.mxu0 %v4392_v16  ;;  %5766 = vmatprep.subr.mxu1 %v5942_v2  ;;  %v4411_v16 = vld [vmem:[%s8294_s3 + $0xb60] sm:$0xff] }
 0x419   :  { %5737 = vmatprep.subr.mxu0 %v5942_v2  ;;  %5767 = vmatpush3.msra.mxu1 %v4406_v57 }
 0x41a   :  { %5738 = vmatpush3.msra.mxu0 %v4391_v49  ;;  %5768 = vmatprep.subr.mxu1 %v5942_v2  ;;  %v4426_v49 = vld [vmem:[%s8294_s3 + $0xbc8] sm:$0xff] }
 0x41b   :  { %5739 = vmatprep.subr.mxu0 %v5942_v2  ;;  %5769 = vmatpush3.msra.mxu1 %v4405_v20  ;;  %v3586_v20 = vrot.slane %v7873_v60, 5  ;;  %v4453_v60 = vld [vmem:[%s8294_s3 + $0xc90] sm:$0x7] }
 0x41c   :  { %5740 = vmatpush3.msra.mxu0 %v4390_v21  ;;  %5770 = vmatprep.subr.mxu1 %v5942_v2  ;;  %v3587_v21 = vrot.slane %v7876_v4, 4 }
 0x41d   :  { %5741 = vmatprep.subr.mxu0 %v5942_v2  ;;  %5771 = vmatpush3.msra.mxu1 %v4404_v25 }
 0x41e   :  { %5742 = vmatpush3.msra.mxu0 %v4389_v27  ;;  %5772 = vmatprep.subr.mxu1 %v5942_v2  ;;  %v3588_v4 = vsel %vm905_vm10, %v3587_v21, %v3586_v20 }
 0x41f   :  { %5743 = vmatprep.subr.mxu0 %v5942_v2  ;;  %5773 = vmatpush3.msra.mxu1 %v4403_v28  ;;  %v4468_v28 = vld [vmem:[%s8294_s3 + $0xcf8] sm:$0x7] }
 0x420   :  { %5744 = vmatpush3.msra.mxu0 %v4388_v29  ;;  %5774 = vmatprep.subr.mxu1 %v5942_v2  ;;  %v4452_v29 = vld [vmem:[%s8294_s3 + $0xc88] sm:$0xff] }
 0x421   :  { %5745 = vmatprep.subr.mxu0 %v5942_v2  ;;  %5775 = vmatpush3.msra.mxu1 %v4402_v32  ;;  %v4467_v32 = vld [vmem:[%s8294_s3 + $0xcf0] sm:$0xff] }
 0x422   :  { %5746 = vmatpush3.msra.mxu0 %v4387_v33  ;;  %5776 = vmatprep.subr.mxu1 %v5942_v2  ;;  %v4451_v33 = vld [vmem:[%s8294_s3 + $0xc80] sm:$0xff] }
 0x423   :  { %5747 = vmatprep.subr.mxu0 %v5942_v2  ;;  %5777 = vmatpush3.msra.mxu1 %v4401_v35  ;;  %v4466_v35 = vld [vmem:[%s8294_s3 + $0xce8] sm:$0xff] }
 0x424   :  { %5748 = vmatpush3.msra.mxu0 %v4386_v36  ;;  %5778 = vmatprep.subr.mxu1 %v5942_v2  ;;  %v4450_v36 = vld [vmem:[%s8294_s3 + $0xc78] sm:$0xff] }
 0x425   :  { %5749 = vmatprep.subr.mxu0 %v5942_v2  ;;  %5779 = vmatpush3.msra.mxu1 %v4400_v37  ;;  %v4465_v37 = vld [vmem:[%s8294_s3 + $0xce0] sm:$0xff] }
 0x426   :  { %5750 = vmatpush3.msra.mxu0 %v4385_v39  ;;  %5780 = vmatprep.subr.mxu1 %v5942_v2  ;;  %v4449_v39 = vld [vmem:[%s8294_s3 + $0xc70] sm:$0xff] }
 0x427   :  { %5751 = vmatprep.subr.mxu0 %v5942_v2  ;;  %5781 = vmatpush3.msra.mxu1 %v4399_v41  ;;  %v4464_v41 = vld [vmem:[%s8294_s3 + $0xcd8] sm:$0xff] }
 0x428   :  { %5752 = vmatpush3.msra.mxu0 %v4384_v43  ;;  %5782 = vmatprep.subr.mxu1 %v5942_v2  ;;  %v4448_v43 = vld [vmem:[%s8294_s3 + $0xc68] sm:$0xff] }
 0x429   :  { %5753 = vmatprep.subr.mxu0 %v5942_v2  ;;  %5783 = vmatpush3.msra.mxu1 %v4398_v42  ;;  %v4463_v42 = vld [vmem:[%s8294_s3 + $0xcd0] sm:$0xff] }
 0x42a   :  { %5754 = vmatpush3.msra.mxu0 %v4383_v11  ;;  %5784 = vmatprep.subr.mxu1 %v5942_v2  ;;  %v4447_v11 = vld [vmem:[%s8294_s3 + $0xc60] sm:$0xff] }
 0x42b   :  { %5755 = vmatprep.subr.mxu0 %v5942_v2  ;;  %5785 = vmatpush3.msra.mxu1 %v4397_v44  ;;  %v4462_v44 = vld [vmem:[%s8294_s3 + $0xcc8] sm:$0xff] }
 0x42c   :  { %5756 = vmatpush3.msra.mxu0 %v4382_v45  ;;  %5786 = vmatprep.subr.mxu1 %v5942_v2  ;;  %v4446_v45 = vld [vmem:[%s8294_s3 + $0xc58] sm:$0xff] }
 0x42d   :  { %5757 = vmatprep.subr.mxu0 %v5942_v2  ;;  %5759 = vmatprep.mubr.msk.f32.mxu0 %vm5947_vm9, %v5942_v2 }
 0x42e   :  { %5758 = vmatpush3.msra.mxu0 %v4381_v30  ;;  %5787 = vmatpush3.msra.mxu1 %v4396_v50  ;;  %v4460_v30 = vld [vmem:[%s8294_s3 + $0xcb8] sm:$0xff]  ;;  %v4444_v50 = vld [vmem:[%s8294_s3 + $0xc48] sm:$0xff] }
 0x42f   :  { %5788 = vmatprep.mubr.msk.f32.mxu1 %vm5947_vm9, %v5942_v2  ;;  %5760 = vmatmul.mubr.msk.f32.vlgmr.msra.gmra.mxu0 %vm907_vm11, %v3309_v56  ;;  %v4458_v56 = vld [vmem:[%s8294_s3 + $0xca8] sm:$0xff] }
 0x430   :  { %5789 = vmatmul.mubr.msk.f32.vlgmr.msra.gmra.mxu1 %vm907_vm11, %v3402_v38  ;;  %5791 = vmatprep.subr.mxu0 %v5942_v2  ;;  %v4457_v38 = vld [vmem:[%s8294_s3 + $0xca0] sm:$0xff] }
 0x431   :  { %5820 = vmatprep.subr.mxu1 %v5942_v2  ;;  %5792 = vmatpush3.msk.msra.mxu0 %vm910_vm8, %v4423_v17  ;;  %v4442_v17 = vld [vmem:[%s8294_s3 + $0xc38] sm:$0xff] }
 0x432   :  { %5821 = vmatpush3.msk.msra.mxu1 %vm910_vm8, %v4438_v8  ;;  %5793 = vmatprep.subr.mxu0 %v5942_v2  ;;  %v4441_v8 = vld [vmem:[%s8294_s3 + $0xc30] sm:$0xff] }
 0x433   :  { %5822 = vmatprep.subr.mxu1 %v5942_v2  ;;  %5794 = vmatpush3.msra.mxu0 %v4422_v40 }
 0x434   :  { %5823 = vmatpush3.msra.mxu1 %v4437_v55  ;;  %5795 = vmatprep.subr.mxu0 %v5942_v2  ;;  %v4456_v55 = vld [vmem:[%s8294_s3 + $0xc98] sm:$0xff] }
 0x435   :  { %5824 = vmatprep.subr.mxu1 %v5942_v2  ;;  %5796 = vmatpush3.msra.mxu0 %v4421_v58 }
 0x436   :  { %5825 = vmatpush3.msra.mxu1 %v4436_v13  ;;  %5797 = vmatprep.subr.mxu0 %v5942_v2 }
 0x437   :  { %5826 = vmatprep.subr.mxu1 %v5942_v2  ;;  %5798 = vmatpush3.msra.mxu0 %v4420_v14 }
 0x438   :  { %5827 = vmatpush3.msra.mxu1 %v4435_v31  ;;  %5799 = vmatprep.subr.mxu0 %v5942_v2 }
 0x439   :  { %5828 = vmatprep.subr.mxu1 %v5942_v2  ;;  %5800 = vmatpush3.msra.mxu0 %v4419_v34 }
 0x43a   :  { %5829 = vmatpush3.msra.mxu1 %v4434_v62  ;;  %5801 = vmatprep.subr.mxu0 %v5942_v2 }
 0x43b   :  { %5830 = vmatprep.subr.mxu1 %v5942_v2  ;;  %5802 = vmatpush3.msra.mxu0 %v4418_v63 }
 0x43c   :  { %5831 = vmatpush3.msra.mxu1 %v4433_v1  ;;  %5803 = vmatprep.subr.mxu0 %v5942_v2 }
 0x43d   :  { %5832 = vmatprep.subr.mxu1 %v5942_v2  ;;  %5804 = vmatpush3.msra.mxu0 %v4417_v3 }
 0x43e   :  { %5833 = vmatpush3.msra.mxu1 %v4432_v24  ;;  %5805 = vmatprep.subr.mxu0 %v5942_v2 }
 0x43f   :  { %5834 = vmatprep.subr.mxu1 %v5942_v2  ;;  %5806 = vmatpush3.msra.mxu0 %v4416_v26 }
 0x440   :  { %5835 = vmatpush3.msra.mxu1 %v4431_v22  ;;  %5807 = vmatprep.subr.mxu0 %v5942_v2  ;;  %v3867_v22 = vld [vmem:[%s8295_s5 + $0x38] sm:$0xff] }
 0x441   :  { %5836 = vmatprep.subr.mxu1 %v5942_v2  ;;  %5808 = vmatpush3.msra.mxu0 %v4415_v23 }
 0x442   :  { %5837 = vmatpush3.msra.mxu1 %v4430_v61  ;;  %5809 = vmatprep.subr.mxu0 %v5942_v2 }
 0x443   :  { %5838 = vmatprep.subr.mxu1 %v5942_v2  ;;  %5810 = vmatpush3.msra.mxu0 %v4414_v6 }
 0x444   :  { %5839 = vmatpush3.msra.mxu1 %v4429_v9  ;;  %5811 = vmatprep.subr.mxu0 %v5942_v2  ;;  %v2544_v10 = vpop.f32.mrf.mxu1 }
 0x445   :  { %5840 = vmatprep.subr.mxu1 %v5942_v2  ;;  %5812 = vmatpush3.msra.mxu0 %v4413_v53  ;;  %v2452_v15 = vpop.f32.mrf.mxu0 }
 0x446   :  { %5841 = vmatpush3.msra.mxu1 %v4428_v51  ;;  %5813 = vmatprep.subr.mxu0 %v5942_v2  ;;  %v2456_v19 = vadd.f32 %v2452_v15, %v7868_v0  ;;  %v5500_v57 = vpop.f32.mrf.mxu1  ;;  %v3495_v0 = vsel %vm905_vm10, %v3494_v18, %v3493_v59  ;;  %v3861_v15 = vld [vmem:[%s8295_s5 + $0x8] sm:$0xff]  ;;  %v12_v59 = vstv %s8296_s6 }
 0x447   :  { %5842 = vmatprep.subr.mxu1 %v5942_v2  ;;  %5814 = vmatpush3.msra.mxu0 %v4412_v5  ;;  %v5471_v25 = vpop.f32.mrf.mxu0  ;;  %v3864_v5 = vld [vmem:[%s8295_s5 + $0x20] sm:$0xff]  ;;  %13 = vst [vmem:[#allocation3] sm:$0x1] %v12_v59 }
 0x448   :  { %5843 = vmatpush3.msra.mxu1 %v4427_v12  ;;  %5815 = vmatprep.subr.mxu0 %v5942_v2  ;;  %v8122_v27 = vadd.f32 %v2544_v10, %v2456_v19  ;;  %v3863_v10 = vld [vmem:[%s8295_s5 + $0x18] sm:$0xff]  ;;  %v3862_v12 = vld [vmem:[%s8295_s5 + $0x10] sm:$0xff] }
 0x449   :  { %5844 = vmatprep.subr.mxu1 %v5942_v2  ;;  %5816 = vmatpush3.msra.mxu0 %v4411_v16  ;;  %v3860_v16 = vld [vmem:[%s8295_s5] sm:$0xff] }
 0x44a   :  { %5817 = vmatprep.mubr.msk.f32.mxu0 %vm5947_vm9, %v5942_v2  ;;  %5845 = vmatpush3.msra.mxu1 %v4426_v49 }
 0x44b   :  { %5846 = vmatprep.mubr.msk.f32.mxu1 %vm5947_vm9, %v5942_v2  ;;  %5818 = vmatmul.mubr.msk.f32.vlgmr.msra.gmra.mxu0 %vm907_vm11, %v3495_v0 }
 0x44c   :  { %5847 = vmatmul.mubr.msk.f32.vlgmr.msra.gmra.mxu1 %vm907_vm11, %v3588_v4  ;;  %5849 = vmatprep.subr.mxu0 %v5942_v2 }
 0x44d   :  { %5878 = vmatprep.subr.mxu1 %v5942_v2  ;;  %5850 = vmatpush3.msk.msra.mxu0 %vm910_vm8, %v4453_v60 }
 0x44e   :  { %5879 = vmatpush3.msk.msra.mxu1 %vm910_vm8, %v4468_v28  ;;  %5851 = vmatprep.subr.mxu0 %v5942_v2 }
 0x44f   :  { %5880 = vmatprep.subr.mxu1 %v5942_v2  ;;  %5852 = vmatpush3.msra.mxu0 %v4452_v29 }
 0x450   :  { %5881 = vmatpush3.msra.mxu1 %v4467_v32  ;;  %5853 = vmatprep.subr.mxu0 %v5942_v2 }
 0x451   :  { %5882 = vmatprep.subr.mxu1 %v5942_v2  ;;  %5854 = vmatpush3.msra.mxu0 %v4451_v33 }
 0x452   :  { %5883 = vmatpush3.msra.mxu1 %v4466_v35  ;;  %5855 = vmatprep.subr.mxu0 %v5942_v2 }
 0x453   :  { %5884 = vmatprep.subr.mxu1 %v5942_v2  ;;  %5856 = vmatpush3.msra.mxu0 %v4450_v36 }
 0x454   :  { %5885 = vmatpush3.msra.mxu1 %v4465_v37  ;;  %5857 = vmatprep.subr.mxu0 %v5942_v2 }
 0x455   :  { %5886 = vmatprep.subr.mxu1 %v5942_v2  ;;  %5858 = vmatpush3.msra.mxu0 %v4449_v39 }
 0x456   :  { %5887 = vmatpush3.msra.mxu1 %v4464_v41  ;;  %5859 = vmatprep.subr.mxu0 %v5942_v2 }
 0x457   :  { %5888 = vmatprep.subr.mxu1 %v5942_v2  ;;  %5860 = vmatpush3.msra.mxu0 %v4448_v43  ;;  %v4471_v43 = vld [vmem:[%s8297_s4] ss:$0 sm:$0xff] }
 0x458   :  { %5889 = vmatpush3.msra.mxu1 %v4463_v42  ;;  %5861 = vmatprep.subr.mxu0 %v5942_v2 }
 0x459   :  { %5890 = vmatprep.subr.mxu1 %v5942_v2  ;;  %5862 = vmatpush3.msra.mxu0 %v4447_v11 }
 0x45a   :  { %5891 = vmatpush3.msra.mxu1 %v4462_v44  ;;  %5863 = vmatprep.subr.mxu0 %v5942_v2 }
 0x45b   :  { %5892 = vmatprep.subr.mxu1 %v5942_v2  ;;  %5864 = vmatpush3.msra.mxu0 %v4446_v45 }
 0x45c   :  { %5893 = vmatpush3.msra.mxu1 %v4461_v48  ;;  %5865 = vmatprep.subr.mxu0 %v5942_v2 }
 0x45d   :  { %5894 = vmatprep.subr.mxu1 %v5942_v2  ;;  %5866 = vmatpush3.msra.mxu0 %v4445_v54  ;;  %v4472_v54 = vld [vmem:[#allocation3] ss:$0 sm:$0xff] }
 0x45e   :  { %5895 = vmatpush3.msra.mxu1 %v4460_v30  ;;  %5867 = vmatprep.subr.mxu0 %v5942_v2 }
 0x45f   :  { %5896 = vmatprep.subr.mxu1 %v5942_v2  ;;  %5868 = vmatpush3.msra.mxu0 %v4444_v50 }
 0x460   :  { %5897 = vmatpush3.msra.mxu1 %v4459_v7  ;;  %5869 = vmatprep.subr.mxu0 %v5942_v2 }
 0x461   :  { %5898 = vmatprep.subr.mxu1 %v5942_v2  ;;  %5870 = vmatpush3.msra.mxu0 %v4443_v52 }
 0x462   :  { %5899 = vmatpush3.msra.mxu1 %v4458_v56  ;;  %5871 = vmatprep.subr.mxu0 %v5942_v2  ;;  %v2637_v40 = vpop.f32.mrf.mxu0 }
 0x463   :  { %5900 = vmatprep.subr.mxu1 %v5942_v2  ;;  %5872 = vmatpush3.msra.mxu0 %v4442_v17  ;;  %v2641_v58 = vadd.f32 %v2637_v40, %v8122_v27  ;;  %v2730_v13 = vpop.f32.mrf.mxu1 }
 0x464   :  { %5901 = vmatpush3.msra.mxu1 %v4457_v38  ;;  %5873 = vmatprep.subr.mxu0 %v5942_v2  ;;  %v5529_v14 = vpop.f32.mrf.mxu0 }
 0x465   :  { %5902 = vmatprep.subr.mxu1 %v5942_v2  ;;  %5874 = vmatpush3.msra.mxu0 %v4441_v8  ;;  %v2734_v31 = vadd.f32 %v2730_v13, %v2641_v58  ;;  %v5558_v34 = vpop.f32.mrf.mxu1 }
 0x466   :  { %5875 = vmatprep.mubr.msk.f32.mxu0 %vm5947_vm9, %v5942_v2  ;;  %5903 = vmatpush3.msra.mxu1 %v4456_v55 }
 0x467   :  { %5904 = vmatprep.mubr.msk.f32.mxu1 %vm5947_vm9, %v5942_v2  ;;  %5876 = vmatmul.mubr.msk.f32.vlgmr.msra.gmra.mxu0 %vm907_vm11, %v7913_v46  ;;  %v3866_v46 = vld [vmem:[%s8295_s5 + $0x30] sm:$0xff] }
 0x468   :  { %5905 = vmatmul.mubr.msk.f32.vlgmr.msra.gmra.mxu1 %vm907_vm11, %v7916_v47  ;;  %5907 = vmatprep.subr.mxu0 %v5942_v2  ;;  %v3865_v47 = vld [vmem:[%s8295_s5 + $0x28] sm:$0xff] }
 0x469   :  { %5923 = vmatprep.mubr.msk.f32.mxu0 %vm5947_vm9, %v5942_v2  ;;  %5908 = vmatpush3.msra.mxu0 %v3867_v22 }
 0x46a   :  { %5909 = vmatprep.subr.mxu0 %v5942_v2 }
 0x46b   :  { %5910 = vmatpush3.msra.mxu0 %v3866_v46 }
 0x46c   :  { %5911 = vmatprep.subr.mxu0 %v5942_v2 }
 0x46d   :  { %5912 = vmatpush3.msra.mxu0 %v3865_v47 }
 0x46e   :  { %5913 = vmatprep.subr.mxu0 %v5942_v2 }
 0x46f   :  { %5914 = vmatpush3.msra.mxu0 %v3864_v5 }
 0x470   :  { %5915 = vmatprep.subr.mxu0 %v5942_v2 }
 0x471   :  { %5916 = vmatpush3.msra.mxu0 %v3863_v10 }
 0x472   :  { %5917 = vmatprep.subr.mxu0 %v5942_v2 }
 0x473   :  { %5918 = vmatpush3.msra.mxu0 %v3862_v12 }
 0x474   :  { %5919 = vmatprep.subr.mxu0 %v5942_v2 }
 0x475   :  { %5920 = vmatpush3.msra.mxu0 %v3861_v15 }
 0x476   :  { %5921 = vmatprep.subr.mxu0 %v5942_v2 }
 0x477   :  { %5922 = vmatpush3.msra.mxu0 %v3860_v16 }
 0x47e   :  { %v2823_v62 = vpop.f32.mrf.mxu0 }
 0x47f   :  { %v2827_v63 = vadd.f32 %v2823_v62, %v2734_v31  ;;  %v2916_v1 = vpop.f32.mrf.mxu1 }
 0x480   :  { %v5587_v3 = vpop.f32.mrf.mxu0 }
 0x481   :  { %v2920_v24 = vadd.f32 %v2916_v1, %v2827_v63  ;;  %v5616_v26 = vpop.f32.mrf.mxu1 }
 0x49a   :  { %v3009_v23 = vpop.f32.mrf.mxu0 }
 0x49b   :  { %v3013_v61 = vadd.f32 %v3009_v23, %v2920_v24  ;;  %v3102_v6 = vpop.f32.mrf.mxu1 }
 0x49c   :  { %v5645_v9 = vpop.f32.mrf.mxu0 }
 0x49d   :  { %v3106_v53 = vadd.f32 %v3102_v6, %v3013_v61  ;;  %v5674_v51 = vpop.f32.mrf.mxu1 }
 0x4d4   :  { %v3288_v18 = vpop.f32.mrf.mxu1 }
 0x4d5   :  { %v3196_v19 = vpop.f32.mrf.mxu0 }
 0x4d6   :  { %v3200_v57 = vadd.f32 %v3196_v19, %v3106_v53  ;;  %v5732_v49 = vpop.f32.mrf.mxu1 }
 0x4d7   :  { %v5703_v20 = vpop.f32.mrf.mxu0 }
 0x4d8   :  { %v3292_v21 = vadd.f32 %v3288_v18, %v3200_v57 }
 0x4ef   :  { %v3381_v25 = vpop.f32.mrf.mxu0 }
 0x4f0   :  { %v3474_v27 = vpop.f32.mrf.mxu1  ;;  %v3385_v32 = vadd.f32 %v3381_v25, %v3292_v21 }
 0x4f1   :  { %v5761_v0 = vpop.f32.mrf.mxu0 }
 0x4f2   :  { %v5790_v60 = vpop.f32.mrf.mxu1  ;;  %v3478_v33 = vadd.f32 %v3474_v27, %v3385_v32 }
 0x50b   :  { %v3567_v4 = vpop.f32.mrf.mxu0 }
 0x50c   :  { %v3660_v28 = vpop.f32.mrf.mxu1  ;;  %v3571_v35 = vadd.f32 %v3567_v4, %v3478_v33 }
 0x50d   :  { %v5819_v29 = vpop.f32.mrf.mxu0 }
 0x50e   :  { %v5848_v2 = vpop.f32.mrf.mxu1  ;;  %v3664_v36 = vadd.f32 %v3660_v28, %v3571_v35 }
 0x527   :  { %v3753_v37 = vpop.f32.mrf.mxu0 }
 0x528   :  { %v3757_v39 = vadd.f32 %v3753_v37, %v3664_v36  ;;  %v3846_v41 = vpop.f32.mrf.mxu1 }
 0x529   :  { %v5877_v42 = vpop.f32.mrf.mxu0 }
 0x52a   :  { %v3850_v11 = vadd.f32 %v3846_v41, %v3757_v39  ;;  %v5906_v44 = vpop.f32.mrf.mxu1 }
 0x52c   :  { %v3858_v45 = vadd.f32 %v4471_v43, %v3850_v11 }
 0x52e   :  { %v3859_v48 = vmax.f32 %v3858_v45, 0.0 }
 0x530   :  { %5924 = vmatmul.mubr.msk.f32.vlgmr.msra.gmra.mxu0 %vm3875_vm12, %v3859_v48 }
 0x5f0   :  { %v3945_v30 = vpop.f32.mrf.mxu0 }
 0x5f1   :  { %v3946_v50 = vadd.f32 %v4472_v54, %v3945_v30 }
 0x5f2   :  { %v5925_v7 = vpop.f32.mrf.mxu0 }
 0x5f3   :  { %v3949_v52 = vsub.f32 0.0, %v3946_v50 }
 0x5f5   :  { %v3950_v56 = vmul.f32 1.442695, %v3949_v52 }
 0x5f7   :  { %5938 = vpow2.f32 %v3950_v56 }
 0x604   :  { %v5939_v17 = vpop.eup %5938 }
 0x605   :  { %v3952_v38 = vadd.f32 1.0, %v5939_v17 }
 0x607   :  { %5940 = vrcp.f32 %v3952_v38 }
 0x614   :  { %v5941_v8 = vpop.eup %5940 }
 0x615   :  { %3956 = vst.msk [vmem:[%s8298_s7] sm:$0x3] %vm3955_vm13, %v5941_v8 }

</bundles_post_ra>
